<compile_context>
chip_gen: v5e
topology: v5e:2x2
jax: 0.10.0
libtpu: 0.0.40
codegen_flags: <defaults>
</compile_context>

<pallas_src>
import math
from functools import partial

import numpy as np
import jax
import jax.numpy as jnp
from jax.experimental import pallas as pl
from jax.experimental.pallas import tpu as pltpu

# ---------------- model config (small shapes consistent with FNO.__init__) ----
IN_CHANNELS = 3
OUT_CHANNELS = 1
HIDDEN = 32          # hidden_channels; forward's `x + temb[:, :, None]` requires
LIFTING = 32         # lifting_channels == hidden_channels
PROJECTION = 32      # projection_channels
N_LAYERS = 2
N_MODES = 8          # n_modes = (8,)
MLP_EXPANSION = 4.0
N_GROUPS = 4         # GroupNorm(num_groups=4)
EPS = 1e-5
BATCH = 2
SPATIAL = 64
HM = int(round(HIDDEN * MLP_EXPANSION))   # 128


# ---------------- in-kernel activations ---------------------------------------
def _gelu(x):
    # TODO(synk): tanh-approx GELU; PyTorch F.gelu default is erf-based (~1e-3 diff).
    return jax.nn.gelu(x, approximate=True)


def _gelu_fast(x):
    # cheap sigmoid-approx GELU (2 VPU + 1 EUP per element) for the big MLP hidden.
    # TODO(synk): ~1e-2 max deviation from erf-GELU at the tails.
    return x * jax.nn.sigmoid(1.702 * x)


def _silu(x):  # nn.SiLU()
    return x * jax.nn.sigmoid(x)


# ---------------- the single fused Pallas kernel -------------------------------
def _fno_fused_kernel(xt_ref, par_ref, b1_ref, gR_ref, gG2_ref,
                      F_ref, Iinv_ref, w1_ref, w2_ref, o_ref):
    """Entire FNO forward over the folded (C, B*S) tile; intermediates stay in VMEM."""
    f32, bf16 = jnp.float32, jnp.bfloat16
    dot = partial(jnp.dot, preferred_element_type=f32)

    # static sizes derived from ref shapes (keeps slicing shape-generic)
    H = par_ref.shape[0]                  # hidden channels
    Cin = xt_ref.shape[0] - H
    BM = F_ref.shape[1] // 2              # batch * retained modes
    HM_ = w1_ref.shape[0] // N_LAYERS     # MLP hidden channels
    # packed-parameter-slab lane offsets (must mirror the packing in fno_forward)
    p_pw1 = 0
    p_spec = p_pw1 + H
    p_lift = p_spec + N_LAYERS * 2 * BM
    p_cols = p_lift + Cin
    p_pb1 = p_cols + 5 * N_LAYERS
    p_pb2 = p_pb1 + 1
    p_pw2 = p_pb2 + 1

    par = par_ref[...]                    # (H, ~112) f32 slab: ~4 vregs, keep resident
    col = lambda k: par[:, k:k + 1]

    # Lifting (1x1 conv) fused with `x = x + temb[:, :, None]`
    # (the lifting bias is folded into the temb map by the wrapper).
    x = dot(par[:, p_lift:p_lift + Cin], xt_ref[H:, :]) + xt_ref[:H, :]   # (H, BS)

    for i in range(N_LAYERS):
        spec = p_spec + i * 2 * BM
        cols = p_cols + i * 5
        gamma, beta, fno_gate, b2, mlp_gate = (col(cols + k) for k in range(5))

        # preactivation: GroupNorm(GELU(x)).  Per-(batch, group) stats with TWO
        # fused MXU matmuls on the stacked [h ; h*h] operand (lane-avg per batch
        # via gR, channel-avg per group via block-diag gG2).  Stats stay in f32
        # to avoid E[x^2] - E[x]^2 cancellation.
        h = _gelu(x)
        hh = jnp.concatenate([h, h * h], axis=0)                 # (2H, BS)
        stats = dot(gG2_ref[...], dot(hh, gR_ref[...]))          # (2H, BS)
        mean, ex2 = stats[:H, :], stats[H:, :]
        inv = jax.lax.rsqrt(ex2 - mean * mean + EPS)
        hn = (h - mean) * inv * gamma + beta

        # separable spectral conv: ONE fused forward truncated-rDFT matmul
        # ([Fc | -Fs], fft_norm='ortho'), per-channel complex multiply of the
        # retained modes on the (H, 2*B*M) tile, ONE fused inverse matmul
        # ([Ic ; -Is]); soft-gated FNO skip fused in.  bf16 operands, f32 acc.
        # TODO(synk): FactorizedSpectralConv is called as convs[i]((x, temb));
        #   its temb path is not defined in the reference, so temb is unused here.
        xri = dot(hn.astype(bf16), F_ref[...])                   # (H, 2BM) = [xr | xi]
        xr, xi = xri[:, :BM], xri[:, BM:]
        wr = par[:, spec:spec + BM]
        wi = par[:, spec + BM:spec + 2 * BM]
        yri = jnp.concatenate([xr * wr - xi * wi, xr * wi + xi * wr], axis=1)
        x_fno = dot(yri.astype(bf16), Iinv_ref[...])             # (H, BS)
        x = x_fno + hn * fno_gate

        # MLP block (fc1 -> gelu -> fc2) + soft-gated MLP skip (skip taken before
        # the inter-block GELU, matching the reference ordering).  bf16 matmul
        # operands; the big (HM, BS) hidden GELU uses the cheap sigmoid form.
        # TODO(synk): the MLP's temb_dim path is not exercised by the visible
        #   forward (self.mlp[i](x) is called without temb), so it is omitted.
        x_skip = x * mlp_gate
        xg = _gelu(x) if i < N_LAYERS - 1 else x
        w1 = w1_ref[i * HM_:(i + 1) * HM_, :]                    # (HM, H) bf16
        w2 = w2_ref[:, i * HM_:(i + 1) * HM_]                    # (H, HM) bf16
        h1 = _gelu_fast(dot(w1, xg.astype(bf16)) + b1_ref[:, i:i + 1])
        x = dot(w2, h1.astype(bf16)) + b2 + x_skip               # (H, BS)

    # Projection: fc1 -> gelu -> fc2.  out_channels == 1, so fc2 is a per-channel
    # weighted sublane reduction instead of a 1-row matmul (avoids an M=1 drain).
    p = _gelu(dot(par[:, p_pw1:p_pw1 + H], x) + col(p_pb1))
    out = jnp.sum(p * col(p_pw2), axis=0, keepdims=True) + par[0:1, p_pb2:p_pb2 + 1]
    o_ref[...] = out.astype(o_ref.dtype)


# ---------------- compile-time constant matrices (numpy -> jaxpr constants) ----
def _fold_constants(B, S, M, C, groups):
    s = np.arange(S, dtype=np.float64)[:, None]
    m = np.arange(M, dtype=np.float64)[None, :]
    ang = 2.0 * np.pi * s * m / S
    scale = 1.0 / np.sqrt(S)                                  # fft_norm='ortho'
    fwd_c = np.cos(ang) * scale                               # (S, M)
    fwd_s = np.sin(ang) * scale
    alpha = np.where(np.arange(M) == 0, 1.0, 2.0)[:, None]    # irfft doubling, m>=1
    inv_c = np.cos(ang).T * alpha * scale                     # (M, S)
    inv_s = np.sin(ang).T * alpha * scale
    eye_b = np.eye(B)
    # fused forward basis [Fc | -Fs] (xi = -x@Fs) and fused inverse [Ic ; -Is]
    F = np.concatenate([np.kron(eye_b, fwd_c), -np.kron(eye_b, fwd_s)], axis=1)    # (BS, 2BM)
    Iinv = np.concatenate([np.kron(eye_b, inv_c), -np.kron(eye_b, inv_s)], axis=0)  # (2BM, BS)
    gR = np.kron(eye_b, np.full((S, S), 1.0 / S))             # lane avg per batch
    gs = C // groups
    gG = np.kron(np.eye(groups), np.full((gs, gs), 1.0 / gs))  # channel avg per group
    gG2 = np.kron(np.eye(2), gG)                              # block-diag for [h ; h*h]
    return (jnp.asarray(F, jnp.bfloat16), jnp.asarray(Iinv, jnp.bfloat16),
            jnp.asarray(gR, jnp.float32), jnp.asarray(gG2, jnp.float32))


# ---------------- glue: timestep embedding & parameter init ---------------------
def get_timestep_embedding(t, embedding_dim, max_positions=10000):
    half = embedding_dim // 2
    t = 1000.0 * t.astype(jnp.float32)
    emb = math.log(max_positions) / (half - 1)
    freqs = jnp.exp(jnp.arange(half, dtype=jnp.float32) * -emb)
    args = t[:, None] * freqs[None, :]
    return jnp.concatenate([jnp.sin(args), jnp.cos(args)], axis=1)


def init_params(key):
    H, PC = HIDDEN, PROJECTION
    keys = iter(jax.random.split(key, 64))

    def uniform_fan_avg(k, shape, scale=1.0):  # mirrors default_init() (fan_avg, uniform)
        fan_in, fan_out = shape[1], shape[0]
        var = scale / ((fan_in + fan_out) / 2.0)
        return (jax.random.uniform(k, shape, jnp.float32) * 2.0 - 1.0) * jnp.sqrt(3.0 * var)

    def conv_w(k, cout, cin):
        return jax.random.normal(k, (cout, cin), jnp.float32) / jnp.sqrt(cin)

    p = {
        "lift_w": conv_w(next(keys), H, IN_CHANNELS),
        "lift_b": jnp.zeros((H,), jnp.float32),
        "d0_w": uniform_fan_avg(next(keys), (LIFTING, LIFTING)),
        "d0_b": jnp.zeros((LIFTING,), jnp.float32),
        "d1_w": uniform_fan_avg(next(keys), (LIFTING, LIFTING)),
        "d1_b": jnp.zeros((LIFTING,), jnp.float32),
        "proj_w1": conv_w(next(keys), PC, H),
        "proj_b1": jnp.zeros((PC,), jnp.float32),
        "proj_w2": conv_w(next(keys), OUT_CHANNELS, PC),
        "proj_b2": jnp.zeros((OUT_CHANNELS,), jnp.float32),
        "layers": [],
    }
    spec_scale = 1.0 / HIDDEN  # separable spectral conv init: scale = 1 / in_channels
    for _ in range(N_LAYERS):
        p["layers"].append({
            "gn_gamma": jnp.ones((H,), jnp.float32),
            "gn_beta": jnp.zeros((H,), jnp.float32),
            "spec_wr": spec_scale * jax.random.normal(next(keys), (H, N_MODES), jnp.float32),
            "spec_wi": spec_scale * jax.random.normal(next(keys), (H, N_MODES), jnp.float32),
            "fno_gate": jnp.ones((H,), jnp.float32),   # SoftGating weight init = 1
            "mlp_w1": conv_w(next(keys), HM, H),
            "mlp_b1": jnp.zeros((HM,), jnp.float32),
            "mlp_w2": conv_w(next(keys), H, HM),
            "mlp_b2": jnp.zeros((H,), jnp.float32),
            "mlp_gate": jnp.ones((H,), jnp.float32),
        })
    return p


# ---------------- full forward (preactivation=True, group_norm, soft-gating) ----
def fno_forward(params, x, t):
    B, Cin, S = x.shape
    BS = B * S
    assert PROJECTION == HIDDEN  # required by the (H, .) parameter-slab packing

    # time-embedding MLP stays in XLA (tiny): temb = Dense1(SiLU(Dense0(embed(t))))
    temb = get_timestep_embedding(t, LIFTING)
    temb = temb @ params["d0_w"].T + params["d0_b"]
    temb = _silu(temb) @ params["d1_w"].T + params["d1_b"]            # (B, H)
    temb_map = jnp.repeat(jnp.transpose(temb), S, axis=1)             # (H, B*S)
    temb_map = temb_map + params["lift_b"][:, None]                   # fold lifting bias

    # fold batch into lanes: (B, Cin, S) -> (Cin, B*S); stack temb on top so the
    # kernel gets ONE activation input (temb rows first -> aligned slices).
    x_f = jnp.transpose(x, (1, 0, 2)).reshape(Cin, BS).astype(jnp.float32)
    xt = jnp.concatenate([temb_map.astype(jnp.float32), x_f], axis=0)  # (H+Cin, BS)

    F, Iinv, gR, gG2 = _fold_constants(B, S, N_MODES, HIDDEN, N_GROUPS)

    # --- pack all small per-layer / projection params into one (H, 112) f32 slab
    col = lambda v: v.reshape(-1, 1)
    slab = [params["proj_w1"]]                                            # p_pw1
    for lp in params["layers"]:                                           # p_spec
        slab += [jnp.tile(lp["spec_wr"], (1, B)), jnp.tile(lp["spec_wi"], (1, B))]
    slab.append(params["lift_w"])                                         # p_lift
    for lp in params["layers"]:                                           # p_cols
        slab += [col(lp["gn_gamma"]), col(lp["gn_beta"]), col(lp["fno_gate"]),
                 col(lp["mlp_b2"]), col(lp["mlp_gate"])]
    pb2_col = jnp.zeros((HIDDEN,), jnp.float32).at[0].set(params["proj_b2"][0])
    slab += [col(params["proj_b1"]), col(pb2_col), params["proj_w2"].reshape(-1, 1)]
    par = jnp.concatenate(slab, axis=1).astype(jnp.float32)               # (H, 112)

    b1_cols = jnp.stack([lp["mlp_b1"] for lp in params["layers"]], axis=1)      # (HM, L)
    w1_all = jnp.concatenate([lp["mlp_w1"] for lp in params["layers"]],
                             axis=0).astype(jnp.bfloat16)                       # (L*HM, H)
    w2_all = jnp.concatenate([lp["mlp_w2"] for lp in params["layers"]],
                             axis=1).astype(jnp.bfloat16)                       # (H, L*HM)

    inputs = [xt, par, b1_cols, gR, gG2, F, Iinv, w1_all, w2_all]
    vmem = pltpu.MemorySpace.VMEM
    # Single grid point: all resident data << 1 MiB on every TPU generation, so no
    # tiling; for much larger B*S add a ("parallel",) lane grid (v7x second TC).
    out = pl.pallas_call(
        _fno_fused_kernel,
        out_shape=jax.ShapeDtypeStruct((OUT_CHANNELS, BS), jnp.float32),
        in_specs=[pl.BlockSpec(memory_space=vmem) for _ in inputs],
        out_specs=pl.BlockSpec(memory_space=vmem),
    )(*inputs)

    # unfold lanes back to (B, OUT, S), then squeeze(1) since out_channels == 1
    out = out.reshape(OUT_CHANNELS, B, S).transpose(1, 0, 2)
    return out[:, 0, :]


if __name__ == "__main__":
    key = jax.random.PRNGKey(0)
    kp, kx, kt = jax.random.split(key, 3)
    params = init_params(kp)
    x = jax.random.normal(kx, (BATCH, IN_CHANNELS, SPATIAL), jnp.float32)
    t = jax.random.uniform(kt, (BATCH,), jnp.float32)
    out = jax.jit(fno_forward)(params, x, t)
    out = jax.block_until_ready(out)
    assert out.shape == (BATCH, SPATIAL) and out.dtype == jnp.float32
    assert bool(jnp.all(jnp.isfinite(out)))
    print("KERNEL_OK")
</pallas_src>

<mosaic_0001>
module attributes {stable_mosaic.version = 11 : i64} {
  func.func @_fno_fused_kernel(%arg0: memref<35x128xf32, #tpu.memory_space<vmem>>, %arg1: memref<32x112xf32, #tpu.memory_space<vmem>>, %arg2: memref<128x2xf32, #tpu.memory_space<vmem>>, %arg3: memref<128x128xf32, #tpu.memory_space<vmem>>, %arg4: memref<64x64xf32, #tpu.memory_space<vmem>>, %arg5: memref<128x32xbf16, #tpu.memory_space<vmem>>, %arg6: memref<32x128xbf16, #tpu.memory_space<vmem>>, %arg7: memref<256x32xbf16, #tpu.memory_space<vmem>>, %arg8: memref<32x256xbf16, #tpu.memory_space<vmem>>, %arg9: memref<1x128xf32, #tpu.memory_space<vmem>>) attributes {dimension_semantics = [], scalar_prefetch = 0 : i64, scratch_operands = 0 : i64, tpu.core_type = #tpu.core_type<tc>} {
    %c0 = arith.constant 0 : index
    %c0_0 = arith.constant 0 : index
    %0 = vector.load %arg1[%c0, %c0_0] : memref<32x112xf32, #tpu.memory_space<vmem>>, vector<32x112xf32>
    %1 = vector.extract_strided_slice %0 {offsets = [0, 96], sizes = [32, 3], strides = [1, 1]} : vector<32x112xf32> to vector<32x3xf32>
    %c32 = arith.constant 32 : index
    %c0_1 = arith.constant 0 : index
    %2 = vector.load %arg0[%c32, %c0_1] : memref<35x128xf32, #tpu.memory_space<vmem>>, vector<3x128xf32>
    %cst = arith.constant dense<0.000000e+00> : vector<32x128xf32>
    %3 = tpu.matmul %1, %2, %cst {dimension_numbers = #tpu.dot_dimension_numbers<[1], [0], [0], [1], [0, 0, 1, 1], [], []>} : vector<32x3xf32>, vector<3x128xf32>, vector<32x128xf32> -> vector<32x128xf32>
    %c0_2 = arith.constant 0 : index
    %c0_3 = arith.constant 0 : index
    %4 = vector.load %arg0[%c0_2, %c0_3] : memref<35x128xf32, #tpu.memory_space<vmem>>, vector<32x128xf32>
    %5 = arith.addf %3, %4 : vector<32x128xf32>
    %6 = vector.extract_strided_slice %0 {offsets = [0, 99], sizes = [32, 1], strides = [1, 1]} : vector<32x112xf32> to vector<32x1xf32>
    %7 = vector.extract_strided_slice %0 {offsets = [0, 100], sizes = [32, 1], strides = [1, 1]} : vector<32x112xf32> to vector<32x1xf32>
    %8 = vector.extract_strided_slice %0 {offsets = [0, 101], sizes = [32, 1], strides = [1, 1]} : vector<32x112xf32> to vector<32x1xf32>
    %9 = vector.extract_strided_slice %0 {offsets = [0, 102], sizes = [32, 1], strides = [1, 1]} : vector<32x112xf32> to vector<32x1xf32>
    %10 = vector.extract_strided_slice %0 {offsets = [0, 103], sizes = [32, 1], strides = [1, 1]} : vector<32x112xf32> to vector<32x1xf32>
    %11 = arith.mulf %5, %5 : vector<32x128xf32>
    %12 = arith.mulf %5, %11 : vector<32x128xf32>
    %cst_4 = arith.constant 4.471500e-02 : f32
    %13 = vector.broadcast %cst_4 : f32 to vector<32x128xf32>
    %14 = arith.mulf %13, %12 : vector<32x128xf32>
    %15 = arith.addf %5, %14 : vector<32x128xf32>
    %cst_5 = arith.constant 0.797884583 : f32
    %16 = vector.broadcast %cst_5 : f32 to vector<32x128xf32>
    %17 = arith.mulf %16, %15 : vector<32x128xf32>
    %18 = math.tanh %17 : vector<32x128xf32>
    %cst_6 = arith.constant 1.000000e+00 : f32
    %19 = vector.broadcast %cst_6 : f32 to vector<32x128xf32>
    %20 = arith.addf %19, %18 : vector<32x128xf32>
    %cst_7 = arith.constant 5.000000e-01 : f32
    %21 = vector.broadcast %cst_7 : f32 to vector<32x128xf32>
    %22 = arith.mulf %21, %20 : vector<32x128xf32>
    %23 = arith.mulf %5, %22 : vector<32x128xf32>
    %24 = arith.mulf %23, %23 : vector<32x128xf32>
    %25 = tpu.concatenate %23, %24 in 0 : vector<32x128xf32>, vector<32x128xf32> -> vector<64x128xf32>
    %c0_8 = arith.constant 0 : index
    %c0_9 = arith.constant 0 : index
    %26 = vector.load %arg4[%c0_8, %c0_9] : memref<64x64xf32, #tpu.memory_space<vmem>>, vector<64x64xf32>
    %c0_10 = arith.constant 0 : index
    %c0_11 = arith.constant 0 : index
    %27 = vector.load %arg3[%c0_10, %c0_11] : memref<128x128xf32, #tpu.memory_space<vmem>>, vector<128x128xf32>
    %cst_12 = arith.constant dense<0.000000e+00> : vector<64x128xf32>
    %28 = tpu.matmul %25, %27, %cst_12 {dimension_numbers = #tpu.dot_dimension_numbers<[1], [0], [0], [1], [0, 0, 1, 1], [], []>} : vector<64x128xf32>, vector<128x128xf32>, vector<64x128xf32> -> vector<64x128xf32>
    %cst_13 = arith.constant dense<0.000000e+00> : vector<64x128xf32>
    %29 = tpu.matmul %26, %28, %cst_13 {dimension_numbers = #tpu.dot_dimension_numbers<[1], [0], [0], [1], [0, 0, 1, 1], [], []>} : vector<64x64xf32>, vector<64x128xf32>, vector<64x128xf32> -> vector<64x128xf32>
    %30 = vector.extract_strided_slice %29 {offsets = [0, 0], sizes = [32, 128], strides = [1, 1]} : vector<64x128xf32> to vector<32x128xf32>
    %31 = vector.extract_strided_slice %29 {offsets = [32, 0], sizes = [32, 128], strides = [1, 1]} : vector<64x128xf32> to vector<32x128xf32>
    %32 = arith.mulf %30, %30 : vector<32x128xf32>
    %33 = arith.subf %31, %32 : vector<32x128xf32>
    %cst_14 = arith.constant 9.99999974E-6 : f32
    %34 = vector.broadcast %cst_14 : f32 to vector<32x128xf32>
    %35 = arith.addf %33, %34 : vector<32x128xf32>
    %36 = math.rsqrt %35 : vector<32x128xf32>
    %37 = arith.subf %23, %30 : vector<32x128xf32>
    %38 = arith.mulf %37, %36 : vector<32x128xf32>
    %39 = vector.broadcast %6 : vector<32x1xf32> to vector<32x128xf32>
    %40 = arith.mulf %38, %39 : vector<32x128xf32>
    %41 = vector.broadcast %7 : vector<32x1xf32> to vector<32x128xf32>
    %42 = arith.addf %40, %41 : vector<32x128xf32>
    %43 = arith.truncf %42 : vector<32x128xf32> to vector<32x128xbf16>
    %c0_15 = arith.constant 0 : index
    %c0_16 = arith.constant 0 : index
    %44 = vector.load %arg5[%c0_15, %c0_16] : memref<128x32xbf16, #tpu.memory_space<vmem>>, vector<128x32xbf16>
    %cst_17 = arith.constant dense<0.000000e+00> : vector<32x32xf32>
    %45 = tpu.matmul %43, %44, %cst_17 {dimension_numbers = #tpu.dot_dimension_numbers<[1], [0], [0], [1], [0, 0, 1, 1], [], []>} : vector<32x128xbf16>, vector<128x32xbf16>, vector<32x32xf32> -> vector<32x32xf32>
    %46 = vector.extract_strided_slice %45 {offsets = [0, 0], sizes = [32, 16], strides = [1, 1]} : vector<32x32xf32> to vector<32x16xf32>
    %47 = vector.extract_strided_slice %45 {offsets = [0, 16], sizes = [32, 16], strides = [1, 1]} : vector<32x32xf32> to vector<32x16xf32>
    %48 = vector.extract_strided_slice %0 {offsets = [0, 32], sizes = [32, 16], strides = [1, 1]} : vector<32x112xf32> to vector<32x16xf32>
    %49 = vector.extract_strided_slice %0 {offsets = [0, 48], sizes = [32, 16], strides = [1, 1]} : vector<32x112xf32> to vector<32x16xf32>
    %50 = arith.mulf %46, %48 : vector<32x16xf32>
    %51 = arith.mulf %47, %49 : vector<32x16xf32>
    %52 = arith.subf %50, %51 : vector<32x16xf32>
    %53 = arith.mulf %46, %49 : vector<32x16xf32>
    %54 = arith.mulf %47, %48 : vector<32x16xf32>
    %55 = arith.addf %53, %54 : vector<32x16xf32>
    %56 = tpu.concatenate %52, %55 in 1 : vector<32x16xf32>, vector<32x16xf32> -> vector<32x32xf32>
    %57 = arith.truncf %56 : vector<32x32xf32> to vector<32x32xbf16>
    %c0_18 = arith.constant 0 : index
    %c0_19 = arith.constant 0 : index
    %58 = vector.load %arg6[%c0_18, %c0_19] : memref<32x128xbf16, #tpu.memory_space<vmem>>, vector<32x128xbf16>
    %cst_20 = arith.constant dense<0.000000e+00> : vector<32x128xf32>
    %59 = tpu.matmul %57, %58, %cst_20 {dimension_numbers = #tpu.dot_dimension_numbers<[1], [0], [0], [1], [0, 0, 1, 1], [], []>} : vector<32x32xbf16>, vector<32x128xbf16>, vector<32x128xf32> -> vector<32x128xf32>
    %60 = vector.broadcast %8 : vector<32x1xf32> to vector<32x128xf32>
    %61 = arith.mulf %42, %60 : vector<32x128xf32>
    %62 = arith.addf %59, %61 : vector<32x128xf32>
    %63 = vector.broadcast %10 : vector<32x1xf32> to vector<32x128xf32>
    %64 = arith.mulf %62, %63 : vector<32x128xf32>
    %65 = arith.mulf %62, %62 : vector<32x128xf32>
    %66 = arith.mulf %62, %65 : vector<32x128xf32>
    %cst_21 = arith.constant 4.471500e-02 : f32
    %67 = vector.broadcast %cst_21 : f32 to vector<32x128xf32>
    %68 = arith.mulf %67, %66 : vector<32x128xf32>
    %69 = arith.addf %62, %68 : vector<32x128xf32>
    %cst_22 = arith.constant 0.797884583 : f32
    %70 = vector.broadcast %cst_22 : f32 to vector<32x128xf32>
    %71 = arith.mulf %70, %69 : vector<32x128xf32>
    %72 = math.tanh %71 : vector<32x128xf32>
    %cst_23 = arith.constant 1.000000e+00 : f32
    %73 = vector.broadcast %cst_23 : f32 to vector<32x128xf32>
    %74 = arith.addf %73, %72 : vector<32x128xf32>
    %cst_24 = arith.constant 5.000000e-01 : f32
    %75 = vector.broadcast %cst_24 : f32 to vector<32x128xf32>
    %76 = arith.mulf %75, %74 : vector<32x128xf32>
    %77 = arith.mulf %62, %76 : vector<32x128xf32>
    %c0_25 = arith.constant 0 : index
    %c0_26 = arith.constant 0 : index
    %78 = vector.load %arg7[%c0_25, %c0_26] : memref<256x32xbf16, #tpu.memory_space<vmem>>, vector<128x32xbf16>
    %c0_27 = arith.constant 0 : index
    %c0_28 = arith.constant 0 : index
    %79 = vector.load %arg8[%c0_27, %c0_28] : memref<32x256xbf16, #tpu.memory_space<vmem>>, vector<32x128xbf16>
    %80 = arith.truncf %77 : vector<32x128xf32> to vector<32x128xbf16>
    %cst_29 = arith.constant dense<0.000000e+00> : vector<128x128xf32>
    %81 = tpu.matmul %78, %80, %cst_29 {dimension_numbers = #tpu.dot_dimension_numbers<[1], [0], [0], [1], [0, 0, 1, 1], [], []>} : vector<128x32xbf16>, vector<32x128xbf16>, vector<128x128xf32> -> vector<128x128xf32>
    %c0_30 = arith.constant 0 : index
    %c0_31 = arith.constant 0 : index
    %82 = vector.load %arg2[%c0_30, %c0_31] : memref<128x2xf32, #tpu.memory_space<vmem>>, vector<128x1xf32>
    %83 = vector.broadcast %82 : vector<128x1xf32> to vector<128x128xf32>
    %84 = arith.addf %81, %83 : vector<128x128xf32>
    %cst_32 = arith.constant 1.702000e+00 : f32
    %85 = vector.broadcast %cst_32 : f32 to vector<128x128xf32>
    %86 = arith.mulf %85, %84 : vector<128x128xf32>
    %87 = arith.negf %86 : vector<128x128xf32>
    %88 = math.exp %87 : vector<128x128xf32>
    %cst_33 = arith.constant 1.000000e+00 : f32
    %89 = vector.broadcast %cst_33 : f32 to vector<128x128xf32>
    %90 = arith.addf %89, %88 : vector<128x128xf32>
    %91 = arith.divf %89, %90 : vector<128x128xf32>
    %92 = arith.mulf %84, %91 : vector<128x128xf32>
    %93 = arith.truncf %92 : vector<128x128xf32> to vector<128x128xbf16>
    %cst_34 = arith.constant dense<0.000000e+00> : vector<32x128xf32>
    %94 = tpu.matmul %79, %93, %cst_34 {dimension_numbers = #tpu.dot_dimension_numbers<[1], [0], [0], [1], [0, 0, 1, 1], [], []>} : vector<32x128xbf16>, vector<128x128xbf16>, vector<32x128xf32> -> vector<32x128xf32>
    %95 = vector.broadcast %9 : vector<32x1xf32> to vector<32x128xf32>
    %96 = arith.addf %94, %95 : vector<32x128xf32>
    %97 = arith.addf %96, %64 : vector<32x128xf32>
    %98 = vector.extract_strided_slice %0 {offsets = [0, 104], sizes = [32, 1], strides = [1, 1]} : vector<32x112xf32> to vector<32x1xf32>
    %99 = vector.extract_strided_slice %0 {offsets = [0, 105], sizes = [32, 1], strides = [1, 1]} : vector<32x112xf32> to vector<32x1xf32>
    %100 = vector.extract_strided_slice %0 {offsets = [0, 106], sizes = [32, 1], strides = [1, 1]} : vector<32x112xf32> to vector<32x1xf32>
    %101 = vector.extract_strided_slice %0 {offsets = [0, 107], sizes = [32, 1], strides = [1, 1]} : vector<32x112xf32> to vector<32x1xf32>
    %102 = vector.extract_strided_slice %0 {offsets = [0, 108], sizes = [32, 1], strides = [1, 1]} : vector<32x112xf32> to vector<32x1xf32>
    %103 = arith.mulf %97, %97 : vector<32x128xf32>
    %104 = arith.mulf %97, %103 : vector<32x128xf32>
    %cst_35 = arith.constant 4.471500e-02 : f32
    %105 = vector.broadcast %cst_35 : f32 to vector<32x128xf32>
    %106 = arith.mulf %105, %104 : vector<32x128xf32>
    %107 = arith.addf %97, %106 : vector<32x128xf32>
    %cst_36 = arith.constant 0.797884583 : f32
    %108 = vector.broadcast %cst_36 : f32 to vector<32x128xf32>
    %109 = arith.mulf %108, %107 : vector<32x128xf32>
    %110 = math.tanh %109 : vector<32x128xf32>
    %cst_37 = arith.constant 1.000000e+00 : f32
    %111 = vector.broadcast %cst_37 : f32 to vector<32x128xf32>
    %112 = arith.addf %111, %110 : vector<32x128xf32>
    %cst_38 = arith.constant 5.000000e-01 : f32
    %113 = vector.broadcast %cst_38 : f32 to vector<32x128xf32>
    %114 = arith.mulf %113, %112 : vector<32x128xf32>
    %115 = arith.mulf %97, %114 : vector<32x128xf32>
    %116 = arith.mulf %115, %115 : vector<32x128xf32>
    %117 = tpu.concatenate %115, %116 in 0 : vector<32x128xf32>, vector<32x128xf32> -> vector<64x128xf32>
    %c0_39 = arith.constant 0 : index
    %c0_40 = arith.constant 0 : index
    %118 = vector.load %arg4[%c0_39, %c0_40] : memref<64x64xf32, #tpu.memory_space<vmem>>, vector<64x64xf32>
    %c0_41 = arith.constant 0 : index
    %c0_42 = arith.constant 0 : index
    %119 = vector.load %arg3[%c0_41, %c0_42] : memref<128x128xf32, #tpu.memory_space<vmem>>, vector<128x128xf32>
    %cst_43 = arith.constant dense<0.000000e+00> : vector<64x128xf32>
    %120 = tpu.matmul %117, %119, %cst_43 {dimension_numbers = #tpu.dot_dimension_numbers<[1], [0], [0], [1], [0, 0, 1, 1], [], []>} : vector<64x128xf32>, vector<128x128xf32>, vector<64x128xf32> -> vector<64x128xf32>
    %cst_44 = arith.constant dense<0.000000e+00> : vector<64x128xf32>
    %121 = tpu.matmul %118, %120, %cst_44 {dimension_numbers = #tpu.dot_dimension_numbers<[1], [0], [0], [1], [0, 0, 1, 1], [], []>} : vector<64x64xf32>, vector<64x128xf32>, vector<64x128xf32> -> vector<64x128xf32>
    %122 = vector.extract_strided_slice %121 {offsets = [0, 0], sizes = [32, 128], strides = [1, 1]} : vector<64x128xf32> to vector<32x128xf32>
    %123 = vector.extract_strided_slice %121 {offsets = [32, 0], sizes = [32, 128], strides = [1, 1]} : vector<64x128xf32> to vector<32x128xf32>
    %124 = arith.mulf %122, %122 : vector<32x128xf32>
    %125 = arith.subf %123, %124 : vector<32x128xf32>
    %cst_45 = arith.constant 9.99999974E-6 : f32
    %126 = vector.broadcast %cst_45 : f32 to vector<32x128xf32>
    %127 = arith.addf %125, %126 : vector<32x128xf32>
    %128 = math.rsqrt %127 : vector<32x128xf32>
    %129 = arith.subf %115, %122 : vector<32x128xf32>
    %130 = arith.mulf %129, %128 : vector<32x128xf32>
    %131 = vector.broadcast %98 : vector<32x1xf32> to vector<32x128xf32>
    %132 = arith.mulf %130, %131 : vector<32x128xf32>
    %133 = vector.broadcast %99 : vector<32x1xf32> to vector<32x128xf32>
    %134 = arith.addf %132, %133 : vector<32x128xf32>
    %135 = arith.truncf %134 : vector<32x128xf32> to vector<32x128xbf16>
    %c0_46 = arith.constant 0 : index
    %c0_47 = arith.constant 0 : index
    %136 = vector.load %arg5[%c0_46, %c0_47] : memref<128x32xbf16, #tpu.memory_space<vmem>>, vector<128x32xbf16>
    %cst_48 = arith.constant dense<0.000000e+00> : vector<32x32xf32>
    %137 = tpu.matmul %135, %136, %cst_48 {dimension_numbers = #tpu.dot_dimension_numbers<[1], [0], [0], [1], [0, 0, 1, 1], [], []>} : vector<32x128xbf16>, vector<128x32xbf16>, vector<32x32xf32> -> vector<32x32xf32>
    %138 = vector.extract_strided_slice %137 {offsets = [0, 0], sizes = [32, 16], strides = [1, 1]} : vector<32x32xf32> to vector<32x16xf32>
    %139 = vector.extract_strided_slice %137 {offsets = [0, 16], sizes = [32, 16], strides = [1, 1]} : vector<32x32xf32> to vector<32x16xf32>
    %140 = vector.extract_strided_slice %0 {offsets = [0, 64], sizes = [32, 16], strides = [1, 1]} : vector<32x112xf32> to vector<32x16xf32>
    %141 = vector.extract_strided_slice %0 {offsets = [0, 80], sizes = [32, 16], strides = [1, 1]} : vector<32x112xf32> to vector<32x16xf32>
    %142 = arith.mulf %138, %140 : vector<32x16xf32>
    %143 = arith.mulf %139, %141 : vector<32x16xf32>
    %144 = arith.subf %142, %143 : vector<32x16xf32>
    %145 = arith.mulf %138, %141 : vector<32x16xf32>
    %146 = arith.mulf %139, %140 : vector<32x16xf32>
    %147 = arith.addf %145, %146 : vector<32x16xf32>
    %148 = tpu.concatenate %144, %147 in 1 : vector<32x16xf32>, vector<32x16xf32> -> vector<32x32xf32>
    %149 = arith.truncf %148 : vector<32x32xf32> to vector<32x32xbf16>
    %c0_49 = arith.constant 0 : index
    %c0_50 = arith.constant 0 : index
    %150 = vector.load %arg6[%c0_49, %c0_50] : memref<32x128xbf16, #tpu.memory_space<vmem>>, vector<32x128xbf16>
    %cst_51 = arith.constant dense<0.000000e+00> : vector<32x128xf32>
    %151 = tpu.matmul %149, %150, %cst_51 {dimension_numbers = #tpu.dot_dimension_numbers<[1], [0], [0], [1], [0, 0, 1, 1], [], []>} : vector<32x32xbf16>, vector<32x128xbf16>, vector<32x128xf32> -> vector<32x128xf32>
    %152 = vector.broadcast %100 : vector<32x1xf32> to vector<32x128xf32>
    %153 = arith.mulf %134, %152 : vector<32x128xf32>
    %154 = arith.addf %151, %153 : vector<32x128xf32>
    %155 = vector.broadcast %102 : vector<32x1xf32> to vector<32x128xf32>
    %156 = arith.mulf %154, %155 : vector<32x128xf32>
    %c128 = arith.constant 128 : index
    %c0_52 = arith.constant 0 : index
    %157 = vector.load %arg7[%c128, %c0_52] : memref<256x32xbf16, #tpu.memory_space<vmem>>, vector<128x32xbf16>
    %c0_53 = arith.constant 0 : index
    %c128_54 = arith.constant 128 : index
    %158 = vector.load %arg8[%c0_53, %c128_54] : memref<32x256xbf16, #tpu.memory_space<vmem>>, vector<32x128xbf16>
    %159 = arith.truncf %154 : vector<32x128xf32> to vector<32x128xbf16>
    %cst_55 = arith.constant dense<0.000000e+00> : vector<128x128xf32>
    %160 = tpu.matmul %157, %159, %cst_55 {dimension_numbers = #tpu.dot_dimension_numbers<[1], [0], [0], [1], [0, 0, 1, 1], [], []>} : vector<128x32xbf16>, vector<32x128xbf16>, vector<128x128xf32> -> vector<128x128xf32>
    %c0_56 = arith.constant 0 : index
    %c1 = arith.constant 1 : index
    %161 = vector.load %arg2[%c0_56, %c1] : memref<128x2xf32, #tpu.memory_space<vmem>>, vector<128x1xf32>
    %162 = vector.broadcast %161 : vector<128x1xf32> to vector<128x128xf32>
    %163 = arith.addf %160, %162 : vector<128x128xf32>
    %cst_57 = arith.constant 1.702000e+00 : f32
    %164 = vector.broadcast %cst_57 : f32 to vector<128x128xf32>
    %165 = arith.mulf %164, %163 : vector<128x128xf32>
    %166 = arith.negf %165 : vector<128x128xf32>
    %167 = math.exp %166 : vector<128x128xf32>
    %cst_58 = arith.constant 1.000000e+00 : f32
    %168 = vector.broadcast %cst_58 : f32 to vector<128x128xf32>
    %169 = arith.addf %168, %167 : vector<128x128xf32>
    %170 = arith.divf %168, %169 : vector<128x128xf32>
    %171 = arith.mulf %163, %170 : vector<128x128xf32>
    %172 = arith.truncf %171 : vector<128x128xf32> to vector<128x128xbf16>
    %cst_59 = arith.constant dense<0.000000e+00> : vector<32x128xf32>
    %173 = tpu.matmul %158, %172, %cst_59 {dimension_numbers = #tpu.dot_dimension_numbers<[1], [0], [0], [1], [0, 0, 1, 1], [], []>} : vector<32x128xbf16>, vector<128x128xbf16>, vector<32x128xf32> -> vector<32x128xf32>
    %174 = vector.broadcast %101 : vector<32x1xf32> to vector<32x128xf32>
    %175 = arith.addf %173, %174 : vector<32x128xf32>
    %176 = arith.addf %175, %156 : vector<32x128xf32>
    %177 = vector.extract_strided_slice %0 {offsets = [0, 0], sizes = [32, 32], strides = [1, 1]} : vector<32x112xf32> to vector<32x32xf32>
    %cst_60 = arith.constant dense<0.000000e+00> : vector<32x128xf32>
    %178 = tpu.matmul %177, %176, %cst_60 {dimension_numbers = #tpu.dot_dimension_numbers<[1], [0], [0], [1], [0, 0, 1, 1], [], []>} : vector<32x32xf32>, vector<32x128xf32>, vector<32x128xf32> -> vector<32x128xf32>
    %179 = vector.extract_strided_slice %0 {offsets = [0, 109], sizes = [32, 1], strides = [1, 1]} : vector<32x112xf32> to vector<32x1xf32>
    %180 = vector.broadcast %179 : vector<32x1xf32> to vector<32x128xf32>
    %181 = arith.addf %178, %180 : vector<32x128xf32>
    %182 = arith.mulf %181, %181 : vector<32x128xf32>
    %183 = arith.mulf %181, %182 : vector<32x128xf32>
    %cst_61 = arith.constant 4.471500e-02 : f32
    %184 = vector.broadcast %cst_61 : f32 to vector<32x128xf32>
    %185 = arith.mulf %184, %183 : vector<32x128xf32>
    %186 = arith.addf %181, %185 : vector<32x128xf32>
    %cst_62 = arith.constant 0.797884583 : f32
    %187 = vector.broadcast %cst_62 : f32 to vector<32x128xf32>
    %188 = arith.mulf %187, %186 : vector<32x128xf32>
    %189 = math.tanh %188 : vector<32x128xf32>
    %cst_63 = arith.constant 1.000000e+00 : f32
    %190 = vector.broadcast %cst_63 : f32 to vector<32x128xf32>
    %191 = arith.addf %190, %189 : vector<32x128xf32>
    %cst_64 = arith.constant 5.000000e-01 : f32
    %192 = vector.broadcast %cst_64 : f32 to vector<32x128xf32>
    %193 = arith.mulf %192, %191 : vector<32x128xf32>
    %194 = arith.mulf %181, %193 : vector<32x128xf32>
    %195 = vector.extract_strided_slice %0 {offsets = [0, 111], sizes = [32, 1], strides = [1, 1]} : vector<32x112xf32> to vector<32x1xf32>
    %196 = vector.broadcast %195 : vector<32x1xf32> to vector<32x128xf32>
    %197 = arith.mulf %194, %196 : vector<32x128xf32>
    %cst_65 = arith.constant dense<0.000000e+00> : vector<128xf32>
    %198 = vector.multi_reduction <add>, %197, %cst_65 [0] : vector<32x128xf32> to vector<128xf32>
    %199 = vector.shape_cast %198 : vector<128xf32> to vector<1x128xf32>
    %200 = vector.extract_strided_slice %0 {offsets = [0, 110], sizes = [1, 1], strides = [1, 1]} : vector<32x112xf32> to vector<1x1xf32>
    %201 = vector.broadcast %200 : vector<1x1xf32> to vector<1x128xf32>
    %202 = arith.addf %199, %201 : vector<1x128xf32>
    %c0_66 = arith.constant 0 : index
    %c0_67 = arith.constant 0 : index
    %203 = vector.load %arg9[%c0_66, %c0_67] : memref<1x128xf32, #tpu.memory_space<vmem>>, vector<1x128xf32>
    tpu.vector_store %arg9[%c0_66, %c0_67], %202 {strides = array<i32>} : memref<1x128xf32, #tpu.memory_space<vmem>>, vector<1x128xf32>,
    return
  }
}

</mosaic_0001>

<bundles_post_ra>
// kernel: fno_forward.1
= control target key start
LH: loop header
LB: loop body
LE: loop exit
PB: predicated region body
PF: predicated region fallthrough
CT: control target
= control target key end

     0   :  { %s2996_s13 = smov 32   ;;  %vm63_vm0 = vcmask 1042432   ;;  %vm54_vm1 = vcmask 23552   ;;  %vm201_vm2 = vcmask 523264   ;;  %s2999_s12 = smov 112   ;;  %vm4550_vm15 = vcmask 130048   ;;  %s4539_s1 = inlined_call_operand.vmem [shape: f32[32,112], index: 1, kind: input, shape index: {}]   ;;  %s4540_s0 = inlined_call_operand.vmem [shape: f32[35,128], index: 0, kind: input, shape index: {}]   ;;  %s4541_s3 = inlined_call_operand.vmem [shape: f32[128,128], index: 3, kind: input, shape index: {}]   ;;  %s4542_s4 = inlined_call_operand.vmem [shape: f32[64,64], index: 4, kind: input, shape index: {}]   ;;  %s4543_s5 = inlined_call_operand.vmem [shape: bf16[128,32], index: 5, kind: input, shape index: {}]   ;;  %s4544_s2 = inlined_call_operand.vmem [shape: f32[128,2], index: 2, kind: input, shape index: {}]   ;;  %s4545_s6 = inlined_call_operand.vmem [shape: bf16[32,128], index: 6, kind: input, shape index: {}]   ;;  %s4546_s7 = inlined_call_operand.vmem [shape: bf16[256,32], index: 7, kind: input, shape index: {}]   ;;  %s4547_s8 = inlined_call_operand.vmem [shape: bf16[32,256], index: 8, kind: input, shape index: {}]   ;;  %s4548_s9 = inlined_call_operand.vmem [shape: f32[1,128], index: 9, kind: output, shape index: {}]  }
   0x1   :  { %v3071_v0 = vld [vmem:[%s4539_s1] sm:$0xff]  ;;  %v3076_v1 = vld [vmem:[%s4539_s1 + $0x10] sm:$0xff]  ;;  %v3083_v2 = vld [vmem:[%s4539_s1 + $0x8] sm:$0xff]  ;;  %s3001_s14 = smov 96   ;;  %s3004_s30 = smov 16  }
   0x2   :  { %46 = vrot.lane.b32.xlu0 %v3071_v0, %s2996_s13  ;;  %50 = vrot.lane.b32.xlu1 %v3076_v1, %s2996_s13  ;;  %v3088_v3 = vld [vmem:[%s4539_s1 + $0x18] sm:$0xff]  ;;  %v37_v4 = vld [vmem:[%s4540_s0 + $0x20] sm:$0x7]  ;;  %s3010_s10 = smov 48  }
   0x3   :  { %2435 = vmatpush.msk.msra.mxu0 %vm63_vm0, %v37_v4  ;;  %v3098_v5 = vld [vmem:[%s4541_s3 + $0x78] sm:$0xff]  ;;  %v3103_v6 = vld [vmem:[%s4541_s3 + $0x70] sm:$0xff]  ;;  %v3109_v7 = vld [vmem:[%s4541_s3 + $0x68] sm:$0xff]  ;;  %vm4549_vm0 = vcmask 261120  }
   0x4   :  { %160 = vmatpush.msra.mxu1 %v3098_v5  ;;  %v3116_v12 = vld [vmem:[%s4541_s3 + $0x60] sm:$0xff]  ;;  %v3122_v13 = vld [vmem:[%s4541_s3 + $0x58] sm:$0xff]  ;;  %v3128_v14 = vld [vmem:[%s4541_s3 + $0x50] sm:$0xff] }
   0x5   :  { %v3134_v15 = vld [vmem:[%s4541_s3 + $0x48] sm:$0xff]  ;;  %v3140_v16 = vld [vmem:[%s4541_s3 + $0x40] sm:$0xff]  ;;  %v3146_v17 = vld [vmem:[%s4541_s3 + $0x38] sm:$0xff] }
   0x6   :  { %161 = vmatpush.msra.mxu1 %v3103_v6  ;;  %v3152_v18 = vld [vmem:[%s4541_s3 + $0x30] sm:$0xff]  ;;  %v3158_v19 = vld [vmem:[%s4541_s3 + $0x28] sm:$0xff]  ;;  %v3164_v20 = vld [vmem:[%s4541_s3 + $0x20] sm:$0xff] }
   0x7   :  { %v3170_v21 = vld [vmem:[%s4541_s3 + $0x18] sm:$0xff]  ;;  %v3176_v22 = vld [vmem:[%s4541_s3 + $0x10] sm:$0xff]  ;;  %v3182_v23 = vld [vmem:[%s4541_s3 + $0x8] sm:$0xff] }
   0x8   :  { %162 = vmatpush.msra.mxu1 %v3109_v7  ;;  %v3188_v24 = vld [vmem:[%s4541_s3] sm:$0xff]  ;;  %v39_v30 = vld [vmem:[%s4540_s0 + $0x8] sm:$0xff]  ;;  %v40_v38 = vld [vmem:[%s4540_s0 + $0x10] sm:$0xff] }
   0x9   :  { %v38_v25 = vld [vmem:[%s4540_s0] sm:$0xff]  ;;  %v41_v48 = vld [vmem:[%s4540_s0 + $0x18] sm:$0xff] }
   0xa   :  { %48 = vrot.lane.b32.xlu0 %v3083_v2, %s2996_s13  ;;  %52 = vrot.lane.b32.xlu1 %v3088_v3, %s2996_s13  ;;  %s3000_s13 = smov 80  }
   0xb   :  { %163 = vmatpush.msra.mxu1 %v3116_v12 }
   0xd   :  { %164 = vmatpush.msra.mxu1 %v3122_v13 }
   0xf   :  { %165 = vmatpush.msra.mxu1 %v3128_v14 }
  0x11   :  { %166 = vmatpush.msra.mxu1 %v3134_v15 }
  0x13   :  { %167 = vmatpush.msra.mxu1 %v3140_v16 }
  0x15   :  { %168 = vmatpush.msra.mxu1 %v3146_v17 }
  0x17   :  { %169 = vmatpush.msra.mxu1 %v3152_v18 }
  0x19   :  { %170 = vmatpush.msra.mxu1 %v3158_v19 }
  0x1b   :  { %171 = vmatpush.msra.mxu1 %v3164_v20 }
  0x1d   :  { %172 = vmatpush.msra.mxu1 %v3170_v21 }
  0x1f   :  { %173 = vmatpush.msra.mxu1 %v3176_v22 }
  0x21   :  { %174 = vmatpush.msra.mxu1 %v3182_v23 }
  0x23   :  { %175 = vmatpush.msra.mxu1 %v3188_v24 }
  0x74   :  { %v47_v8 = vpop.permute.xlu0 %46  ;;  %v51_v10 = vpop.permute.xlu1 %50 }
  0x75   :  { %2436 = vmatmul.msk.f32.vlgmr.msra.gmra.mxu0 %vm54_vm1, %v47_v8 }
  0x7c   :  { %v49_v9 = vpop.permute.xlu0 %48  ;;  %v53_v11 = vpop.permute.xlu1 %52 }
  0x7d   :  { %2437 = vmatmul.msk.f32.gmra.mxu0 %vm54_vm1, %v49_v9 }
  0x85   :  { %2438 = vmatmul.msk.f32.gmra.mxu0 %vm54_vm1, %v51_v10 }
  0x8d   :  { %2439 = vmatmul.msk.f32.gmra.mxu0 %vm54_vm1, %v53_v11 }
  0xf2   :  { %v84_v26 = vpop.f32.mrf.mxu0 }
  0xf3   :  { %v85_v27 = vadd.f32 %v84_v26, %v38_v25 }
  0xf5   :  { %v96_v28 = vmul.f32 %v85_v27, %v85_v27 }
  0xf7   :  { %v100_v29 = vmul.f32 %v96_v28, %v85_v27 }
  0xf9   :  { %v104_v31 = vmul.f32 0.044715, %v100_v29 }
  0xfa   :  { %v87_v32 = vpop.f32.mrf.mxu0 }
  0xfb   :  { %v88_v33 = vadd.f32 %v87_v32, %v39_v30  ;;  %v108_v34 = vadd.f32 %v104_v31, %v85_v27 }
  0xfd   :  { %v97_v35 = vmul.f32 %v88_v33, %v88_v33  ;;  %v112_v36 = vmul.f32 0.7978846, %v108_v34 }
  0xff   :  { %v101_v37 = vmul.f32 %v97_v35, %v88_v33  ;;  %2777 = vtanh.f32 %v112_v36 }
 0x101   :  { %v105_v39 = vmul.f32 0.044715, %v101_v37 }
 0x102   :  { %v90_v40 = vpop.f32.mrf.mxu0 }
 0x103   :  { %v91_v41 = vadd.f32 %v90_v40, %v40_v38  ;;  %v109_v42 = vadd.f32 %v105_v39, %v88_v33 }
 0x105   :  { %v2778_v43 = vpop.eup %2777  ;;  %v98_v44 = vmul.f32 %v91_v41, %v91_v41  ;;  %v113_v45 = vmul.f32 0.7978846, %v109_v42  ;;  %v136_v42 = vld [vmem:[%s4542_s4] sm:$0xff] }
 0x106   :  { %v120_v46 = vadd.f32 1.0, %v2778_v43  ;;  %v138_v43 = vld [vmem:[%s4542_s4 + $0x10] sm:$0xff] }
 0x107   :  { %v102_v47 = vmul.f32 %v98_v44, %v91_v41  ;;  %2779 = vtanh.f32 %v113_v45  ;;  %v140_v44 = vld [vmem:[%s4542_s4 + $0x20] sm:$0xff]  ;;  %v2998_v45 = vmov 99  }
 0x108   :  { %v124_v49 = vmul.f32 0.5, %v120_v46  ;;  %2716 = vset.pattern.permute.xlu2 %v2998_v45  ;;  %v137_v46 = vld [vmem:[%s4542_s4 + $0x8] sm:$0xff] }
 0x109   :  { %v106_v50 = vmul.f32 0.044715, %v102_v47  ;;  %328 = vperm.xlu2 %2716, %v3071_v0   ;;  %v139_v47 = vld [vmem:[%s4542_s4 + $0x18] sm:$0xff] }
 0x10a   :  { %v93_v51 = vpop.f32.mrf.mxu0  ;;  %v3203_v52 = vmul.f32 %v124_v49, %v85_v27  ;;  %v143_v49 = vld [vmem:[%s4542_s4 + $0x38] sm:$0xff] }
 0x10b   :  { %v110_v53 = vadd.f32 %v106_v50, %v91_v41  ;;  %v94_v54 = vadd.f32 %v93_v51, %v41_v48  ;;  %v141_v48 = vld [vmem:[%s4542_s4 + $0x28] sm:$0xff]  ;;  %v2639_v50 = vld [vmem:[%s4543_s5 + $0x38] sm:$0xff]  ;;  %v2638_v51 = vld [vmem:[%s4543_s5 + $0x30] sm:$0xff] }
 0x10c   :  { %176 = vmatmul.f32.vlgmr.msra.gmra.mxu1 %v3203_v52  ;;  %v132_v29 = vmul.f32 %v3203_v52, %v3203_v52  ;;  %433 = vmatpush.bf16.msra.mxu3 %v2639_v50 }
 0x10d   :  { %v2780_v55 = vpop.eup %2779  ;;  %v99_v56 = vmul.f32 %v94_v54, %v94_v54  ;;  %v114_v57 = vmul.f32 0.7978846, %v110_v53  ;;  %v2637_v53 = vld [vmem:[%s4543_s5 + $0x28] sm:$0xff] }
 0x10e   :  { %v121_v58 = vadd.f32 1.0, %v2780_v55  ;;  %v2635_v55 = vld [vmem:[%s4543_s5 + $0x18] sm:$0xff] }
 0x10f   :  { %v103_v59 = vmul.f32 %v99_v56, %v94_v54  ;;  %2781 = vtanh.f32 %v114_v57  ;;  %v2634_v57 = vld [vmem:[%s4543_s5 + $0x10] sm:$0xff] }
 0x110   :  { %v125_v60 = vmul.f32 0.5, %v121_v58  ;;  %434 = vmatpush.bf16.msra.mxu3 %v2638_v51 }
 0x111   :  { %v107_v61 = vmul.f32 0.044715, %v103_v59  ;;  %332 = vperm.xlu2 %2716, %v3083_v2   ;;  %v2633_v59 = vld [vmem:[%s4543_s5 + $0x8] sm:$0xff] }
 0x112   :  { %v3206_v62 = vmul.f32 %v125_v60, %v88_v33 }
 0x113   :  { %v111_v63 = vadd.f32 %v107_v61, %v94_v54 }
 0x114   :  { %179 = vmatmul.f32.gmra.mxu1 %v3206_v62  ;;  %v133_v30 = vmul.f32 %v3206_v62, %v3206_v62  ;;  %435 = vmatpush.bf16.msra.mxu3 %v2637_v53 }
 0x115   :  { %v2782_v4 = vpop.eup %2781  ;;  %v115_v8 = vmul.f32 0.7978846, %v111_v63  ;;  %v2632_v63 = vld [vmem:[%s4543_s5] sm:$0xff] }
 0x116   :  { %v122_v9 = vadd.f32 1.0, %v2782_v4 }
 0x117   :  { %2783 = vtanh.f32 %v115_v8 }
 0x118   :  { %v126_v10 = vmul.f32 0.5, %v122_v9 }
 0x119   :  { %336 = vperm.xlu2 %2716, %v3076_v1  }
 0x11a   :  { %v3209_v11 = vmul.f32 %v126_v10, %v91_v41  ;;  %v2997_v41 = vmov 100  }
 0x11b   :  { %2717 = vset.pattern.permute.xlu0 %v2997_v41  ;;  %2718 = vset.pattern.permute.xlu1 %v2997_v41 }
 0x11c   :  { %182 = vmatmul.f32.gmra.mxu1 %v3209_v11  ;;  %v134_v31 = vmul.f32 %v3209_v11, %v3209_v11  ;;  %348 = vperm.xlu0 %2717, %v3071_v0  }
 0x11d   :  { %v2784_v25 = vpop.eup %2783  ;;  %352 = vperm.xlu1 %2718, %v3083_v2  }
 0x11e   :  { %v123_v26 = vadd.f32 1.0, %v2784_v25 }
 0x120   :  { %v127_v27 = vmul.f32 0.5, %v123_v26 }
 0x121   :  { %2720 = vset.pattern.permute.xlu2 %v2997_v41 }
 0x122   :  { %v3212_v28 = vmul.f32 %v127_v27, %v94_v54  ;;  %356 = vperm.xlu2 %2720, %v3076_v1   ;;  %v2636_v54 = vld [vmem:[%s4543_s5 + $0x20] sm:$0xff] }
 0x123   :  { %436 = vmatpush.bf16.msra.mxu3 %v2636_v54 }
 0x124   :  { %185 = vmatmul.f32.gmra.mxu1 %v3212_v28  ;;  %v135_v32 = vmul.f32 %v3212_v28, %v3212_v28  ;;  %360 = vperm.xlu0 %2717, %v3088_v3  }
 0x125   :  { %2719 = vset.pattern.permute.xlu1 %v2998_v45 }
 0x126   :  { %340 = vperm.xlu1 %2719, %v3088_v3  }
 0x127   :  { %437 = vmatpush.bf16.msra.mxu3 %v2635_v55 }
 0x12a   :  { %506 = vrot.lane.b32.xlu2 %v3083_v2, %s2999_s12 }
 0x12b   :  { %438 = vmatpush.bf16.msra.mxu3 %v2634_v57 }
 0x12c   :  { %188 = vmatmul.f32.gmra.mxu1 %v132_v29  ;;  %508 = vrot.lane.b32.xlu0 %v3076_v1, %s2999_s12 }
 0x12e   :  { %504 = vrot.lane.b32.xlu1 %v3071_v0, %s2999_s12 }
 0x12f   :  { %439 = vmatpush.bf16.msra.mxu3 %v2633_v59 }
 0x132   :  { %452 = vrot.lane.b32.xlu2 %v3071_v0, %s3001_s14 }
 0x133   :  { %440 = vmatpush.bf16.msra.mxu3 %v2632_v63 }
 0x134   :  { %191 = vmatmul.f32.gmra.mxu1 %v133_v30  ;;  %454 = vrot.lane.b32.xlu0 %v3083_v2, %s3001_s14 }
 0x136   :  { %510 = vrot.lane.b32.xlu1 %v3088_v3, %s2999_s12 }
 0x13a   :  { %490 = vrot.lane.b32.xlu2 %v3083_v2, %s3000_s13 }
 0x13c   :  { %194 = vmatmul.f32.gmra.mxu1 %v134_v31 }
 0x13e   :  { %488 = vrot.lane.b32.xlu1 %v3071_v0, %s3000_s13 }
 0x142   :  { %456 = vrot.lane.b32.xlu2 %v3076_v1, %s3001_s14 }
 0x144   :  { %197 = vmatmul.f32.gmra.mxu1 %v135_v32 }
 0x14a   :  { %494 = vrot.lane.b32.xlu2 %v3088_v3, %s3000_s13 }
 0x189   :  { %v177_v33 = vpop.f32.mrf.mxu1 }
 0x191   :  { %v180_v34 = vpop.f32.mrf.mxu1 }
 0x199   :  { %v183_v35 = vpop.f32.mrf.mxu1 }
 0x1a1   :  { %v186_v36 = vpop.f32.mrf.mxu1 }
 0x1a9   :  { %v189_v37 = vpop.f32.mrf.mxu1 }
 0x1b1   :  { %v192_v38 = vpop.f32.mrf.mxu1 }
 0x1b9   :  { %v195_v39 = vpop.f32.mrf.mxu1 }
 0x1c1   :  { %v198_v40 = vpop.f32.mrf.mxu1 }
 0x1c2   :  { %234 = vmatpush.msrb.mxu0 %v198_v40  ;;  %2662 = vmatpush.msrb.mxu1 %v198_v40 }
 0x1c3   :  { %2663 = vmatpush.msra.mxu2 %v198_v40  ;;  %v329_v40 = vpop.permute.xlu2 %328 }
 0x1c4   :  { %235 = vmatpush.msrb.mxu0 %v195_v39  ;;  %2664 = vmatpush.msrb.mxu1 %v195_v39 }
 0x1c5   :  { %2665 = vmatpush.msra.mxu2 %v195_v39 }
 0x1c6   :  { %236 = vmatpush.msrb.mxu0 %v192_v38  ;;  %2666 = vmatpush.msrb.mxu1 %v192_v38 }
 0x1c7   :  { %2667 = vmatpush.msra.mxu2 %v192_v38 }
 0x1c8   :  { %237 = vmatpush.msrb.mxu0 %v189_v37  ;;  %2668 = vmatpush.msrb.mxu1 %v189_v37 }
 0x1c9   :  { %2669 = vmatpush.msra.mxu2 %v189_v37 }
 0x1ca   :  { %238 = vmatpush.msrb.mxu0 %v186_v36  ;;  %2670 = vmatpush.msrb.mxu1 %v186_v36 }
 0x1cb   :  { %2671 = vmatpush.msra.mxu2 %v186_v36 }
 0x1cc   :  { %239 = vmatpush.msrb.mxu0 %v183_v35  ;;  %2672 = vmatpush.msrb.mxu1 %v183_v35 }
 0x1cd   :  { %2673 = vmatpush.msra.mxu2 %v183_v35 }
 0x1ce   :  { %240 = vmatpush.msrb.mxu0 %v180_v34  ;;  %2674 = vmatpush.msrb.mxu1 %v180_v34 }
 0x1cf   :  { %2675 = vmatpush.msra.mxu2 %v180_v34 }
 0x1d0   :  { %241 = vmatpush.msrb.mxu0 %v177_v33  ;;  %2676 = vmatpush.msrb.mxu1 %v177_v33 }
 0x1d1   :  { %2677 = vmatpush.msra.mxu2 %v177_v33  ;;  %2440 = vmatmul.msk.f32.vlgmr.msrb.gmra.mxu0 %vm201_vm2, %v136_v42 }
 0x1d2   :  { %2442 = vmatmul.msk.f32.vlgmr.msrb.gmra.mxu1 %vm201_vm2, %v138_v43  ;;  %2444 = vmatmul.msk.f32.vlgmr.msra.gmra.mxu2 %vm201_vm2, %v140_v44 }
 0x1d3   :  { %1347 = vmatpush.msrb.mxu2 %v3098_v5 }
 0x1d5   :  { %1348 = vmatpush.msrb.mxu2 %v3103_v6  ;;  %v142_v6 = vld [vmem:[%s4542_s4 + $0x30] sm:$0xff] }
 0x1d7   :  { %1349 = vmatpush.msrb.mxu2 %v3109_v7 }
 0x1d9   :  { %2441 = vmatmul.msk.f32.gmra.mxu0 %vm201_vm2, %v137_v46  ;;  %1350 = vmatpush.msrb.mxu2 %v3116_v12 }
 0x1da   :  { %2443 = vmatmul.msk.f32.gmra.mxu1 %vm201_vm2, %v139_v47  ;;  %2445 = vmatmul.msk.f32.gmra.mxu2 %vm201_vm2, %v141_v48 }
 0x1db   :  { %1351 = vmatpush.msrb.mxu2 %v3122_v13 }
 0x1dd   :  { %1352 = vmatpush.msrb.mxu2 %v3128_v14 }
 0x1df   :  { %1353 = vmatpush.msrb.mxu2 %v3134_v15 }
 0x1e1   :  { %1354 = vmatpush.msrb.mxu2 %v3140_v16 }
 0x1e2   :  { %2446 = vmatmul.msk.f32.gmra.mxu2 %vm201_vm2, %v142_v6 }
 0x1e3   :  { %1355 = vmatpush.msrb.mxu2 %v3146_v17 }
 0x1e5   :  { %1356 = vmatpush.msrb.mxu2 %v3152_v18 }
 0x1e7   :  { %1357 = vmatpush.msrb.mxu2 %v3158_v19 }
 0x1e9   :  { %1358 = vmatpush.msrb.mxu2 %v3164_v20 }
 0x1ea   :  { %2447 = vmatmul.msk.f32.gmra.mxu2 %vm201_vm2, %v143_v49 }
 0x1eb   :  { %1359 = vmatpush.msrb.mxu2 %v3170_v21 }
 0x1ed   :  { %1360 = vmatpush.msrb.mxu2 %v3176_v22 }
 0x1ef   :  { %1361 = vmatpush.msrb.mxu2 %v3182_v23 }
 0x1f1   :  { %1362 = vmatpush.msrb.mxu2 %v3188_v24 }
 0x24e   :  { %v243_v56 = vpop.f32.mrf.mxu0 }
 0x24f   :  { %v267_v58 = vmul.f32 %v243_v56, %v243_v56  ;;  %v3323_v26 = vpop.f32.mrf.mxu1  ;;  %v319_v48 = vsub.f32 %v3203_v52, %v243_v56  ;;  %v349_v52 = vpop.permute.xlu0 %348 }
 0x250   :  { %v269_v31 = vmul.f32 %v3323_v26, %v3323_v26  ;;  %v353_v56 = vpop.permute.xlu1 %352 }
 0x255   :  { %v255_v60 = vpop.f32.mrf.mxu2 }
 0x256   :  { %v271_v61 = vsub.f32 %v255_v60, %v267_v58  ;;  %v246_v8 = vpop.f32.mrf.mxu0  ;;  %v333_v58 = vpop.permute.xlu2 %332 }
 0x257   :  { %v268_v9 = vmul.f32 %v246_v8, %v246_v8  ;;  %v252_v39 = vpop.f32.mrf.mxu1  ;;  %v320_v57 = vsub.f32 %v3206_v62, %v246_v8 }
 0x258   :  { %v275_v4 = vadd.f32 1e-05, %v271_v61  ;;  %v270_v43 = vmul.f32 %v252_v39, %v252_v39 }
 0x25a   :  { %2785 = vrsqrt.f32 %v275_v4  ;;  %vm285_vm4 = vweird.f32 %v275_v4 }
 0x25d   :  { %v258_v10 = vpop.f32.mrf.mxu2 }
 0x25e   :  { %v272_v25 = vsub.f32 %v258_v10, %v268_v9 }
 0x260   :  { %v2786_v27 = vpop.eup %2785  ;;  %v276_v29 = vadd.f32 1e-05, %v272_v25 }
 0x261   :  { %v280_v30 = vmul.f32 %v2786_v27, %v275_v4  ;;  %vm286_vm3 = vweird.f32 %v2786_v27 }
 0x262   :  { %2787 = vrsqrt.f32 %v276_v29  ;;  %vm287_vm5 = vmor %vm285_vm4, %vm286_vm3  ;;  %vm295_vm7 = vweird.f32 %v276_v29 }
 0x263   :  { %v281_v32 = vmul.f32 %v2786_v27, %v280_v30 }
 0x265   :  { %v282_v33 = vmul.f32 0.5, %v281_v32  ;;  %v261_v34 = vpop.f32.mrf.mxu2  ;;  %v337_v32 = vpop.permute.xlu2 %336 }
 0x266   :  { %v273_v35 = vsub.f32 %v261_v34, %v269_v31 }
 0x267   :  { %v283_v36 = vsub.f32 1.5, %v282_v33 }
 0x268   :  { %v2788_v37 = vpop.eup %2787  ;;  %v277_v38 = vadd.f32 1e-05, %v273_v35  ;;  %v321_v35 = vsub.f32 %v3209_v11, %v3323_v26 }
 0x269   :  { %v284_v41 = vmul.f32 %v2786_v27, %v283_v36  ;;  %v290_v42 = vmul.f32 %v2788_v37, %v276_v29  ;;  %vm296_vm6 = vweird.f32 %v2788_v37 }
 0x26a   :  { %2789 = vrsqrt.f32 %v277_v38  ;;  %vm297_vm8 = vmor %vm295_vm7, %vm296_vm6  ;;  %vm305_vm10 = vweird.f32 %v277_v38 }
 0x26b   :  { %v291_v44 = vmul.f32 %v2788_v37, %v290_v42  ;;  %v288_v45 = vsel %vm287_vm5, %v2786_v27, %v284_v41  ;;  %v322_v41 = vsub.f32 %v3212_v28, %v252_v39  ;;  %v341_v42 = vpop.permute.xlu1 %340 }
 0x26c   :  { %v323_v51 = vmul.f32 %v319_v48, %v288_v45 }
 0x26d   :  { %v292_v46 = vmul.f32 0.5, %v291_v44  ;;  %v264_v47 = vpop.f32.mrf.mxu2  ;;  %v357_v45 = vpop.permute.xlu2 %356 }
 0x26e   :  { %v274_v6 = vsub.f32 %v264_v47, %v270_v43  ;;  %v343_v61 = vmul.f32 %v329_v40, %v323_v51  ;;  %v361_v47 = vpop.permute.xlu0 %360 }
 0x26f   :  { %v293_v49 = vsub.f32 1.5, %v292_v46 }
 0x270   :  { %v2790_v50 = vpop.eup %2789  ;;  %v278_v53 = vadd.f32 1e-05, %v274_v6  ;;  %v3329_v27 = vadd.f32 %v349_v52, %v343_v61 }
 0x271   :  { %v294_v54 = vmul.f32 %v2788_v37, %v293_v49  ;;  %v300_v55 = vmul.f32 %v2790_v50, %v277_v38  ;;  %vm306_vm9 = vweird.f32 %v2790_v50 }
 0x272   :  { %2791 = vrsqrt.f32 %v278_v53  ;;  %vm307_vm11 = vmor %vm305_vm10, %vm306_vm9  ;;  %vm315_vm13 = vweird.f32 %v278_v53 }
 0x273   :  { %v298_v59 = vsel %vm297_vm8, %v2788_v37, %v294_v54  ;;  %v301_v60 = vmul.f32 %v2790_v50, %v300_v55  ;;  %v505_v28 = vpop.permute.xlu1 %504 }
 0x274   :  { %v324_v63 = vmul.f32 %v320_v57, %v298_v59 }
 0x275   :  { %v302_v4 = vmul.f32 0.5, %v301_v60  ;;  %v507_v26 = vpop.permute.xlu2 %506 }
 0x276   :  { %v344_v9 = vmul.f32 %v333_v58, %v324_v63  ;;  %v509_v58 = vpop.permute.xlu0 %508 }
 0x277   :  { %v303_v10 = vsub.f32 1.5, %v302_v4 }
 0x278   :  { %v2792_v25 = vpop.eup %2791  ;;  %v3331_v29 = vadd.f32 %v353_v56, %v344_v9 }
 0x279   :  { %v304_v30 = vmul.f32 %v2790_v50, %v303_v10  ;;  %v310_v62 = vmul.f32 %v2792_v25, %v278_v53  ;;  %vm316_vm12 = vweird.f32 %v2792_v25 }
 0x27a   :  { %v367_v8 = vpack.c.bf16 %v3331_v29, %v3329_v27  ;;  %vm317_vm14 = vmor %vm315_vm13, %vm316_vm12 }
 0x27b   :  { %v311_v31 = vmul.f32 %v2792_v25, %v310_v62  ;;  %v308_v33 = vsel %vm307_vm11, %v2790_v50, %v304_v30  ;;  %v3002_v50 = vmov 101   ;;  %v511_v52 = vpop.permute.xlu1 %510  ;;  %v3003_v62 = vmov 0  }
 0x27c   :  { %441 = vmatmul.bf16.vlgmr.msra.gmra.mxu3 %v367_v8  ;;  %v325_v37 = vmul.f32 %v321_v35, %v308_v33  ;;  %2731 = vset.pattern.permute.xlu2 %v3002_v50 }
 0x27d   :  { %v312_v34 = vmul.f32 0.5, %v311_v31  ;;  %v453_v49 = vpop.permute.xlu2 %452  ;;  %2732 = vset.pattern.permute.xlu0 %v3002_v50  ;;  %2733 = vset.pattern.permute.xlu1 %v3002_v50  ;;  %v716_v50 = vld [vmem:[%s4544_s2 + $0x68] sm:$0xff] }
 0x27e   :  { %v345_v38 = vmul.f32 %v337_v32, %v325_v37  ;;  %v455_v4 = vpop.permute.xlu0 %454 }
 0x27f   :  { %v313_v36 = vsub.f32 1.5, %v312_v34 }
 0x280   :  { %v3338_v48 = vadd.f32 %v357_v45, %v345_v38 }
 0x281   :  { %v314_v40 = vmul.f32 %v2792_v25, %v313_v36 }
 0x283   :  { %v318_v43 = vsel %vm317_vm14, %v2792_v25, %v314_v40  ;;  %v3368_v25 = vpop.permute.xlu1 %488 }
 0x284   :  { %v326_v44 = vmul.f32 %v322_v41, %v318_v43 }
 0x285   :  { %v3349_v54 = vpop.permute.xlu2 %490 }
 0x286   :  { %v346_v46 = vmul.f32 %v341_v42, %v326_v44 }
 0x288   :  { %v3340_v6 = vadd.f32 %v361_v47, %v346_v46  ;;  %v715_v47 = vld [vmem:[%s4544_s2 + $0x60] sm:$0xff] }
 0x28a   :  { %v368_v11 = vpack.c.bf16 %v3340_v6, %v3338_v48 }
 0x28c   :  { %446 = vmatmul.bf16.gmra.mxu3 %v368_v11 }
 0x28d   :  { %v457_v59 = vpop.permute.xlu2 %456 }
 0x295   :  { %v3380_v41 = vpop.permute.xlu2 %494 }
 0x2ff   :  { %v442_v39 = vpop.f32.mrf.mxu3 }
 0x300   :  { %v3344_v51 = vmul.f32 %v453_v49, %v442_v39  ;;  %v516_v53 = vmul.f32 %v505_v28, %v442_v39  ;;  %v500_v8 = vmul.f32 %v3368_v25, %v442_v39  ;;  %v717_v49 = vld [vmem:[%s4544_s2 + $0x70] sm:$0xff]  ;;  %v714_v28 = vld [vmem:[%s4544_s2 + $0x58] sm:$0xff]  ;;  %v2641_v39 = vld [vmem:[%s4545_s6 + $0x8] sm:$0xff] }
 0x301   :  { %612 = vmatpush.bf16.msra.mxu0 %v2641_v39 }
 0x302   :  { %524 = vrot.lane.b32.xlu0 %v516_v53, %s2999_s12  ;;  %472 = vrot.lane.b32.xlu2 %v3344_v51, %s2999_s12  ;;  %v709_v53 = vld [vmem:[%s4544_s2 + $0x30] sm:$0xff] }
 0x307   :  { %v444_v55 = vpop.f32.mrf.mxu3 }
 0x308   :  { %v517_v57 = vmul.f32 %v507_v26, %v444_v55  ;;  %v3361_v9 = vmul.f32 %v455_v4, %v444_v55  ;;  %v501_v31 = vmul.f32 %v3349_v54, %v444_v55  ;;  %v712_v26 = vld [vmem:[%s4544_s2 + $0x48] sm:$0xff]  ;;  %v718_v55 = vld [vmem:[%s4544_s2 + $0x78] sm:$0xff]  ;;  %v703_v4 = vld [vmem:[%s4544_s2] sm:$0xff] }
 0x30a   :  { %458 = vrot.lane.b32.xlu0 %v3088_v3, %s3001_s14  ;;  %526 = vrot.lane.b32.xlu1 %v517_v57, %s2999_s12  ;;  %v707_v57 = vld [vmem:[%s4544_s2 + $0x20] sm:$0xff] }
 0x30f   :  { %v447_v60 = vpop.f32.mrf.mxu3 }
 0x310   :  { %v3354_v61 = vmul.f32 %v457_v59, %v447_v60  ;;  %v518_v63 = vmul.f32 %v509_v58, %v447_v60  ;;  %v2640_v58 = vld [vmem:[%s4545_s6] sm:$0xff]  ;;  %v708_v59 = vld [vmem:[%s4544_s2 + $0x28] sm:$0xff] }
 0x311   :  { %613 = vmatpush.bf16.msra.mxu0 %v2640_v58 }
 0x312   :  { %492 = vrot.lane.b32.xlu1 %v3076_v1, %s3000_s13  ;;  %528 = vrot.lane.b32.xlu0 %v518_v63, %s2999_s12  ;;  %v706_v63 = vld [vmem:[%s4544_s2 + $0x18] sm:$0xff] }
 0x313   :  { %476 = vrot.lane.b32.xlu2 %v3354_v61, %s2999_s12 }
 0x317   :  { %v449_v56 = vpop.f32.mrf.mxu3 }
 0x318   :  { %v519_v10 = vmul.f32 %v511_v52, %v449_v56  ;;  %v503_v43 = vmul.f32 %v3380_v41, %v449_v56  ;;  %v711_v52 = vld [vmem:[%s4544_s2 + $0x40] sm:$0xff] }
 0x31a   :  { %474 = vrot.lane.b32.xlu0 %v3361_v9, %s2999_s12  ;;  %530 = vrot.lane.b32.xlu1 %v519_v10, %s2999_s12  ;;  %v710_v10 = vld [vmem:[%s4544_s2 + $0x38] sm:$0xff] }
 0x31b   :  { %576 = vperm.xlu2 %2731, %v3076_v1  }
 0x323   :  { %572 = vperm.xlu2 %2731, %v3083_v2  }
 0x32b   :  { %2735 = vset.pattern.permute.xlu2 %v3003_v62 }
 0x32c   :  { %796 = vperm.xlu2 %2735, %v718_v55  }
 0x374   :  { %v525_v30 = vpop.permute.xlu0 %524 }
 0x375   :  { %v536_v34 = vadd.f32 %v525_v30, %v500_v8  ;;  %v3006_v30 = vmov 102  }
 0x37c   :  { %v459_v32 = vpop.permute.xlu0 %458  ;;  %v527_v33 = vpop.permute.xlu1 %526 }
 0x37d   :  { %v3372_v35 = vmul.f32 %v459_v32, %v449_v56  ;;  %v537_v36 = vadd.f32 %v527_v33, %v501_v31  ;;  %v3005_v56 = vmov 103   ;;  %v705_v32 = vld [vmem:[%s4544_s2 + $0x10] sm:$0xff] }
 0x37f   :  { %v2721_v37 = vpack.i.bf16 %v537_v36, %v536_v34  ;;  %478 = vrot.lane.b32.xlu0 %v3372_v35, %s2999_s12 }
 0x381   :  { %2722 = vrot.lane.b32.xlu1 %v2721_v37, %s3004_s30 }
 0x384   :  { %v3377_v40 = vpop.permute.xlu1 %492  ;;  %v529_v38 = vpop.permute.xlu0 %528 }
 0x385   :  { %v502_v42 = vmul.f32 %v3377_v40, %v447_v60  ;;  %v713_v60 = vld [vmem:[%s4544_s2 + $0x50] sm:$0xff] }
 0x386   :  { %771 = vperm.xlu2 %2735, %v713_v60  }
 0x387   :  { %580 = vperm.xlu0 %2732, %v3088_v3   ;;  %v538_v45 = vadd.f32 %v529_v38, %v502_v42  ;;  %v704_v38 = vld [vmem:[%s4544_s2 + $0x8] sm:$0xff] }
 0x38c   :  { %v531_v44 = vpop.permute.xlu1 %530  ;;  %v475_v8 = vpop.permute.xlu0 %474 }
 0x38d   :  { %v539_v46 = vadd.f32 %v531_v44, %v503_v43  ;;  %v485_v34 = vsub.f32 %v3361_v9, %v475_v8 }
 0x38e   :  { %761 = vperm.xlu2 %2735, %v711_v52  }
 0x38f   :  { %v2726_v11 = vpack.i.bf16 %v539_v46, %v538_v45  ;;  %2736 = vset.pattern.permute.xlu0 %v3003_v62 }
 0x390   :  { %781 = vperm.xlu0 %2736, %v715_v47  }
 0x391   :  { %2727 = vrot.lane.b32.xlu1 %v2726_v11, %s3004_s30 }
 0x396   :  { %756 = vperm.xlu2 %2735, %v710_v10  }
 0x398   :  { %766 = vperm.xlu0 %2736, %v712_v26  }
 0x399   :  { %568 = vperm.xlu1 %2733, %v3071_v0  }
 0x39e   :  { %731 = vperm.xlu2 %2735, %v705_v32  }
 0x3a0   :  { %741 = vperm.xlu0 %2736, %v707_v57  }
 0x3a1   :  { %2734 = vset.pattern.permute.xlu1 %v3003_v62  ;;  %v473_v62 = vpop.permute.xlu2 %472 }
 0x3a2   :  { %791 = vperm.xlu1 %2734, %v717_v49   ;;  %v484_v33 = vsub.f32 %v3344_v51, %v473_v62 }
 0x3a6   :  { %726 = vperm.xlu2 %2735, %v704_v38  }
 0x3a8   :  { %736 = vperm.xlu0 %2736, %v706_v63  }
 0x3a9   :  { %v477_v51 = vpop.permute.xlu2 %476 }
 0x3aa   :  { %786 = vperm.xlu1 %2734, %v716_v50   ;;  %v486_v45 = vsub.f32 %v3354_v61, %v477_v51 }
 0x3ae   :  { %2739 = vset.pattern.permute.xlu2 %v3005_v56 }
 0x3af   :  { %630 = vperm.xlu2 %2739, %v3083_v2  }
 0x3b0   :  { %2737 = vset.pattern.permute.xlu0 %v3005_v56 }
 0x3b1   :  { %626 = vperm.xlu0 %2737, %v3071_v0   ;;  %v577_v61 = vpop.permute.xlu2 %576 }
 0x3b2   :  { %776 = vperm.xlu1 %2734, %v714_v28  }
 0x3b7   :  { %634 = vperm.xlu2 %2739, %v3076_v1  }
 0x3b9   :  { %2740 = vset.pattern.permute.xlu0 %v3006_v30 }
 0x3ba   :  { %751 = vperm.xlu1 %2734, %v709_v53   ;;  %1265 = vperm.xlu0 %2740, %v3076_v1   ;;  %v585_v1 = vmul.f32 %v577_v61, %v3338_v48 }
 0x3bf   :  { %2742 = vset.pattern.permute.xlu2 %v3006_v30 }
 0x3c0   :  { %1269 = vperm.xlu2 %2742, %v3088_v3  }
 0x3c2   :  { %746 = vperm.xlu1 %2734, %v708_v59  }
 0x3ca   :  { %721 = vperm.xlu1 %2734, %v703_v4  }
 0x3d2   :  { %2738 = vset.pattern.permute.xlu1 %v3006_v30 }
 0x3d3   :  { %1257 = vperm.xlu1 %2738, %v3071_v0  }
 0x3db   :  { %1261 = vperm.xlu1 %2738, %v3083_v2  }
 0x3e3   :  { %2741 = vset.pattern.permute.xlu1 %v3005_v56 }
 0x3e4   :  { %638 = vperm.xlu1 %2741, %v3088_v3  }
 0x3f1   :  { %v479_v9 = vpop.permute.xlu0 %478 }
 0x3f2   :  { %v487_v46 = vsub.f32 %v3372_v35, %v479_v9  ;;  %v573_v35 = vpop.permute.xlu2 %572 }
 0x3f3   :  { %v2723_v31 = vpop.permute.xlu1 %2722  ;;  %v584_v53 = vmul.f32 %v573_v35, %v3331_v29 }
 0x3f4   :  { %v2725_v36 = vunpack.i.h.bf16 %v2723_v31  ;;  %v2724_v37 = vunpack.i.l.bf16 %v2723_v31 }
 0x3f6   :  { %v558_v42 = vsel %vm4550_vm15, %v485_v34, %v2725_v36  ;;  %v557_v0 = vsel %vm4550_vm15, %v484_v33, %v2724_v37 }
 0x3f7   :  { %v561_v43 = vpack.c.bf16 %v558_v42, %v557_v0 }
 0x3f9   :  { %2488 = vmatmul.msk.bf16.vlgmr.msra.gmra.mxu0 %vm4549_vm0, %v561_v43  ;;  %v581_v52 = vpop.permute.xlu0 %580 }
 0x3fa   :  { %v586_v30 = vmul.f32 %v581_v52, %v3340_v6 }
 0x403   :  { %v2728_v44 = vpop.permute.xlu1 %2727 }
 0x404   :  { %v2730_v47 = vunpack.i.h.bf16 %v2728_v44  ;;  %v2729_v11 = vunpack.i.l.bf16 %v2728_v44 }
 0x406   :  { %v559_v26 = vsel %vm4550_vm15, %v486_v45, %v2729_v11  ;;  %v560_v49 = vsel %vm4550_vm15, %v487_v46, %v2730_v47 }
 0x407   :  { %v562_v50 = vpack.c.bf16 %v560_v49, %v559_v26 }
 0x409   :  { %2489 = vmatmul.msk.bf16.gmra.mxu0 %vm4549_vm0, %v562_v50 }
 0x40b   :  { %v569_v39 = vpop.permute.xlu1 %568 }
 0x40c   :  { %v583_v57 = vmul.f32 %v569_v39, %v3329_v27 }
 0x476   :  { %v615_v28 = vpop.f32.mrf.mxu0 }
 0x477   :  { %v3462_v59 = vadd.f32 %v615_v28, %v583_v57 }
 0x479   :  { %v645_v3 = vmul.f32 %v3462_v59, %v3462_v59 }
 0x47b   :  { %v649_v4 = vmul.f32 %v645_v3, %v3462_v59  ;;  %v2642_v3 = vld [vmem:[%s4546_s7] sm:$0xff] }
 0x47d   :  { %v653_v62 = vmul.f32 0.044715, %v649_v4 }
 0x47e   :  { %v617_v55 = vpop.f32.mrf.mxu0 }
 0x47f   :  { %v3460_v58 = vadd.f32 %v617_v55, %v584_v53  ;;  %v657_v37 = vadd.f32 %v653_v62, %v3462_v59 }
 0x481   :  { %v646_v2 = vmul.f32 %v3460_v58, %v3460_v58  ;;  %v661_v6 = vmul.f32 0.7978846, %v657_v37 }
 0x483   :  { %v650_v29 = vmul.f32 %v646_v2, %v3460_v58 }
 0x485   :  { %v654_v10 = vmul.f32 0.044715, %v650_v29 }
 0x486   :  { %v620_v60 = vpop.f32.mrf.mxu0 }
 0x487   :  { %v3469_v63 = vadd.f32 %v620_v60, %v585_v1  ;;  %v658_v33 = vadd.f32 %v654_v10, %v3460_v58  ;;  %v2953_v60 = vld [vmem:[%s4541_s3 + $0x70] sm:$0xff] }
 0x489   :  { %v647_v27 = vmul.f32 %v3469_v63, %v3469_v63  ;;  %v662_v0 = vmul.f32 0.7978846, %v658_v33 }
 0x48b   :  { %v651_v56 = vmul.f32 %v647_v27, %v3469_v63  ;;  %v3558_v27 = vpop.permute.xlu0 %781 }
 0x48d   :  { %v655_v48 = vmul.f32 0.044715, %v651_v56 }
 0x48e   :  { %v622_v8 = vpop.f32.mrf.mxu0 }
 0x48f   :  { %v3477_v31 = vadd.f32 %v622_v8, %v586_v30  ;;  %v659_v32 = vadd.f32 %v655_v48, %v3469_v63 }
 0x491   :  { %v648_v34 = vmul.f32 %v3477_v31, %v3477_v31  ;;  %v663_v36 = vmul.f32 0.7978846, %v659_v32 }
 0x493   :  { %v652_v42 = vmul.f32 %v648_v34, %v3477_v31  ;;  %2793 = vtanh.f32 %v663_v36  ;;  %v3563_v48 = vpop.permute.xlu0 %766 }
 0x494   :  { %2795 = vtanh.f32 %v662_v0 }
 0x495   :  { %v656_v43 = vmul.f32 0.044715, %v652_v42  ;;  %2797 = vtanh.f32 %v661_v6 }
 0x497   :  { %v660_v38 = vadd.f32 %v656_v43, %v3477_v31 }
 0x499   :  { %v664_v51 = vmul.f32 0.7978846, %v660_v38  ;;  %v2794_v9 = vpop.eup %2793 }
 0x49a   :  { %v2796_v44 = vpop.eup %2795  ;;  %v671_v45 = vadd.f32 1.0, %v2794_v9 }
 0x49b   :  { %2799 = vtanh.f32 %v664_v51  ;;  %v2798_v46 = vpop.eup %2797  ;;  %v670_v47 = vadd.f32 1.0, %v2796_v44  ;;  %v742_v42 = vpop.permute.xlu0 %741 }
 0x49c   :  { %v675_v49 = vmul.f32 0.5, %v671_v45  ;;  %v669_v50 = vadd.f32 1.0, %v2798_v46 }
 0x49d   :  { %v674_v28 = vmul.f32 0.5, %v670_v47 }
 0x49e   :  { %v679_v35 = vmul.f32 %v675_v49, %v3469_v63  ;;  %v673_v53 = vmul.f32 0.5, %v669_v50 }
 0x49f   :  { %v678_v57 = vmul.f32 %v674_v28, %v3460_v58 }
 0x4a0   :  { %v677_v2 = vmul.f32 %v673_v53, %v3462_v59 }
 0x4a1   :  { %v2800_v11 = vpop.eup %2799 }
 0x4a2   :  { %v672_v26 = vadd.f32 1.0, %v2800_v11  ;;  %v701_v1 = vpack.c.bf16 %v678_v57, %v677_v2 }
 0x4a3   :  { %v737_v47 = vpop.permute.xlu0 %736 }
 0x4a4   :  { %v676_v61 = vmul.f32 0.5, %v672_v26 }
 0x4a6   :  { %v680_v39 = vmul.f32 %v676_v61, %v3477_v31 }
 0x4a8   :  { %v702_v55 = vpack.c.bf16 %v680_v39, %v679_v35 }
 0x4aa   :  { %869 = vmatpush.bf16.msrb.mxu3 %v702_v55 }
 0x4ae   :  { %870 = vmatpush.bf16.msrb.mxu3 %v701_v1 }
 0x4b1   :  { %2522 = vmatmul.msk.bf16.vlgmr.msrb.gmra.mxu3 %vm4549_vm0, %v2642_v3 }
 0x4b2   :  { %2678 = vmatpush.msra.mxu3 %v3098_v5  ;;  %v2643_v5 = vld [vmem:[%s4546_s7 + $0x8] sm:$0xff] }
 0x4b4   :  { %2679 = vmatpush.msra.mxu3 %v2953_v60 }
 0x4b6   :  { %2680 = vmatpush.msra.mxu3 %v3109_v7  ;;  %v2644_v7 = vld [vmem:[%s4546_s7 + $0x10] sm:$0xff] }
 0x4b8   :  { %2681 = vmatpush.msra.mxu3 %v3116_v12  ;;  %v2645_v12 = vld [vmem:[%s4546_s7 + $0x18] sm:$0xff] }
 0x4ba   :  { %2682 = vmatpush.msra.mxu3 %v3122_v13  ;;  %v2646_v13 = vld [vmem:[%s4546_s7 + $0x20] sm:$0xff] }
 0x4bc   :  { %2683 = vmatpush.msra.mxu3 %v3128_v14  ;;  %v2647_v14 = vld [vmem:[%s4546_s7 + $0x28] sm:$0xff] }
 0x4be   :  { %2684 = vmatpush.msra.mxu3 %v3134_v15  ;;  %v3532_v15 = vpop.permute.xlu1 %791 }
 0x4c0   :  { %2685 = vmatpush.msra.mxu3 %v3140_v16  ;;  %v3534_v16 = vpop.permute.xlu2 %796 }
 0x4c1   :  { %2523 = vmatmul.msk.bf16.gmra.mxu3 %vm4549_vm0, %v2643_v5 }
 0x4c2   :  { %2686 = vmatpush.msra.mxu3 %v3146_v17 }
 0x4c4   :  { %2687 = vmatpush.msra.mxu3 %v3152_v18  ;;  %v2648_v18 = vld [vmem:[%s4546_s7 + $0x30] sm:$0xff] }
 0x4c6   :  { %2688 = vmatpush.msra.mxu3 %v3158_v19  ;;  %v3536_v17 = vpop.permute.xlu1 %786 }
 0x4c8   :  { %2689 = vmatpush.msra.mxu3 %v3164_v20  ;;  %v3542_v19 = vpop.permute.xlu2 %771 }
 0x4ca   :  { %2690 = vmatpush.msra.mxu3 %v3170_v21  ;;  %v2649_v21 = vld [vmem:[%s4546_s7 + $0x38] sm:$0xff] }
 0x4cc   :  { %2691 = vmatpush.msra.mxu3 %v3176_v22 }
 0x4ce   :  { %2692 = vmatpush.msra.mxu3 %v3182_v23  ;;  %v3544_v20 = vpop.permute.xlu1 %776 }
 0x4d0   :  { %2693 = vmatpush.msra.mxu3 %v3188_v24  ;;  %v3549_v22 = vpop.permute.xlu2 %761 }
 0x4d1   :  { %2524 = vmatmul.msk.bf16.gmra.mxu3 %vm4549_vm0, %v2644_v7 }
 0x4d6   :  { %v3551_v23 = vpop.permute.xlu1 %751 }
 0x4d8   :  { %v3554_v24 = vpop.permute.xlu2 %756 }
 0x4de   :  { %v3556_v29 = vpop.permute.xlu1 %746 }
 0x4e0   :  { %v732_v4 = vpop.permute.xlu2 %731 }
 0x4e1   :  { %2525 = vmatmul.msk.bf16.gmra.mxu3 %vm4549_vm0, %v2645_v12 }
 0x4e6   :  { %v722_v52 = vpop.permute.xlu1 %721 }
 0x4e8   :  { %v727_v8 = vpop.permute.xlu2 %726 }
 0x4f1   :  { %2526 = vmatmul.msk.bf16.gmra.mxu3 %vm4549_vm0, %v2646_v13 }
 0x501   :  { %2527 = vmatmul.msk.bf16.gmra.mxu3 %vm4549_vm0, %v2647_v14 }
 0x511   :  { %2528 = vmatmul.msk.bf16.gmra.mxu3 %vm4549_vm0, %v2648_v18 }
 0x521   :  { %2529 = vmatmul.msk.bf16.gmra.mxu3 %vm4549_vm0, %v2649_v21 }
 0x534   :  { %v872_v56 = vpop.f32.mrf.mxu3 }
 0x535   :  { %v3560_v10 = vadd.f32 %v872_v56, %v722_v52 }
 0x537   :  { %v2530_v30 = vmul.f32 -1.702, %v3560_v10 }
 0x539   :  { %v944_v62 = vmul.f32 1.442695, %v2530_v30 }
 0x53b   :  { %2801 = vpow2.f32 %v944_v62 }
 0x53c   :  { %v874_v32 = vpop.f32.mrf.mxu3 }
 0x53d   :  { %v3565_v33 = vadd.f32 %v874_v32, %v727_v8 }
 0x53f   :  { %v2531_v34 = vmul.f32 -1.702, %v3565_v33 }
 0x541   :  { %v2802_v36 = vpop.eup %2801  ;;  %v946_v37 = vmul.f32 1.442695, %v2531_v34 }
 0x542   :  { %v976_v0 = vadd.f32 1.0, %v2802_v36 }
 0x543   :  { %2803 = vpow2.f32 %v946_v37 }
 0x544   :  { %2805 = vrcp.f32 %v976_v0  ;;  %v877_v43 = vpop.f32.mrf.mxu3  ;;  %v1003_v2 = vand.u32 2147483648, %v976_v0  ;;  %vm997_vm3 = vweird.f32 %v976_v0  ;;  %v1001_v3 = vand.u32 2147483647, %v976_v0 }
 0x545   :  { %v3568_v6 = vadd.f32 %v877_v43, %v732_v4 }
 0x546   :  { %v1004_v21 = vor.u32 1.1754944e-38, %v1003_v2  ;;  %vm1002_vm6 = vcmp.eq.f32.partialorder %v1001_v3, 8.507059e+37 }
 0x547   :  { %v2532_v38 = vmul.f32 -1.702, %v3568_v6 }
 0x549   :  { %v2804_v51 = vpop.eup %2803  ;;  %v948_v9 = vmul.f32 1.442695, %v2532_v38 }
 0x54a   :  { %v2806_v44 = vpop.eup %2805  ;;  %v977_v45 = vadd.f32 1.0, %v2804_v51 }
 0x54b   :  { %v993_v46 = vmul.f32 %v2806_v44, %v976_v0  ;;  %2807 = vpow2.f32 %v948_v9  ;;  %vm998_vm1 = vweird.f32 %v2806_v44 }
 0x54c   :  { %2809 = vrcp.f32 %v977_v45  ;;  %v879_v11 = vpop.f32.mrf.mxu3  ;;  %vm999_vm4 = vmor %vm997_vm3, %vm998_vm1  ;;  %v1016_v7 = vand.u32 2147483647, %v977_v45  ;;  %v1018_v12 = vand.u32 2147483648, %v977_v45  ;;  %vm1012_vm7 = vweird.f32 %v977_v45 }
 0x54d   :  { %v994_v26 = vsub.f32 1.0, %v993_v46  ;;  %v3571_v49 = vadd.f32 %v879_v11, %v737_v47 }
 0x54e   :  { %v1019_v8 = vor.u32 1.1754944e-38, %v1018_v12  ;;  %vm1017_vm9 = vcmp.eq.f32.partialorder %v1016_v7, 8.507059e+37 }
 0x54f   :  { %v995_v50 = vmul.f32 %v2806_v44, %v994_v26  ;;  %v2533_v61 = vmul.f32 -1.702, %v3571_v49 }
 0x551   :  { %v2808_v28 = vpop.eup %2807  ;;  %v950_v35 = vmul.f32 1.442695, %v2533_v61  ;;  %v996_v55 = vadd.f32 %v2806_v44, %v995_v50 }
 0x552   :  { %v2810_v39 = vpop.eup %2809  ;;  %v3574_v53 = vadd.f32 1.0, %v2808_v28 }
 0x553   :  { %v1008_v57 = vmul.f32 %v2810_v39, %v977_v45  ;;  %2811 = vpow2.f32 %v950_v35  ;;  %v1000_v13 = vsel %vm999_vm4, %v2806_v44, %v996_v55  ;;  %vm1013_vm5 = vweird.f32 %v2810_v39 }
 0x554   :  { %2813 = vrcp.f32 %v3574_v53  ;;  %v882_v1 = vpop.f32.mrf.mxu3  ;;  %v1005_v62 = vsel %vm1002_vm6, %v1004_v21, %v1000_v13  ;;  %vm1014_vm8 = vmor %vm1012_vm7, %vm1013_vm5  ;;  %vm1027_vm11 = vweird.f32 %v3574_v53  ;;  %v1031_v61 = vand.u32 2147483647, %v3574_v53 }
 0x555   :  { %v1009_v60 = vsub.f32 1.0, %v1008_v57  ;;  %v3577_v5 = vadd.f32 %v882_v1, %v742_v42  ;;  %v3582_v0 = vmul.f32 %v1005_v62, %v3560_v10 }
 0x556   :  { %vm1032_vm14 = vcmp.eq.f32.partialorder %v1031_v61, 8.507059e+37 }
 0x557   :  { %v1010_v14 = vmul.f32 %v2810_v39, %v1009_v60  ;;  %v2534_v18 = vmul.f32 -1.702, %v3577_v5 }
 0x559   :  { %v2812_v4 = vpop.eup %2811  ;;  %v1011_v52 = vadd.f32 %v2810_v39, %v1010_v14  ;;  %v952_v56 = vmul.f32 1.442695, %v2534_v18 }
 0x55a   :  { %v2814_v30 = vpop.eup %2813  ;;  %v979_v32 = vadd.f32 1.0, %v2812_v4 }
 0x55b   :  { %v1015_v34 = vsel %vm1014_vm8, %v2810_v39, %v1011_v52  ;;  %v1023_v36 = vmul.f32 %v2814_v30, %v3574_v53  ;;  %2815 = vpow2.f32 %v952_v56  ;;  %vm1028_vm10 = vweird.f32 %v2814_v30 }
 0x55c   :  { %v1020_v37 = vsel %vm1017_vm9, %v1019_v8, %v1015_v34  ;;  %2817 = vrcp.f32 %v979_v32  ;;  %v884_v42 = vpop.f32.mrf.mxu3  ;;  %vm1029_vm12 = vmor %vm1027_vm11, %vm1028_vm10  ;;  %v1046_v39 = vand.u32 2147483647, %v979_v32  ;;  %v1048_v55 = vand.u32 2147483648, %v979_v32 }
 0x55d   :  { %v3585_v43 = vmul.f32 %v1020_v37, %v3565_v33  ;;  %v1024_v38 = vsub.f32 1.0, %v1023_v36  ;;  %v3588_v51 = vadd.f32 %v884_v42, %v3556_v29  ;;  %v1033_v33 = vand.u32 2147483648, %v3574_v53 }
 0x55e   :  { %vm1042_vm1 = vweird.f32 %v979_v32  ;;  %v1049_v14 = vor.u32 1.1754944e-38, %v1048_v55  ;;  %vm1047_vm4 = vcmp.eq.f32.partialorder %v1046_v39, 8.507059e+37 }
 0x55f   :  { %v1025_v9 = vmul.f32 %v2814_v30, %v1024_v38  ;;  %v2535_v44 = vmul.f32 -1.702, %v3588_v51  ;;  %v1034_v3 = vor.u32 1.1754944e-38, %v1033_v33 }
 0x561   :  { %v2816_v46 = vpop.eup %2815  ;;  %v954_v47 = vmul.f32 1.442695, %v2535_v44  ;;  %v1026_v10 = vadd.f32 %v2814_v30, %v1025_v9 }
 0x562   :  { %v2818_v11 = vpop.eup %2817  ;;  %v3593_v26 = vadd.f32 1.0, %v2816_v46 }
 0x563   :  { %v1038_v50 = vmul.f32 %v2818_v11, %v979_v32  ;;  %2819 = vpow2.f32 %v954_v47  ;;  %v1030_v57 = vsel %vm1029_vm12, %v2814_v30, %v1026_v10  ;;  %vm1043_vm13 = vweird.f32 %v2818_v11 }
 0x564   :  { %2821 = vrcp.f32 %v3593_v26  ;;  %v887_v29 = vpop.f32.mrf.mxu3  ;;  %v1035_v53 = vsel %vm1032_vm14, %v1034_v3, %v1030_v57  ;;  %vm1044_vm3 = vmor %vm1042_vm1, %vm1043_vm13  ;;  %vm1057_vm6 = vweird.f32 %v3593_v26 }
 0x565   :  { %v1039_v28 = vsub.f32 1.0, %v1038_v50  ;;  %v3600_v35 = vadd.f32 %v887_v29, %v3551_v23  ;;  %v3605_v56 = vmul.f32 %v1035_v53, %v3568_v6 }
 0x567   :  { %v1040_v2 = vmul.f32 %v2818_v11, %v1039_v28  ;;  %v2536_v1 = vmul.f32 -1.702, %v3600_v35 }
 0x569   :  { %v2820_v60 = vpop.eup %2819  ;;  %v1041_v7 = vadd.f32 %v2818_v11, %v1040_v2  ;;  %v956_v12 = vmul.f32 1.442695, %v2536_v1 }
 0x56a   :  { %v2822_v13 = vpop.eup %2821  ;;  %v981_v23 = vadd.f32 1.0, %v2820_v60 }
 0x56b   :  { %v1045_v18 = vsel %vm1044_vm3, %v2818_v11, %v1041_v7  ;;  %v1053_v21 = vmul.f32 %v2822_v13, %v3593_v26  ;;  %2823 = vpow2.f32 %v956_v12  ;;  %vm1058_vm5 = vweird.f32 %v2822_v13 }
 0x56c   :  { %v1050_v4 = vsel %vm1047_vm4, %v1049_v14, %v1045_v18  ;;  %2825 = vrcp.f32 %v981_v23  ;;  %v889_v52 = vpop.f32.mrf.mxu3  ;;  %vm1059_vm7 = vmor %vm1057_vm6, %vm1058_vm5  ;;  %v1078_v11 = vand.u32 2147483648, %v981_v23  ;;  %v1076_v33 = vand.u32 2147483647, %v981_v23 }
 0x56d   :  { %v3608_v30 = vmul.f32 %v1050_v4, %v3571_v49  ;;  %v1054_v62 = vsub.f32 1.0, %v1053_v21  ;;  %v3611_v8 = vadd.f32 %v889_v52, %v3554_v24  ;;  %v1063_v49 = vand.u32 2147483648, %v3593_v26 }
 0x56e   :  { %v1061_v24 = vand.u32 2147483647, %v3593_v26  ;;  %vm1072_vm10 = vweird.f32 %v981_v23  ;;  %v1079_v57 = vor.u32 1.1754944e-38, %v1078_v11  ;;  %vm1077_vm12 = vcmp.eq.f32.partialorder %v1076_v33, 8.507059e+37 }
 0x56f   :  { %v1055_v32 = vmul.f32 %v2822_v13, %v1054_v62  ;;  %v2537_v34 = vmul.f32 -1.702, %v3611_v8  ;;  %v1064_v29 = vor.u32 1.1754944e-38, %v1063_v49 }
 0x570   :  { %vm1062_vm9 = vcmp.eq.f32.partialorder %v1061_v24, 8.507059e+37 }
 0x571   :  { %v2824_v37 = vpop.eup %2823  ;;  %v958_v42 = vmul.f32 1.442695, %v2537_v34  ;;  %v1056_v44 = vadd.f32 %v2822_v13, %v1055_v32 }
 0x572   :  { %v2826_v38 = vpop.eup %2825  ;;  %v982_v9 = vadd.f32 1.0, %v2824_v37 }
 0x573   :  { %v1068_v6 = vmul.f32 %v2826_v38, %v981_v23  ;;  %2827 = vpow2.f32 %v958_v42  ;;  %v1060_v10 = vsel %vm1059_vm7, %v2822_v13, %v1056_v44  ;;  %vm1073_vm8 = vweird.f32 %v2826_v38 }
 0x574   :  { %2829 = vrcp.f32 %v982_v9  ;;  %v892_v46 = vpop.f32.mrf.mxu3  ;;  %v1065_v55 = vsel %vm1062_vm9, %v1064_v29, %v1060_v10  ;;  %vm1074_vm11 = vmor %vm1072_vm10, %vm1073_vm8  ;;  %v1093_v4 = vand.u32 2147483648, %v982_v9  ;;  %vm1087_vm14 = vweird.f32 %v982_v9 }
 0x575   :  { %v1069_v47 = vsub.f32 1.0, %v1068_v6  ;;  %v3620_v7 = vmul.f32 %v1065_v55, %v3577_v5  ;;  %v1091_v62 = vand.u32 2147483647, %v982_v9 }
 0x576   :  { %v1094_v42 = vor.u32 1.1754944e-38, %v1093_v4 }
 0x577   :  { %v1070_v50 = vmul.f32 %v2826_v38, %v1069_v47  ;;  %vm1092_vm4 = vcmp.eq.f32.partialorder %v1091_v62, 8.507059e+37 }
 0x579   :  { %v2828_v61 = vpop.eup %2827  ;;  %v1071_v28 = vadd.f32 %v2826_v38, %v1070_v50  ;;  %v3636_v50 = vadd.f32 %v892_v46, %v3549_v22 }
 0x57a   :  { %v2830_v39 = vpop.eup %2829  ;;  %v983_v2 = vadd.f32 1.0, %v2828_v61 }
 0x57b   :  { %v1075_v1 = vsel %vm1074_vm11, %v2826_v38, %v1071_v28  ;;  %v1083_v26 = vmul.f32 %v2830_v39, %v982_v9  ;;  %vm1088_vm13 = vweird.f32 %v2830_v39  ;;  %v2538_v28 = vmul.f32 -1.702, %v3636_v50 }
 0x57c   :  { %v1080_v3 = vsel %vm1077_vm12, %v1079_v57, %v1075_v1  ;;  %2831 = vrcp.f32 %v983_v2  ;;  %v894_v60 = vpop.f32.mrf.mxu3  ;;  %vm1089_vm1 = vmor %vm1087_vm14, %vm1088_vm13  ;;  %v1108_v5 = vand.u32 2147483648, %v983_v2  ;;  %vm1102_vm5 = vweird.f32 %v983_v2 }
 0x57d   :  { %v3623_v12 = vmul.f32 %v1080_v3, %v3588_v51  ;;  %v1084_v13 = vsub.f32 1.0, %v1083_v26  ;;  %v1106_v51 = vand.u32 2147483647, %v983_v2  ;;  %v3639_v29 = vadd.f32 %v894_v60, %v3563_v48 }
 0x57e   :  { %v1109_v6 = vor.u32 1.1754944e-38, %v1108_v5  ;;  %v960_v46 = vmul.f32 1.442695, %v2538_v28 }
 0x57f   :  { %v1085_v53 = vmul.f32 %v2830_v39, %v1084_v13  ;;  %vm1107_vm7 = vcmp.eq.f32.partialorder %v1106_v51, 8.507059e+37 }
 0x580   :  { %2833 = vpow2.f32 %v960_v46 }
 0x581   :  { %v1086_v18 = vadd.f32 %v2830_v39, %v1085_v53 }
 0x582   :  { %v2832_v23 = vpop.eup %2831 }
 0x583   :  { %v1098_v21 = vmul.f32 %v2832_v23, %v983_v2  ;;  %v1090_v34 = vsel %vm1089_vm1, %v2830_v39, %v1086_v18  ;;  %vm1103_vm3 = vweird.f32 %v2832_v23 }
 0x584   :  { %v897_v52 = vpop.f32.mrf.mxu3  ;;  %v1095_v44 = vsel %vm1092_vm4, %v1094_v42, %v1090_v34  ;;  %vm1104_vm6 = vmor %vm1102_vm5, %vm1103_vm3 }
 0x585   :  { %v1099_v32 = vsub.f32 1.0, %v1098_v21  ;;  %v3628_v9 = vmul.f32 %v1095_v44, %v3600_v35  ;;  %v3642_v61 = vadd.f32 %v897_v52, %v3542_v19 }
 0x586   :  { %v2834_v53 = vpop.eup %2833 }
 0x587   :  { %v1100_v37 = vmul.f32 %v2832_v23, %v1099_v32  ;;  %v2540_v22 = vmul.f32 -1.702, %v3642_v61  ;;  %v3663_v4 = vadd.f32 1.0, %v2834_v53 }
 0x589   :  { %v1101_v38 = vadd.f32 %v2832_v23, %v1100_v37  ;;  %v964_v1 = vmul.f32 1.442695, %v2540_v22 }
 0x58b   :  { %v1105_v49 = vsel %vm1104_vm6, %v2832_v23, %v1101_v38 }
 0x58c   :  { %v1110_v24 = vsel %vm1107_vm7, %v1109_v6, %v1105_v49  ;;  %v899_v47 = vpop.f32.mrf.mxu3 }
 0x58d   :  { %v3631_v11 = vmul.f32 %v1110_v24, %v3611_v8  ;;  %v2539_v8 = vmul.f32 -1.702, %v3639_v29  ;;  %v3650_v39 = vadd.f32 %v899_v47, %v3544_v20 }
 0x58f   :  { %v962_v57 = vmul.f32 1.442695, %v2539_v8  ;;  %v2541_v19 = vmul.f32 -1.702, %v3650_v39 }
 0x591   :  { %2835 = vpow2.f32 %v962_v57  ;;  %v966_v20 = vmul.f32 1.442695, %v2541_v19 }
 0x592   :  { %2837 = vpow2.f32 %v964_v1 }
 0x594   :  { %v902_v33 = vpop.f32.mrf.mxu3 }
 0x595   :  { %v3646_v35 = vadd.f32 %v902_v33, %v3558_v27 }
 0x597   :  { %v2542_v55 = vmul.f32 -1.702, %v3646_v35  ;;  %v2836_v23 = vpop.eup %2835 }
 0x598   :  { %v2838_v18 = vpop.eup %2837  ;;  %v3665_v32 = vadd.f32 1.0, %v2836_v23 }
 0x599   :  { %v968_v26 = vmul.f32 1.442695, %v2542_v55  ;;  %v3667_v34 = vadd.f32 1.0, %v2838_v18 }
 0x59a   :  { %vm1132_vm0 = vweird.f32 %v3665_v32 }
 0x59b   :  { %vm1147_vm4 = vweird.f32 %v3667_v34 }
 0x59c   :  { %v904_v48 = vpop.f32.mrf.mxu3 }
 0x59d   :  { %v3656_v2 = vadd.f32 %v904_v48, %v3536_v17 }
 0x59f   :  { %v2543_v27 = vmul.f32 -1.702, %v3656_v2 }
 0x5a1   :  { %v970_v3 = vmul.f32 1.442695, %v2543_v27 }
 0x5a3   :  { %2839 = vpow2.f32 %v970_v3 }
 0x5a4   :  { %2841 = vpow2.f32 %v968_v26  ;;  %v907_v60 = vpop.f32.mrf.mxu3 }
 0x5a5   :  { %2843 = vpow2.f32 %v966_v20  ;;  %v3660_v13 = vadd.f32 %v907_v60, %v3532_v15 }
 0x5a7   :  { %v2544_v17 = vmul.f32 -1.702, %v3660_v13 }
 0x5a9   :  { %v2840_v21 = vpop.eup %2839  ;;  %v972_v52 = vmul.f32 1.442695, %v2544_v17 }
 0x5aa   :  { %v2842_v62 = vpop.eup %2841  ;;  %v3669_v37 = vadd.f32 1.0, %v2840_v21 }
 0x5ab   :  { %v2844_v5 = vpop.eup %2843  ;;  %2845 = vpow2.f32 %v972_v52  ;;  %v3672_v51 = vadd.f32 1.0, %v2842_v62 }
 0x5ac   :  { %v909_v15 = vpop.f32.mrf.mxu3  ;;  %2847 = vrcp.f32 %v3663_v4  ;;  %v3678_v38 = vadd.f32 1.0, %v2844_v5  ;;  %vm1192_vm14 = vweird.f32 %v3669_v37 }
 0x5ad   :  { %v3675_v42 = vadd.f32 %v909_v15, %v3534_v16  ;;  %2849 = vrcp.f32 %v3665_v32  ;;  %vm1177_vm9 = vweird.f32 %v3672_v51  ;;  %v1181_v14 = vand.u32 2147483647, %v3672_v51 }
 0x5ae   :  { %2851 = vrcp.f32 %v3667_v34  ;;  %vm1162_vm11 = vweird.f32 %v3678_v38  ;;  %v1183_v10 = vand.u32 2147483648, %v3672_v51 }
 0x5af   :  { %v2545_v44 = vmul.f32 -1.702, %v3675_v42  ;;  %2853 = vrcp.f32 %v3669_v37 }
 0x5b0   :  { %2855 = vrcp.f32 %v3672_v51  ;;  %v1184_v15 = vor.u32 1.1754944e-38, %v1183_v10 }
 0x5b1   :  { %v2846_v6 = vpop.eup %2845  ;;  %v974_v49 = vmul.f32 1.442695, %v2545_v44  ;;  %2857 = vrcp.f32 %v3678_v38 }
 0x5b2   :  { %v3685_v24 = vadd.f32 1.0, %v2846_v6  ;;  %v3687_v16 = vpop.eup %2847 }
 0x5b3   :  { %2859 = vpow2.f32 %v974_v49  ;;  %v3689_v47 = vpop.eup %2849  ;;  %v1113_v46 = vmul.f32 %v3687_v16, %v3663_v4  ;;  %vm1118_vm7 = vweird.f32 %v3687_v16 }
 0x5b4   :  { %2861 = vrcp.f32 %v3685_v24  ;;  %v3692_v33 = vpop.eup %2851  ;;  %v1128_v48 = vmul.f32 %v3689_v47, %v3665_v32  ;;  %vm1133_vm3 = vweird.f32 %v3689_v47  ;;  %vm1207_vm5 = vweird.f32 %v3685_v24 }
 0x5b5   :  { %v3694_v28 = vpop.eup %2853  ;;  %v1143_v1 = vmul.f32 %v3692_v33, %v3667_v34  ;;  %v1114_v60 = vsub.f32 1.0, %v1113_v46  ;;  %v1166_v46 = vand.u32 2147483647, %v3678_v38  ;;  %vm1148_vm10 = vweird.f32 %v3692_v33 }
 0x5b6   :  { %v3696_v8 = vpop.eup %2855  ;;  %v1188_v57 = vmul.f32 %v3694_v28, %v3669_v37  ;;  %v1129_v53 = vsub.f32 1.0, %v1128_v48  ;;  %vm1193_vm1 = vweird.f32 %v3694_v28 }
 0x5b7   :  { %v3698_v22 = vpop.eup %2857  ;;  %v1173_v27 = vmul.f32 %v3696_v8, %v3672_v51  ;;  %v1144_v18 = vsub.f32 1.0, %v1143_v1  ;;  %v3721_v5 = vmul.f32 %v3687_v16, %v1114_v60  ;;  %vm1178_vm13 = vweird.f32 %v3696_v8 }
 0x5b8   :  { %v1158_v20 = vmul.f32 %v3698_v22, %v3678_v38  ;;  %v1189_v23 = vsub.f32 1.0, %v1188_v57  ;;  %v1130_v49 = vmul.f32 %v3689_v47, %v1129_v53  ;;  %vm1163_vm8 = vweird.f32 %v3698_v22 }
 0x5b9   :  { %v2860_v55 = vpop.eup %2859  ;;  %v1174_v21 = vsub.f32 1.0, %v1173_v27  ;;  %v1145_v1 = vmul.f32 %v3692_v33, %v1144_v18  ;;  %v1213_v53 = vand.u32 2147483648, %v3685_v24 }
 0x5ba   :  { %v3706_v19 = vpop.eup %2861  ;;  %v3712_v26 = vadd.f32 1.0, %v2860_v55  ;;  %v1159_v52 = vsub.f32 1.0, %v1158_v20  ;;  %v1168_v55 = vand.u32 2147483648, %v3678_v38  ;;  %v1190_v48 = vmul.f32 %v3694_v28, %v1189_v23 }
 0x5bb   :  { %v1203_v3 = vmul.f32 %v3706_v19, %v3685_v24  ;;  %v1175_v27 = vmul.f32 %v3696_v8, %v1174_v21  ;;  %vm1208_vm12 = vweird.f32 %v3706_v19  ;;  %v1214_v45 = vor.u32 1.1754944e-38, %v1213_v53 }
 0x5bc   :  { %2863 = vrcp.f32 %v3712_v26  ;;  %v1160_v20 = vmul.f32 %v3698_v22, %v1159_v52  ;;  %v1191_v23 = vadd.f32 %v3694_v28, %v1190_v48  ;;  %v1196_v52 = vand.u32 2147483647, %v3669_v37  ;;  %vm3754_vm6 = vmor %vm1207_vm5, %vm1208_vm12 }
 0x5bd   :  { %v1204_v17 = vsub.f32 1.0, %v1203_v3  ;;  %v1176_v21 = vadd.f32 %v3696_v8, %v1175_v27  ;;  %v1228_v36 = vand.u32 2147483648, %v3712_v26  ;;  %v1226_v27 = vand.u32 2147483647, %v3712_v26  ;;  %vm3772_vm12 = vmor %vm1192_vm14, %vm1193_vm1 }
 0x5be   :  { %vm3780_vm5 = vmor %vm1177_vm9, %vm1178_vm13  ;;  %vm1222_vm14 = vweird.f32 %v3712_v26  ;;  %vm1197_vm9 = vcmp.eq.f32.partialorder %v1196_v52, 8.507059e+37 }
 0x5bf   :  { %v1205_v62 = vmul.f32 %v3706_v19, %v1204_v17  ;;  %v1211_v17 = vand.u32 2147483647, %v3685_v24  ;;  %v1229_v44 = vor.u32 1.1754944e-38, %v1228_v36  ;;  %v1180_v51 = vsel %vm3780_vm5, %v3696_v8, %v1176_v21 }
 0x5c0   :  { %vm1227_vm13 = vcmp.eq.f32.partialorder %v1226_v27, 8.507059e+37  ;;  %vm1117_vm5 = vweird.f32 %v3663_v4  ;;  %v4564_v21 = vand.u32 2147483647, %v3667_v34  ;;  %v4565_v27 = vand.u32 2147483647, %v3665_v32 }
 0x5c1   :  { %v1206_v3 = vadd.f32 %v3706_v19, %v1205_v62  ;;  %v1198_v62 = vand.u32 2147483648, %v3669_v37  ;;  %v1146_v37 = vadd.f32 %v3692_v33, %v1145_v1 }
 0x5c2   :  { %v2864_v57 = vpop.eup %2863 }
 0x5c3   :  { %v1218_v60 = vmul.f32 %v2864_v57, %v3712_v26  ;;  %v1210_v24 = vsel %vm3754_vm6, %v3706_v19, %v1206_v3  ;;  %vm1223_vm15 = vweird.f32 %v2864_v57  ;;  %vm1212_vm6 = vcmp.eq.f32.partialorder %v1211_v17, 8.507059e+37  ;;  %v2962_v26 = vld [vmem:[%s4545_s6 + $0x8] sm:$0xff] }
 0x5c4   :  { %v1215_v53 = vsel %vm1212_vm6, %v1214_v45, %v1210_v24  ;;  %vm1224_vm1 = vmor %vm1222_vm14, %vm1223_vm15  ;;  %vm1182_vm15 = vcmp.eq.f32.partialorder %v1181_v14, 8.507059e+37  ;;  %v1138_v17 = vand.u32 2147483648, %v3665_v32  ;;  %v1169_v14 = vor.u32 1.1754944e-38, %v1168_v55 }
 0x5c5   :  { %v1219_v18 = vsub.f32 1.0, %v1218_v60  ;;  %v1161_v60 = vadd.f32 %v3698_v22, %v1160_v20  ;;  %v1195_v20 = vsel %vm3772_vm12, %v3694_v28, %v1191_v23  ;;  %v1131_v28 = vadd.f32 %v3689_v47, %v1130_v49  ;;  %vm3798_vm12 = vmor %vm1162_vm11, %vm1163_vm8 }
 0x5c6   :  { %v1116_v23 = vadd.f32 %v3687_v16, %v3721_v5  ;;  %vm3814_vm8 = vmor %vm1147_vm4, %vm1148_vm10  ;;  %vm1167_vm11 = vcmp.eq.f32.partialorder %v1166_v46, 8.507059e+37  ;;  %v1121_v46 = vand.u32 2147483647, %v3663_v4  ;;  %vm1152_vm4 = vcmp.eq.f32.partialorder %v4564_v21, 8.507059e+37 }
 0x5c7   :  { %v1220_v48 = vmul.f32 %v2864_v57, %v1219_v18  ;;  %v1199_v18 = vor.u32 1.1754944e-38, %v1198_v62  ;;  %v1165_v8 = vsel %vm3798_vm12, %v3698_v22, %v1161_v60  ;;  %v1185_v22 = vsel %vm1182_vm15, %v1184_v15, %v1180_v51  ;;  %vm3832_vm10 = vmor %vm1132_vm0, %vm1133_vm3  ;;  %v2960_v51 = vld [vmem:[%s4543_s5 + $0x8] sm:$0xff]  ;;  %v2963_v15 = vld [vmem:[%s4545_s6] sm:$0xff]  ;;  %s3009_s6 = smov 64  }
 0x5c8   :  { %v1170_v38 = vsel %vm1167_vm11, %v1169_v14, %v1165_v8  ;;  %v1244_v52 = vmul.f32 %v1185_v22, %v3646_v35  ;;  %vm1119_vm0 = vmor %vm1117_vm5, %vm1118_vm7  ;;  %v1139_v62 = vor.u32 1.1754944e-38, %v1138_v17  ;;  %vm1137_vm3 = vcmp.eq.f32.partialorder %v4565_v27, 8.507059e+37  ;;  %v631_v17 = vpop.permute.xlu2 %630 }
 0x5c9   :  { %v1221_v3 = vadd.f32 %v2864_v57, %v1220_v48  ;;  %v1200_v1 = vsel %vm1197_vm9, %v1199_v18, %v1195_v20  ;;  %v1120_v48 = vsel %vm1119_vm0, %v3687_v16, %v1116_v23  ;;  %vm1122_vm6 = vcmp.eq.f32.partialorder %v1121_v46, 8.507059e+37  ;;  %v2958_v18 = vld [vmem:[%s4543_s5 + $0x18] sm:$0xff] }
 0x5ca   :  { %v4566_v32 = vpack.c.bf16 %v3631_v11, %v3628_v9  ;;  %v4569_v9 = vpack.c.bf16 %v3585_v43, %v3582_v0  ;;  %v2552_v0 = vld [vmem:[%s4547_s8 + $0x10] sm:$0xf]  ;;  %v2651_v43 = vld [vmem:[%s4547_s8 + $0x14] sm:$0xf0] }
 0x5cb   :  { %v1225_v6 = vsel %vm1224_vm1, %v2864_v57, %v1221_v3  ;;  %v1246_v57 = vmul.f32 %v1215_v53, %v3660_v13  ;;  %v1150_v13 = vsel %vm3814_vm8, %v3692_v33, %v1146_v37  ;;  %v4563_v33 = vand.u32 2147483648, %v3667_v34  ;;  %v2959_v53 = vld [vmem:[%s4543_s5 + $0x10] sm:$0xff] }
 0x5cc   :  { %v1230_v36 = vsel %vm1227_vm13, %v1229_v44, %v1225_v6  ;;  %v1123_v44 = vand.u32 2147483648, %v3663_v4  ;;  %v1243_v4 = vmul.f32 %v1170_v38, %v3650_v39  ;;  %v4567_v39 = vpack.c.bf16 %v3623_v12, %v3620_v7  ;;  %v2954_v7 = vld [vmem:[%s4543_s5 + $0x38] sm:$0xff]  ;;  %v2957_v12 = vld [vmem:[%s4543_s5 + $0x20] sm:$0xff] }
 0x5cd   :  { %v1247_v49 = vmul.f32 %v1230_v36, %v3675_v42  ;;  %v1245_v42 = vmul.f32 %v1200_v1, %v3656_v2  ;;  %v1154_v55 = vor.u32 1.1754944e-38, %v4563_v33  ;;  %v1135_v2 = vsel %vm3832_vm10, %v3689_v47, %v1131_v28  ;;  %v2961_v28 = vld [vmem:[%s4543_s5] sm:$0xff]  ;;  %v627_v1 = vpop.permute.xlu0 %626  ;;  %v1258_v36 = vpop.permute.xlu1 %1257 }
 0x5ce   :  { %v1124_v47 = vor.u32 1.1754944e-38, %v1123_v44  ;;  %v1140_v45 = vsel %vm1137_vm3, %v1139_v62, %v1135_v2  ;;  %v2553_v11 = vor.u32 %v2651_v43, %v2552_v0  ;;  %vm4572_vm3 = vcmask 261120  }
 0x5cf   :  { %v1255_v5 = vpack.c.bf16 %v1247_v49, %v1246_v57  ;;  %v1155_v24 = vsel %vm1152_vm4, %v1154_v55, %v1150_v13  ;;  %v1254_v60 = vpack.c.bf16 %v1245_v42, %v1244_v52  ;;  %v1241_v19 = vmul.f32 %v1140_v45, %v3639_v29  ;;  %v2548_v29 = vld [vmem:[%s4547_s8] sm:$0xf] }
 0x5d0   :  { %v1242_v34 = vmul.f32 %v1155_v24, %v3642_v61  ;;  %v1125_v35 = vsel %vm1122_vm6, %v1124_v47, %v1120_v48  ;;  %v4568_v61 = vpack.c.bf16 %v3608_v30, %v3605_v56  ;;  %v2955_v56 = vld [vmem:[%s4543_s5 + $0x30] sm:$0xff]  ;;  %v2956_v30 = vld [vmem:[%s4543_s5 + $0x28] sm:$0xff]  ;;  %v641_v57 = vmul.f32 %v627_v1, %v3462_v59  ;;  %v635_v46 = vpop.permute.xlu2 %634 }
 0x5d1   :  { %1284 = vmatpush.bf16.msrb.mxu0 %v1255_v5  ;;  %v1240_v3 = vmul.f32 %v1125_v35, %v3636_v50  ;;  %v2650_v50 = vld [vmem:[%s4547_s8 + $0x4] sm:$0xf0]  ;;  %v642_v42 = vmul.f32 %v631_v17, %v3460_v58  ;;  %v643_v52 = vmul.f32 %v635_v46, %v3469_v63  ;;  %v3951_v46 = vld [vmem:[%s4539_s1] sm:$0xff]  ;;  %vm4570_vm4 = vcmask 130048  }
 0x5d2   :  { %v1253_v20 = vpack.c.bf16 %v1243_v4, %v1242_v34  ;;  %v2549_v37 = vor.u32 %v2650_v50, %v2548_v29  ;;  %vm4571_vm0 = vmmov %vm4570_vm4 }
 0x5d3   :  { %v1252_v16 = vpack.c.bf16 %v1241_v19, %v1240_v3  ;;  %vm4573_vm6 = vmmov %vm4571_vm0 }
 0x5d5   :  { %1285 = vmatpush.bf16.msrb.mxu0 %v1254_v60  ;;  %v1262_v22 = vpop.permute.xlu1 %1261  ;;  %v1266_v2 = vpop.permute.xlu0 %1265 }
 0x5d8   :  { %v1270_v45 = vpop.permute.xlu2 %1269 }
 0x5d9   :  { %1286 = vmatpush.bf16.msrb.mxu0 %v1253_v20 }
 0x5dd   :  { %1287 = vmatpush.bf16.msrb.mxu0 %v1252_v16  ;;  %v639_v47 = vpop.permute.xlu1 %638 }
 0x5de   :  { %v644_v3 = vmul.f32 %v639_v47, %v3477_v31 }
 0x5e1   :  { %1288 = vmatpush.bf16.msrb.mxu0 %v4566_v32 }
 0x5e5   :  { %1289 = vmatpush.bf16.msrb.mxu0 %v4567_v39 }
 0x5e9   :  { %1290 = vmatpush.bf16.msrb.mxu0 %v4568_v61 }
 0x5ed   :  { %1291 = vmatpush.bf16.msrb.mxu0 %v4569_v9 }
 0x5f0   :  { %1292 = vmatmul.bf16.vlgmr.msrb.gmra.mxu0 %v2549_v37 }
 0x5f1   :  { %1531 = vmatpush.bf16.msra.mxu0 %v2954_v7 }
 0x5f5   :  { %1532 = vmatpush.bf16.msra.mxu0 %v2955_v56 }
 0x5f9   :  { %1533 = vmatpush.bf16.msra.mxu0 %v2956_v30 }
 0x5fd   :  { %1534 = vmatpush.bf16.msra.mxu0 %v2957_v12 }
 0x600   :  { %1297 = vmatmul.bf16.gmra.mxu0 %v2553_v11 }
 0x601   :  { %1535 = vmatpush.bf16.msra.mxu0 %v2958_v18 }
 0x605   :  { %1536 = vmatpush.bf16.msra.mxu0 %v2959_v53 }
 0x609   :  { %1537 = vmatpush.bf16.msra.mxu0 %v2960_v51 }
 0x60d   :  { %1538 = vmatpush.bf16.msra.mxu0 %v2961_v28 }
 0x611   :  { %1680 = vmatpush.bf16.msrb.mxu0 %v2962_v26 }
 0x615   :  { %1681 = vmatpush.bf16.msrb.mxu0 %v2963_v15 }
 0x66d   :  { %v1293_v8 = vpop.f32.mrf.mxu0 }
 0x66e   :  { %v1294_v49 = vadd.f32 %v1293_v8, %v1258_v36 }
 0x670   :  { %v1303_v23 = vadd.f32 %v1294_v49, %v641_v57 }
 0x672   :  { %v1307_v10 = vmul.f32 %v1303_v23, %v1303_v23 }
 0x674   :  { %v1311_v14 = vmul.f32 %v1307_v10, %v1303_v23 }
 0x675   :  { %v1295_v13 = vpop.f32.mrf.mxu0 }
 0x676   :  { %v1315_v5 = vmul.f32 0.044715, %v1311_v14  ;;  %v1296_v44 = vadd.f32 %v1295_v13, %v1262_v22 }
 0x678   :  { %v1304_v6 = vadd.f32 %v1296_v44, %v642_v42  ;;  %v1319_v33 = vadd.f32 %v1315_v5, %v1303_v23  ;;  %v2964_v5 = vld [vmem:[%s4542_s4] sm:$0xff]  ;;  %v2965_v44 = vld [vmem:[%s4542_s4 + $0x8] sm:$0xff] }
 0x67a   :  { %v1308_v55 = vmul.f32 %v1304_v6, %v1304_v6  ;;  %v1323_v38 = vmul.f32 0.7978846, %v1319_v33  ;;  %v2967_v33 = vld [vmem:[%s4542_s4 + $0x18] sm:$0xff] }
 0x67c   :  { %v1312_v21 = vmul.f32 %v1308_v55, %v1304_v6  ;;  %2865 = vtanh.f32 %v1323_v38  ;;  %v3007_v55 = vmov 104   ;;  %v3008_v38 = vmov 105  }
 0x67d   :  { %v1298_v59 = vpop.f32.mrf.mxu0  ;;  %2743 = vset.pattern.permute.xlu1 %v3007_v55  ;;  %2745 = vset.pattern.permute.xlu0 %v3008_v38 }
 0x67e   :  { %v1316_v62 = vmul.f32 0.044715, %v1312_v21  ;;  %v1299_v24 = vadd.f32 %v1298_v59, %v1266_v2  ;;  %1490 = vperm.xlu1 %2743, %v3951_v46   ;;  %1510 = vperm.xlu0 %2745, %v3951_v46   ;;  %v3958_v2 = vld [vmem:[%s4539_s1 + $0x8] sm:$0xff]  ;;  %v2970_v21 = vld [vmem:[%s4542_s4 + $0x20] sm:$0xff]  ;;  %v3968_v59 = vld [vmem:[%s4539_s1 + $0x18] sm:$0xff] }
 0x67f   :  { %2744 = vset.pattern.permute.xlu2 %v3007_v55 }
 0x680   :  { %v1305_v48 = vadd.f32 %v1299_v24, %v643_v52  ;;  %v1320_v27 = vadd.f32 %v1316_v62, %v1304_v6  ;;  %1494 = vperm.xlu2 %2744, %v3958_v2   ;;  %v3975_v52 = vld [vmem:[%s4539_s1 + $0x10] sm:$0xff]  ;;  %v2973_v62 = vld [vmem:[%s4542_s4 + $0x28] sm:$0xff] }
 0x681   :  { %v2974_v24 = vld [vmem:[%s4542_s4 + $0x30] sm:$0xff] }
 0x682   :  { %v2866_v4 = vpop.eup %2865  ;;  %v1309_v60 = vmul.f32 %v1305_v48, %v1305_v48  ;;  %v1324_v58 = vmul.f32 0.7978846, %v1320_v27 }
 0x683   :  { %v1331_v34 = vadd.f32 1.0, %v2866_v4 }
 0x684   :  { %v1313_v35 = vmul.f32 %v1309_v60, %v1305_v48  ;;  %2867 = vtanh.f32 %v1324_v58 }
 0x685   :  { %v1300_v19 = vpop.f32.mrf.mxu0  ;;  %v1335_v20 = vmul.f32 0.5, %v1331_v34 }
 0x686   :  { %v1317_v16 = vmul.f32 0.044715, %v1313_v35  ;;  %v1301_v32 = vadd.f32 %v1300_v19, %v1270_v45  ;;  %2746 = vset.pattern.permute.xlu1 %v3008_v38  ;;  %1522 = vperm.xlu0 %2745, %v3968_v59  }
 0x687   :  { %v3912_v39 = vmul.f32 %v1335_v20, %v1303_v23  ;;  %1514 = vperm.xlu1 %2746, %v3958_v2  }
 0x688   :  { %v1306_v63 = vadd.f32 %v1301_v32, %v644_v3  ;;  %v1321_v61 = vadd.f32 %v1317_v16, %v1305_v48  ;;  %1498 = vperm.xlu2 %2744, %v3975_v52  }
 0x689   :  { %1363 = vmatmul.f32.vlgmr.msrb.gmra.mxu2 %v3912_v39  ;;  %v1343_v57 = vmul.f32 %v3912_v39, %v3912_v39 }
 0x68a   :  { %v2868_v29 = vpop.eup %2867  ;;  %v1310_v50 = vmul.f32 %v1306_v63, %v1306_v63  ;;  %v1325_v37 = vmul.f32 0.7978846, %v1321_v61 }
 0x68b   :  { %v1332_v9 = vadd.f32 1.0, %v2868_v29 }
 0x68c   :  { %v1314_v7 = vmul.f32 %v1310_v50, %v1306_v63  ;;  %2869 = vtanh.f32 %v1325_v37 }
 0x68d   :  { %v1336_v56 = vmul.f32 0.5, %v1332_v9 }
 0x68e   :  { %v1318_v30 = vmul.f32 0.044715, %v1314_v7  ;;  %1586 = vrot.lane.b32.xlu0 %v3951_v46, %s3010_s10 }
 0x68f   :  { %v3915_v0 = vmul.f32 %v1336_v56, %v1304_v6  ;;  %v2966_v6 = vld [vmem:[%s4542_s4 + $0x10] sm:$0xff]  ;;  %2747 = vset.pattern.permute.xlu1 %v3007_v55 }
 0x690   :  { %v1322_v43 = vadd.f32 %v1318_v30, %v1306_v63  ;;  %1502 = vperm.xlu1 %2747, %v3968_v59   ;;  %2748 = vset.pattern.permute.xlu2 %v3008_v38 }
 0x691   :  { %1366 = vmatmul.f32.gmra.mxu2 %v3915_v0  ;;  %v1344_v31 = vmul.f32 %v3915_v0, %v3915_v0  ;;  %1518 = vperm.xlu2 %2748, %v3975_v52  }
 0x692   :  { %v2870_v12 = vpop.eup %2869  ;;  %v1326_v11 = vmul.f32 0.7978846, %v1322_v43 }
 0x693   :  { %1378 = vmatmul.f32.vlgmr.msra.gmra.mxu3 %v1344_v31  ;;  %v1333_v18 = vadd.f32 1.0, %v2870_v12 }
 0x694   :  { %2871 = vtanh.f32 %v1326_v11 }
 0x695   :  { %v1337_v53 = vmul.f32 0.5, %v1333_v18 }
 0x697   :  { %v3920_v51 = vmul.f32 %v1337_v53, %v1305_v48  ;;  %v2975_v48 = vld [vmem:[%s4542_s4 + $0x38] sm:$0xff] }
 0x698   :  { %1550 = vrot.lane.b32.xlu1 %v3951_v46, %s3009_s6 }
 0x699   :  { %1369 = vmatmul.f32.gmra.mxu2 %v3920_v51  ;;  %v1345_v28 = vmul.f32 %v3920_v51, %v3920_v51  ;;  %1552 = vrot.lane.b32.xlu2 %v3958_v2, %s3009_s6 }
 0x69a   :  { %v2872_v26 = vpop.eup %2871 }
 0x69b   :  { %1381 = vmatmul.f32.gmra.mxu3 %v1345_v28  ;;  %v1334_v15 = vadd.f32 1.0, %v2872_v26 }
 0x69d   :  { %v1338_v1 = vmul.f32 0.5, %v1334_v15 }
 0x69f   :  { %v3925_v36 = vmul.f32 %v1338_v1, %v1306_v63 }
 0x6a0   :  { %1588 = vrot.lane.b32.xlu1 %v3958_v2, %s3010_s10 }
 0x6a1   :  { %1372 = vmatmul.f32.gmra.mxu2 %v3925_v36  ;;  %v1346_v8 = vmul.f32 %v3925_v36, %v3925_v36 }
 0x6a3   :  { %1384 = vmatmul.f32.gmra.mxu3 %v1346_v8 }
 0x6a8   :  { %1554 = vrot.lane.b32.xlu1 %v3975_v52, %s3009_s6 }
 0x6a9   :  { %1375 = vmatmul.f32.gmra.mxu2 %v1343_v57 }
 0x6b0   :  { %1592 = vrot.lane.b32.xlu1 %v3968_v59, %s3010_s10 }
 0x6f0   :  { %v1491_v53 = vpop.permute.xlu1 %1490 }
 0x70c   :  { %v1364_v49 = vpop.f32.mrf.mxu2 }
 0x714   :  { %v1367_v23 = vpop.f32.mrf.mxu2 }
 0x716   :  { %v1379_v17 = vpop.f32.mrf.mxu3 }
 0x71c   :  { %v1370_v10 = vpop.f32.mrf.mxu2 }
 0x71e   :  { %v1382_v14 = vpop.f32.mrf.mxu3 }
 0x724   :  { %v1373_v22 = vpop.f32.mrf.mxu2 }
 0x726   :  { %v1385_v13 = vpop.f32.mrf.mxu3 }
 0x727   :  { %1396 = vmatpush.msra.mxu1 %v1385_v13  ;;  %v1495_v13 = vpop.permute.xlu2 %1494 }
 0x729   :  { %1397 = vmatpush.msra.mxu1 %v1382_v14 }
 0x72b   :  { %1398 = vmatpush.msra.mxu1 %v1379_v17 }
 0x72c   :  { %v1376_v42 = vpop.f32.mrf.mxu2 }
 0x72d   :  { %1399 = vmatpush.msra.mxu1 %v1376_v42 }
 0x72f   :  { %1400 = vmatpush.msra.mxu1 %v1373_v22 }
 0x731   :  { %1401 = vmatpush.msra.mxu1 %v1370_v10 }
 0x733   :  { %1402 = vmatpush.msra.mxu1 %v1367_v23 }
 0x735   :  { %1403 = vmatpush.msra.mxu1 %v1364_v49 }
 0x736   :  { %2554 = vmatmul.msk.f32.vlgmr.msra.gmra.mxu1 %vm201_vm2, %v2964_v5 }
 0x73e   :  { %2555 = vmatmul.msk.f32.gmra.mxu1 %vm201_vm2, %v2965_v44 }
 0x746   :  { %2556 = vmatmul.msk.f32.gmra.mxu1 %vm201_vm2, %v2966_v6 }
 0x74e   :  { %2557 = vmatmul.msk.f32.gmra.mxu1 %vm201_vm2, %v2967_v33  ;;  %v1515_v33 = vpop.permute.xlu1 %1514 }
 0x756   :  { %2558 = vmatmul.msk.f32.gmra.mxu1 %vm201_vm2, %v2970_v21 }
 0x75e   :  { %2559 = vmatmul.msk.f32.gmra.mxu1 %vm201_vm2, %v2973_v62 }
 0x766   :  { %2560 = vmatmul.msk.f32.gmra.mxu1 %vm201_vm2, %v2974_v24 }
 0x76e   :  { %2561 = vmatmul.msk.f32.gmra.mxu1 %vm201_vm2, %v2975_v48 }
 0x7b3   :  { %v1405_v27 = vpop.f32.mrf.mxu1 }
 0x7b4   :  { %v1429_v47 = vmul.f32 %v1405_v27, %v1405_v27  ;;  %v1481_v15 = vsub.f32 %v3912_v39, %v1405_v27  ;;  %v1511_v39 = vpop.permute.xlu0 %1510 }
 0x7bb   :  { %v1408_v4 = vpop.f32.mrf.mxu1 }
 0x7bc   :  { %v1430_v19 = vmul.f32 %v1408_v4, %v1408_v4  ;;  %v1482_v14 = vsub.f32 %v3915_v0, %v1408_v4 }
 0x7c3   :  { %v4004_v60 = vpop.f32.mrf.mxu1 }
 0x7c4   :  { %v1431_v29 = vmul.f32 %v4004_v60, %v4004_v60 }
 0x7cb   :  { %v4006_v58 = vpop.f32.mrf.mxu1 }
 0x7cc   :  { %v1432_v11 = vmul.f32 %v4006_v58, %v4006_v58 }
 0x7d3   :  { %v1417_v45 = vpop.f32.mrf.mxu1 }
 0x7d4   :  { %v1433_v34 = vsub.f32 %v1417_v45, %v1429_v47  ;;  %v1499_v45 = vpop.permute.xlu2 %1498 }
 0x7d6   :  { %v1437_v35 = vadd.f32 1e-05, %v1433_v34 }
 0x7d8   :  { %2873 = vrsqrt.f32 %v1437_v35  ;;  %vm1447_vm7 = vweird.f32 %v1437_v35 }
 0x7db   :  { %v1420_v20 = vpop.f32.mrf.mxu1 }
 0x7dc   :  { %v1434_v3 = vsub.f32 %v1420_v20, %v1430_v19 }
 0x7de   :  { %v2874_v16 = vpop.eup %2873  ;;  %v1438_v32 = vadd.f32 1e-05, %v1434_v3 }
 0x7df   :  { %v1442_v63 = vmul.f32 %v2874_v16, %v1437_v35  ;;  %vm1448_vm2 = vweird.f32 %v2874_v16  ;;  %v1483_v35 = vsub.f32 %v3920_v51, %v4004_v60 }
 0x7e0   :  { %2875 = vrsqrt.f32 %v1438_v32  ;;  %vm1449_vm14 = vmor %vm1447_vm7, %vm1448_vm2  ;;  %vm1457_vm9 = vweird.f32 %v1438_v32 }
 0x7e1   :  { %v1443_v61 = vmul.f32 %v2874_v16, %v1442_v63  ;;  %vm4574_vm2 = vmmov %vm4571_vm0 }
 0x7e2   :  { %vm4575_vm7 = vmmov %vm4572_vm3 }
 0x7e3   :  { %v1444_v50 = vmul.f32 0.5, %v1443_v61  ;;  %v1423_v37 = vpop.f32.mrf.mxu1 }
 0x7e4   :  { %v1435_v9 = vsub.f32 %v1423_v37, %v1431_v29 }
 0x7e5   :  { %v1445_v7 = vsub.f32 1.5, %v1444_v50  ;;  %v1519_v50 = vpop.permute.xlu2 %1518 }
 0x7e6   :  { %v2876_v56 = vpop.eup %2875  ;;  %v1439_v30 = vadd.f32 1e-05, %v1435_v9  ;;  %v1523_v9 = vpop.permute.xlu0 %1522 }
 0x7e7   :  { %v1452_v43 = vmul.f32 %v2876_v56, %v1438_v32  ;;  %v1446_v31 = vmul.f32 %v2874_v16, %v1445_v7  ;;  %vm1458_vm1 = vweird.f32 %v2876_v56  ;;  %v1503_v32 = vpop.permute.xlu1 %1502 }
 0x7e8   :  { %2877 = vrsqrt.f32 %v1439_v30  ;;  %vm1459_vm13 = vmor %vm1457_vm9, %vm1458_vm1  ;;  %vm1467_vm15 = vweird.f32 %v1439_v30 }
 0x7e9   :  { %v1453_v12 = vmul.f32 %v2876_v56, %v1452_v43  ;;  %v1450_v28 = vsel %vm1449_vm14, %v2874_v16, %v1446_v31  ;;  %v1484_v16 = vsub.f32 %v3925_v36, %v4006_v58  ;;  %vm4576_vm14 = vmmov %vm4572_vm3 }
 0x7ea   :  { %v1485_v49 = vmul.f32 %v1481_v15, %v1450_v28  ;;  %vm4577_vm1 = vmmov %vm4572_vm3 }
 0x7eb   :  { %v1454_v18 = vmul.f32 0.5, %v1453_v12  ;;  %v1426_v26 = vpop.f32.mrf.mxu1  ;;  %vm4578_vm9 = vmmov %vm4577_vm1 }
 0x7ec   :  { %v1436_v1 = vsub.f32 %v1426_v26, %v1432_v11  ;;  %v1505_v44 = vmul.f32 %v1491_v53, %v1485_v49 }
 0x7ed   :  { %v1455_v8 = vsub.f32 1.5, %v1454_v18 }
 0x7ee   :  { %v2878_v57 = vpop.eup %2877  ;;  %v1440_v23 = vadd.f32 1e-05, %v1436_v1  ;;  %v4014_v62 = vadd.f32 %v1511_v39, %v1505_v44 }
 0x7ef   :  { %v1462_v17 = vmul.f32 %v2878_v57, %v1439_v30  ;;  %v1456_v10 = vmul.f32 %v2876_v56, %v1455_v8  ;;  %vm1468_vm12 = vweird.f32 %v2878_v57  ;;  %v1551_v60 = vpop.permute.xlu1 %1550  ;;  %v3011_v30 = vmov 106  }
 0x7f0   :  { %2879 = vrsqrt.f32 %v1440_v23  ;;  %vm1469_vm8 = vmor %vm1467_vm15, %vm1468_vm12  ;;  %vm1477_vm5 = vweird.f32 %v1440_v23  ;;  %2759 = vset.pattern.permute.xlu1 %v3011_v30  ;;  %2760 = vset.pattern.permute.xlu2 %v3011_v30 }
 0x7f1   :  { %v1463_v22 = vmul.f32 %v2878_v57, %v1462_v17  ;;  %v1460_v42 = vsel %vm1459_vm13, %v2876_v56, %v1456_v10  ;;  %2761 = vset.pattern.permute.xlu0 %v3011_v30  ;;  %vm4579_vm13 = vmmov %vm4577_vm1 }
 0x7f2   :  { %v1486_v5 = vmul.f32 %v1482_v14, %v1460_v42  ;;  %vm4580_vm12 = vmmov %vm4577_vm1 }
 0x7f3   :  { %v1464_v6 = vmul.f32 0.5, %v1463_v22  ;;  %vm4581_vm15 = vmmov %vm4577_vm1 }
 0x7f4   :  { %v1506_v55 = vmul.f32 %v1495_v13, %v1486_v5 }
 0x7f5   :  { %v1465_v38 = vsub.f32 1.5, %v1464_v6 }
 0x7f6   :  { %v2880_v21 = vpop.eup %2879  ;;  %v4016_v24 = vadd.f32 %v1515_v33, %v1506_v55 }
 0x7f7   :  { %v1472_v48 = vmul.f32 %v2880_v21, %v1440_v23  ;;  %v1466_v27 = vmul.f32 %v2878_v57, %v1465_v38  ;;  %vm1478_vm11 = vweird.f32 %v2880_v21  ;;  %v1589_v31 = vpop.permute.xlu1 %1588  ;;  %v1587_v23 = vpop.permute.xlu0 %1586 }
 0x7f8   :  { %v1529_v0 = vpack.c.bf16 %v4016_v24, %v4014_v62  ;;  %vm1479_vm10 = vmor %vm1477_vm5, %vm1478_vm11 }
 0x7f9   :  { %v1473_v4 = vmul.f32 %v2880_v21, %v1472_v48  ;;  %v1470_v34 = vsel %vm1469_vm8, %v2878_v57, %v1466_v27  ;;  %v2976_v48 = vld [vmem:[%s4544_s2 + $0x78] sm:$0xff]  ;;  %v2977_v27 = vld [vmem:[%s4544_s2 + $0x68] sm:$0xff]  ;;  %vm4582_vm8 = vmmov %vm4577_vm1 }
 0x7fa   :  { %1539 = vmatmul.bf16.vlgmr.msra.gmra.mxu0 %v1529_v0  ;;  %v1487_v20 = vmul.f32 %v1483_v35, %v1470_v34  ;;  %v2978_v0 = vld [vmem:[%s4544_s2 + $0x70] sm:$0xff]  ;;  %v2982_v34 = vld [vmem:[%s4544_s2 + $0x40] sm:$0xff]  ;;  %v2983_v35 = vld [vmem:[%s4544_s2 + $0x28] sm:$0xff] }
 0x7fb   :  { %v1474_v47 = vmul.f32 0.5, %v1473_v4  ;;  %v2979_v4 = vld [vmem:[%s4544_s2 + $0x50] sm:$0xff]  ;;  %vm4583_vm11 = vmmov %vm4577_vm1 }
 0x7fc   :  { %v1507_v61 = vmul.f32 %v1499_v45, %v1487_v20  ;;  %v2981_v45 = vld [vmem:[%s4544_s2 + $0x60] sm:$0xff]  ;;  %v2985_v20 = vld [vmem:[%s4544_s2 + $0x38] sm:$0xff] }
 0x7fd   :  { %v1475_v19 = vsub.f32 1.5, %v1474_v47  ;;  %v2980_v47 = vld [vmem:[%s4544_s2 + $0x30] sm:$0xff] }
 0x7fe   :  { %v4024_v7 = vadd.f32 %v1519_v50, %v1507_v61  ;;  %v2990_v61 = vld [vmem:[%s4544_s2 + $0x8] sm:$0xff]  ;;  %v3013_v50 = vmov 107  }
 0x7ff   :  { %v1476_v3 = vmul.f32 %v2880_v21, %v1475_v19  ;;  %v1555_v53 = vpop.permute.xlu1 %1554  ;;  %v2984_v19 = vld [vmem:[%s4544_s2 + $0x58] sm:$0xff] }
 0x801   :  { %v1480_v63 = vsel %vm1479_vm10, %v2880_v21, %v1476_v3  ;;  %v3012_v21 = vmov 1   ;;  %v2986_v3 = vld [vmem:[%s4544_s2] sm:$0xff] }
 0x802   :  { %v1488_v29 = vmul.f32 %v1484_v16, %v1480_v63  ;;  %v2987_v16 = vld [vmem:[%s4544_s2 + $0x48] sm:$0xff]  ;;  %v2989_v63 = vld [vmem:[%s4544_s2 + $0x20] sm:$0xff] }
 0x804   :  { %v1508_v37 = vmul.f32 %v1503_v32, %v1488_v29  ;;  %v2988_v32 = vld [vmem:[%s4544_s2 + $0x10] sm:$0xff]  ;;  %v2991_v29 = vld [vmem:[%s4544_s2 + $0x18] sm:$0xff] }
 0x806   :  { %v4026_v56 = vadd.f32 %v1523_v9, %v1508_v37  ;;  %v3014_v37 = vmov 108  }
 0x807   :  { %v1593_v42 = vpop.permute.xlu1 %1592 }
 0x808   :  { %v1530_v51 = vpack.c.bf16 %v4026_v56, %v4024_v7 }
 0x80a   :  { %1544 = vmatmul.bf16.gmra.mxu0 %v1530_v51 }
 0x877   :  { %v1540_v36 = vpop.f32.mrf.mxu0 }
 0x878   :  { %v4030_v58 = vmul.f32 %v1551_v60, %v1540_v36  ;;  %v1602_v43 = vmul.f32 %v1540_v36, %v3368_v25 }
 0x87a   :  { %1610 = vrot.lane.b32.xlu2 %v1602_v43, %s2999_s12  ;;  %1570 = vrot.lane.b32.xlu1 %v4030_v58, %s2999_s12 }
 0x87f   :  { %v1542_v12 = vpop.f32.mrf.mxu0 }
 0x880   :  { %v1603_v11 = vmul.f32 %v1542_v12, %v3349_v54  ;;  %v1599_v18 = vmul.f32 %v1589_v31, %v1542_v12  ;;  %v1553_v54 = vpop.permute.xlu2 %1552 }
 0x881   :  { %v4048_v1 = vmul.f32 %v1553_v54, %v1542_v12 }
 0x882   :  { %1556 = vrot.lane.b32.xlu2 %v3968_v59, %s3009_s6  ;;  %1612 = vrot.lane.b32.xlu0 %v1603_v11, %s2999_s12 }
 0x887   :  { %v1545_v28 = vpop.f32.mrf.mxu0 }
 0x888   :  { %v4040_v26 = vmul.f32 %v1555_v53, %v1545_v28  ;;  %v1604_v25 = vmul.f32 %v1545_v28, %v3377_v40 }
 0x88a   :  { %1590 = vrot.lane.b32.xlu0 %v3975_v52, %s3010_s10  ;;  %1614 = vrot.lane.b32.xlu2 %v1604_v25, %s2999_s12 }
 0x88b   :  { %1574 = vrot.lane.b32.xlu1 %v4040_v26, %s2999_s12 }
 0x88f   :  { %v1547_v15 = vpop.f32.mrf.mxu0 }
 0x890   :  { %v1605_v8 = vmul.f32 %v1547_v15, %v3380_v41  ;;  %v1598_v41 = vmul.f32 %v1587_v23, %v1540_v36  ;;  %v1601_v44 = vmul.f32 %v1593_v42, %v1547_v15 }
 0x892   :  { %1572 = vrot.lane.b32.xlu2 %v4048_v1, %s2999_s12  ;;  %1616 = vrot.lane.b32.xlu0 %v1605_v8, %s2999_s12 }
 0x893   :  { %1657 = vperm.xlu1 %2759, %v3975_v52  }
 0x89b   :  { %1653 = vperm.xlu1 %2759, %v3958_v2  }
 0x8a3   :  { %2763 = vset.pattern.permute.xlu1 %v3012_v21 }
 0x8a4   :  { %1796 = vperm.xlu1 %2763, %v2976_v48  }
 0x8ac   :  { %1776 = vperm.xlu1 %2763, %v2979_v4   ;;  %v2659_v4 = vld [vmem:[%s4546_s7 + $0x78] sm:$0xff] }
 0x8b4   :  { %1768 = vperm.xlu1 %2763, %v2982_v34  }
 0x8bc   :  { %1764 = vperm.xlu1 %2763, %v2985_v20  }
 0x8c4   :  { %1744 = vperm.xlu1 %2763, %v2988_v32  }
 0x8cc   :  { %1740 = vperm.xlu1 %2763, %v2990_v61  }
 0x8d4   :  { %v1611_v40 = vpop.permute.xlu2 %1610  ;;  %2767 = vset.pattern.permute.xlu1 %v3014_v37 }
 0x8d5   :  { %v1622_v10 = vadd.f32 %v1611_v40, %v1598_v41  ;;  %1702 = vperm.xlu1 %2767, %v3975_v52  }
 0x8dc   :  { %v1557_v57 = vpop.permute.xlu2 %1556 }
 0x8dd   :  { %v4056_v49 = vmul.f32 %v1557_v57, %v1547_v15  ;;  %1698 = vperm.xlu1 %2767, %v3958_v2  }
 0x8df   :  { %1576 = vrot.lane.b32.xlu2 %v4056_v49, %s2999_s12 }
 0x8e4   :  { %v1615_v6 = vpop.permute.xlu2 %1614 }
 0x8e5   :  { %2770 = vset.pattern.permute.xlu1 %v3013_v50 }
 0x8e6   :  { %2257 = vperm.xlu1 %2770, %v3951_v46  }
 0x8e7   :  { %1661 = vperm.xlu2 %2760, %v3968_v59  }
 0x8ec   :  { %v1571_v9 = vpop.permute.xlu1 %1570  ;;  %v1573_v51 = vpop.permute.xlu2 %1572 }
 0x8ed   :  { %v1582_v30 = vsub.f32 %v4030_v58, %v1571_v9  ;;  %v1583_v36 = vsub.f32 %v4048_v1, %v1573_v51 }
 0x8ef   :  { %2762 = vset.pattern.permute.xlu2 %v3012_v21 }
 0x8f0   :  { %1792 = vperm.xlu2 %2762, %v2978_v0  }
 0x8f4   :  { %v1613_v17 = vpop.permute.xlu0 %1612 }
 0x8f5   :  { %v1623_v14 = vadd.f32 %v1613_v17, %v1599_v18 }
 0x8f7   :  { %v2749_v22 = vpack.i.bf16 %v1623_v14, %v1622_v10 }
 0x8f8   :  { %1784 = vperm.xlu2 %2762, %v2981_v45  }
 0x8f9   :  { %2750 = vrot.lane.b32.xlu0 %v2749_v22, %s3004_s30 }
 0x8fc   :  { %v1591_v13 = vpop.permute.xlu0 %1590 }
 0x8fd   :  { %v1600_v5 = vmul.f32 %v1591_v13, %v1545_v28 }
 0x8ff   :  { %v1624_v33 = vadd.f32 %v1615_v6, %v1600_v5 }
 0x900   :  { %1780 = vperm.xlu2 %2762, %v2984_v19  }
 0x904   :  { %v1617_v39 = vpop.permute.xlu0 %1616 }
 0x905   :  { %v1625_v55 = vadd.f32 %v1617_v39, %v1601_v44  ;;  %v2655_v39 = vld [vmem:[%s4546_s7 + $0x58] sm:$0xff] }
 0x907   :  { %v2754_v38 = vpack.i.bf16 %v1625_v55, %v1624_v33  ;;  %v2656_v33 = vld [vmem:[%s4546_s7 + $0x60] sm:$0xff]  ;;  %v2657_v55 = vld [vmem:[%s4546_s7 + $0x68] sm:$0xff] }
 0x908   :  { %1772 = vperm.xlu2 %2762, %v2987_v16  }
 0x909   :  { %2755 = vrot.lane.b32.xlu0 %v2754_v38, %s3004_s30 }
 0x910   :  { %1752 = vperm.xlu2 %2762, %v2989_v63  }
 0x911   :  { %1649 = vperm.xlu0 %2761, %v3951_v46  }
 0x918   :  { %1748 = vperm.xlu2 %2762, %v2991_v29  }
 0x919   :  { %2764 = vset.pattern.permute.xlu0 %v3012_v21  ;;  %v2658_v21 = vld [vmem:[%s4546_s7 + $0x70] sm:$0xff] }
 0x91a   :  { %1788 = vperm.xlu0 %2764, %v2977_v27  }
 0x920   :  { %2765 = vset.pattern.permute.xlu2 %v3014_v37 }
 0x921   :  { %1706 = vperm.xlu2 %2765, %v3968_v59  }
 0x922   :  { %1760 = vperm.xlu0 %2764, %v2980_v47  }
 0x929   :  { %2768 = vset.pattern.permute.xlu2 %v3013_v50 }
 0x92a   :  { %1756 = vperm.xlu0 %2764, %v2983_v35   ;;  %2265 = vperm.xlu2 %2768, %v3975_v52   ;;  %v1575_v52 = vpop.permute.xlu1 %1574 }
 0x92b   :  { %v1584_v58 = vsub.f32 %v4040_v26, %v1575_v52 }
 0x932   :  { %1736 = vperm.xlu0 %2764, %v2986_v3   ;;  %2261 = vperm.xlu2 %2768, %v3958_v2   ;;  %v1658_v57 = vpop.permute.xlu1 %1657 }
 0x933   :  { %v1666_v17 = vmul.f32 %v1658_v57, %v4024_v7 }
 0x939   :  { %v1577_v18 = vpop.permute.xlu2 %1576 }
 0x93a   :  { %2766 = vset.pattern.permute.xlu0 %v3013_v50  ;;  %v1585_v28 = vsub.f32 %v4056_v49, %v1577_v18  ;;  %v1654_v41 = vpop.permute.xlu1 %1653 }
 0x93b   :  { %2269 = vperm.xlu0 %2766, %v3968_v59   ;;  %v1665_v14 = vmul.f32 %v1654_v41, %v4016_v24  ;;  %v2652_v24 = vld [vmem:[%s4546_s7 + $0x40] sm:$0xff] }
 0x941   :  { %v1662_v23 = vpop.permute.xlu2 %1661 }
 0x942   :  { %v1667_v26 = vmul.f32 %v1662_v23, %v4026_v56  ;;  %v2654_v56 = vld [vmem:[%s4546_s7 + $0x50] sm:$0xff]  ;;  %v4170_v38 = vpop.permute.xlu1 %1796 }
 0x943   :  { %2769 = vset.pattern.permute.xlu0 %v3014_v37 }
 0x944   :  { %1694 = vperm.xlu0 %2769, %v3951_v46  }
 0x94a   :  { %v4176_v48 = vpop.permute.xlu1 %1776  ;;  %v4180_v0 = vpop.permute.xlu2 %1792 }
 0x952   :  { %v4185_v47 = vpop.permute.xlu1 %1768  ;;  %v4190_v34 = vpop.permute.xlu2 %1784 }
 0x95a   :  { %v4192_v35 = vpop.permute.xlu1 %1764  ;;  %v4196_v20 = vpop.permute.xlu2 %1780 }
 0x962   :  { %v1745_v3 = vpop.permute.xlu1 %1744  ;;  %v4201_v29 = vpop.permute.xlu2 %1772 }
 0x96a   :  { %v1741_v37 = vpop.permute.xlu1 %1740 }
 0x96b   :  { %v2751_v60 = vpop.permute.xlu0 %2750 }
 0x96c   :  { %v2753_v43 = vunpack.i.h.bf16 %v2751_v60  ;;  %v2752_v31 = vunpack.i.l.bf16 %v2751_v60 }
 0x96e   :  { %v1643_v12 = vsel %vm4570_vm4, %v1583_v36, %v2753_v43  ;;  %v1642_v11 = vsel %vm4571_vm0, %v1582_v30, %v2752_v31  ;;  %v1753_v43 = vpop.permute.xlu2 %1752 }
 0x96f   :  { %v1646_v59 = vpack.c.bf16 %v1643_v12, %v1642_v11 }
 0x971   :  { %2562 = vmatmul.msk.bf16.vlgmr.msrb.gmra.mxu0 %vm4572_vm3, %v1646_v59 }
 0x97b   :  { %v2756_v53 = vpop.permute.xlu0 %2755 }
 0x97c   :  { %v2758_v25 = vunpack.i.h.bf16 %v2756_v53  ;;  %v2757_v54 = vunpack.i.l.bf16 %v2756_v53 }
 0x97e   :  { %v1644_v15 = vsel %vm4573_vm6, %v1584_v58, %v2757_v54  ;;  %v1645_v1 = vsel %vm4574_vm2, %v1585_v28, %v2758_v25  ;;  %v1749_v25 = vpop.permute.xlu2 %1748 }
 0x97f   :  { %v1647_v8 = vpack.c.bf16 %v1645_v1, %v1644_v15 }
 0x981   :  { %2563 = vmatmul.msk.bf16.gmra.mxu0 %vm4575_vm7, %v1647_v8 }
 0x983   :  { %v1650_v49 = vpop.permute.xlu0 %1649 }
 0x984   :  { %v1664_v42 = vmul.f32 %v1650_v49, %v4014_v62  ;;  %v2653_v62 = vld [vmem:[%s4546_s7 + $0x48] sm:$0xff] }
 0x98c   :  { %v4178_v27 = vpop.permute.xlu0 %1788 }
 0x994   :  { %v4187_v45 = vpop.permute.xlu0 %1760 }
 0x99c   :  { %v4194_v19 = vpop.permute.xlu0 %1756 }
 0x9a4   :  { %v1737_v16 = vpop.permute.xlu0 %1736 }
 0x9ee   :  { %v1683_v46 = vpop.f32.mrf.mxu0 }
 0x9ef   :  { %v4142_v6 = vadd.f32 %v1683_v46, %v1664_v42 }
 0x9f6   :  { %v1685_v40 = vpop.f32.mrf.mxu0 }
 0x9f7   :  { %v4138_v5 = vadd.f32 %v1685_v40, %v1665_v14 }
 0x9f9   :  { %v1733_v7 = vpack.c.bf16 %v4138_v5, %v4142_v6 }
 0x9fe   :  { %v1688_v2 = vpop.f32.mrf.mxu0 }
 0x9ff   :  { %v4133_v22 = vadd.f32 %v1688_v2, %v1666_v17 }
 0xa06   :  { %v1690_v10 = vpop.f32.mrf.mxu0 }
 0xa07   :  { %v4135_v13 = vadd.f32 %v1690_v10, %v1667_v26 }
 0xa09   :  { %v1734_v44 = vpack.c.bf16 %v4135_v13, %v4133_v22 }
 0xa0b   :  { %1869 = vmatpush.bf16.msra.mxu2 %v1734_v44 }
 0xa0f   :  { %1870 = vmatpush.bf16.msra.mxu2 %v1733_v7 }
 0xa12   :  { %2596 = vmatmul.msk.bf16.vlgmr.msra.gmra.mxu2 %vm4576_vm14, %v2652_v24 }
 0xa22   :  { %2597 = vmatmul.msk.bf16.gmra.mxu2 %vm4577_vm1, %v2653_v62 }
 0xa32   :  { %2598 = vmatmul.msk.bf16.gmra.mxu2 %vm4578_vm9, %v2654_v56 }
 0xa42   :  { %2599 = vmatmul.msk.bf16.gmra.mxu2 %vm4579_vm13, %v2655_v39 }
 0xa52   :  { %2600 = vmatmul.msk.bf16.gmra.mxu2 %vm4580_vm12, %v2656_v33 }
 0xa62   :  { %2601 = vmatmul.msk.bf16.gmra.mxu2 %vm4581_vm15, %v2657_v55 }
 0xa72   :  { %2602 = vmatmul.msk.bf16.gmra.mxu2 %vm4582_vm8, %v2658_v21 }
 0xa82   :  { %2603 = vmatmul.msk.bf16.gmra.mxu2 %vm4583_vm11, %v2659_v4 }
 0xa95   :  { %v1872_v32 = vpop.f32.mrf.mxu2 }
 0xa96   :  { %v4198_v63 = vadd.f32 %v1872_v32, %v1737_v16 }
 0xa98   :  { %v2604_v61 = vmul.f32 -1.702, %v4198_v63 }
 0xa9a   :  { %v1944_v50 = vmul.f32 1.442695, %v2604_v61 }
 0xa9c   :  { %2881 = vpow2.f32 %v1944_v50 }
 0xa9d   :  { %v1874_v9 = vpop.f32.mrf.mxu2 }
 0xa9e   :  { %v4203_v51 = vadd.f32 %v1874_v9, %v1741_v37 }
 0xaa0   :  { %v2605_v60 = vmul.f32 -1.702, %v4203_v51 }
 0xaa2   :  { %v2882_v30 = vpop.eup %2881  ;;  %v1946_v36 = vmul.f32 1.442695, %v2605_v60 }
 0xaa3   :  { %v1976_v31 = vadd.f32 1.0, %v2882_v30 }
 0xaa4   :  { %2883 = vpow2.f32 %v1946_v36 }
 0xaa5   :  { %2885 = vrcp.f32 %v1976_v31  ;;  %v1877_v12 = vpop.f32.mrf.mxu2  ;;  %v2003_v26 = vand.u32 2147483648, %v1976_v31  ;;  %vm1997_vm10 = vweird.f32 %v1976_v31  ;;  %v2001_v10 = vand.u32 2147483647, %v1976_v31 }
 0xaa6   :  { %v4206_v11 = vadd.f32 %v1877_v12, %v1745_v3 }
 0xaa7   :  { %v2004_v39 = vor.u32 1.1754944e-38, %v2003_v26  ;;  %vm2002_vm3 = vcmp.eq.f32.partialorder %v2001_v10, 8.507059e+37 }
 0xaa8   :  { %v2606_v59 = vmul.f32 -1.702, %v4206_v11 }
 0xaaa   :  { %v2884_v52 = vpop.eup %2883  ;;  %v1948_v18 = vmul.f32 1.442695, %v2606_v59 }
 0xaab   :  { %v2886_v53 = vpop.eup %2885  ;;  %v1977_v58 = vadd.f32 1.0, %v2884_v52 }
 0xaac   :  { %v1993_v28 = vmul.f32 %v2886_v53, %v1976_v31  ;;  %2887 = vpow2.f32 %v1948_v18  ;;  %vm1998_vm5 = vweird.f32 %v2886_v53 }
 0xaad   :  { %2889 = vrcp.f32 %v1977_v58  ;;  %v1879_v54 = vpop.f32.mrf.mxu2  ;;  %vm1999_vm4 = vmor %vm1997_vm10, %vm1998_vm5  ;;  %v2016_v44 = vand.u32 2147483647, %v1977_v58  ;;  %v2018_v7 = vand.u32 2147483648, %v1977_v58  ;;  %vm2012_vm6 = vweird.f32 %v1977_v58 }
 0xaae   :  { %v1994_v15 = vsub.f32 1.0, %v1993_v28  ;;  %v4209_v1 = vadd.f32 %v1879_v54, %v1749_v25 }
 0xaaf   :  { %v2019_v16 = vor.u32 1.1754944e-38, %v2018_v7  ;;  %vm2017_vm7 = vcmp.eq.f32.partialorder %v2016_v44, 8.507059e+37 }
 0xab0   :  { %v1995_v8 = vmul.f32 %v2886_v53, %v1994_v15  ;;  %v2607_v46 = vmul.f32 -1.702, %v4209_v1 }
 0xab2   :  { %v2888_v40 = vpop.eup %2887  ;;  %v1950_v57 = vmul.f32 1.442695, %v2607_v46  ;;  %v1996_v41 = vadd.f32 %v2886_v53, %v1995_v8 }
 0xab3   :  { %v2890_v2 = vpop.eup %2889  ;;  %v4212_v23 = vadd.f32 1.0, %v2888_v40 }
 0xab4   :  { %v2008_v17 = vmul.f32 %v2890_v2, %v1977_v58  ;;  %2891 = vpow2.f32 %v1950_v57  ;;  %v2000_v24 = vsel %vm1999_vm4, %v2886_v53, %v1996_v41  ;;  %vm2013_vm0 = vweird.f32 %v2890_v2 }
 0xab5   :  { %2893 = vrcp.f32 %v4212_v23  ;;  %v1882_v49 = vpop.f32.mrf.mxu2  ;;  %v2005_v3 = vsel %vm2002_vm3, %v2004_v39, %v2000_v24  ;;  %vm2014_vm2 = vmor %vm2012_vm6, %vm2013_vm0  ;;  %vm2027_vm1 = vweird.f32 %v4212_v23  ;;  %v2031_v25 = vand.u32 2147483647, %v4212_v23 }
 0xab6   :  { %v2009_v14 = vsub.f32 1.0, %v2008_v17  ;;  %v4215_v42 = vadd.f32 %v1882_v49, %v1753_v43  ;;  %v4220_v60 = vmul.f32 %v2005_v3, %v4198_v63 }
 0xab7   :  { %vm2032_vm12 = vcmp.eq.f32.partialorder %v2031_v25, 8.507059e+37 }
 0xab8   :  { %v2010_v62 = vmul.f32 %v2890_v2, %v2009_v14  ;;  %v2608_v56 = vmul.f32 -1.702, %v4215_v42 }
 0xaba   :  { %v2892_v33 = vpop.eup %2891  ;;  %v2011_v55 = vadd.f32 %v2890_v2, %v2010_v62  ;;  %v1952_v21 = vmul.f32 1.442695, %v2608_v56 }
 0xabb   :  { %v2894_v4 = vpop.eup %2893  ;;  %v1979_v32 = vadd.f32 1.0, %v2892_v33 }
 0xabc   :  { %v2015_v61 = vsel %vm2014_vm2, %v2890_v2, %v2011_v55  ;;  %v2023_v50 = vmul.f32 %v2894_v4, %v4212_v23  ;;  %2895 = vpow2.f32 %v1952_v21  ;;  %vm2028_vm14 = vweird.f32 %v2894_v4 }
 0xabd   :  { %v2020_v37 = vsel %vm2017_vm7, %v2019_v16, %v2015_v61  ;;  %2897 = vrcp.f32 %v1979_v32  ;;  %v1884_v9 = vpop.f32.mrf.mxu2  ;;  %vm2029_vm9 = vmor %vm2027_vm1, %vm2028_vm14  ;;  %v2046_v8 = vand.u32 2147483647, %v1979_v32  ;;  %v2048_v46 = vand.u32 2147483648, %v1979_v32 }
 0xabe   :  { %v4223_v30 = vmul.f32 %v2020_v37, %v4203_v51  ;;  %v2024_v36 = vsub.f32 1.0, %v2023_v50  ;;  %v4226_v43 = vadd.f32 %v1884_v9, %v4194_v19  ;;  %v2033_v51 = vand.u32 2147483648, %v4212_v23 }
 0xabf   :  { %vm2042_vm15 = vweird.f32 %v1979_v32  ;;  %v2049_v14 = vor.u32 1.1754944e-38, %v2048_v46  ;;  %vm2047_vm11 = vcmp.eq.f32.partialorder %v2046_v8, 8.507059e+37 }
 0xac0   :  { %v2025_v31 = vmul.f32 %v2894_v4, %v2024_v36  ;;  %v2609_v12 = vmul.f32 -1.702, %v4226_v43  ;;  %v2034_v41 = vor.u32 1.1754944e-38, %v2033_v51 }
 0xac2   :  { %v2896_v52 = vpop.eup %2895  ;;  %v1954_v18 = vmul.f32 1.442695, %v2609_v12  ;;  %v2026_v63 = vadd.f32 %v2894_v4, %v2025_v31 }
 0xac3   :  { %v2898_v53 = vpop.eup %2897  ;;  %v4231_v58 = vadd.f32 1.0, %v2896_v52 }
 0xac4   :  { %v2038_v28 = vmul.f32 %v2898_v53, %v1979_v32  ;;  %2899 = vpow2.f32 %v1954_v18  ;;  %v2030_v40 = vsel %vm2029_vm9, %v2894_v4, %v2026_v63  ;;  %vm2043_vm13 = vweird.f32 %v2898_v53 }
 0xac5   :  { %2901 = vrcp.f32 %v4231_v58  ;;  %v1887_v19 = vpop.f32.mrf.mxu2  ;;  %v2035_v23 = vsel %vm2032_vm12, %v2034_v41, %v2030_v40  ;;  %vm2044_vm8 = vmor %vm2042_vm15, %vm2043_vm13  ;;  %vm2057_vm10 = vweird.f32 %v4231_v58 }
 0xac6   :  { %v2039_v54 = vsub.f32 1.0, %v2038_v28  ;;  %v4238_v15 = vadd.f32 %v1887_v19, %v4187_v45  ;;  %v4243_v56 = vmul.f32 %v2035_v23, %v4206_v11 }
 0xac8   :  { %v2040_v57 = vmul.f32 %v2898_v53, %v2039_v54  ;;  %v2610_v2 = vmul.f32 -1.702, %v4238_v15 }
 0xaca   :  { %v2900_v17 = vpop.eup %2899  ;;  %v2041_v26 = vadd.f32 %v2898_v53, %v2040_v57  ;;  %v1956_v49 = vmul.f32 1.442695, %v2610_v2 }
 0xacb   :  { %v2902_v10 = vpop.eup %2901  ;;  %v1981_v45 = vadd.f32 1.0, %v2900_v17 }
 0xacc   :  { %v2045_v44 = vsel %vm2044_vm8, %v2898_v53, %v2041_v26  ;;  %v2053_v7 = vmul.f32 %v2902_v10, %v4231_v58  ;;  %2903 = vpow2.f32 %v1956_v49  ;;  %vm2058_vm5 = vweird.f32 %v2902_v10 }
 0xacd   :  { %v2050_v24 = vsel %vm2047_vm11, %v2049_v14, %v2045_v44  ;;  %2905 = vrcp.f32 %v1981_v45  ;;  %v1889_v62 = vpop.f32.mrf.mxu2  ;;  %vm2059_vm4 = vmor %vm2057_vm10, %vm2058_vm5  ;;  %v2078_v31 = vand.u32 2147483648, %v1981_v45  ;;  %v2076_v18 = vand.u32 2147483647, %v1981_v45 }
 0xace   :  { %v4246_v39 = vmul.f32 %v2050_v24, %v4209_v1  ;;  %v2054_v33 = vsub.f32 1.0, %v2053_v7  ;;  %v4249_v55 = vadd.f32 %v1889_v62, %v4192_v35  ;;  %v2063_v1 = vand.u32 2147483648, %v4231_v58 }
 0xacf   :  { %v2061_v35 = vand.u32 2147483647, %v4231_v58  ;;  %vm2072_vm6 = vweird.f32 %v1981_v45  ;;  %v2079_v25 = vor.u32 1.1754944e-38, %v2078_v31  ;;  %vm2077_vm7 = vcmp.eq.f32.partialorder %v2076_v18, 8.507059e+37 }
 0xad0   :  { %v2055_v21 = vmul.f32 %v2902_v10, %v2054_v33  ;;  %v2611_v4 = vmul.f32 -1.702, %v4249_v55  ;;  %v2064_v53 = vor.u32 1.1754944e-38, %v2063_v1 }
 0xad1   :  { %vm2062_vm3 = vcmp.eq.f32.partialorder %v2061_v35, 8.507059e+37 }
 0xad2   :  { %v2904_v16 = vpop.eup %2903  ;;  %v1958_v32 = vmul.f32 1.442695, %v2611_v4  ;;  %v2056_v37 = vadd.f32 %v2902_v10, %v2055_v21 }
 0xad3   :  { %v2906_v61 = vpop.eup %2905  ;;  %v1982_v50 = vadd.f32 1.0, %v2904_v16 }
 0xad4   :  { %v2068_v11 = vmul.f32 %v2906_v61, %v1981_v45  ;;  %2907 = vpow2.f32 %v1958_v32  ;;  %v2060_v12 = vsel %vm2059_vm4, %v2902_v10, %v2056_v37  ;;  %vm2073_vm0 = vweird.f32 %v2906_v61 }
 0xad5   :  { %2909 = vrcp.f32 %v1982_v50  ;;  %v1892_v9 = vpop.f32.mrf.mxu2  ;;  %v2065_v19 = vsel %vm2062_vm3, %v2064_v53, %v2060_v12  ;;  %vm2074_vm2 = vmor %vm2072_vm6, %vm2073_vm0  ;;  %v2093_v14 = vand.u32 2147483648, %v1982_v50  ;;  %vm2087_vm1 = vweird.f32 %v1982_v50 }
 0xad6   :  { %v2069_v36 = vsub.f32 1.0, %v2068_v11  ;;  %v4258_v57 = vmul.f32 %v2065_v19, %v4215_v42  ;;  %v2091_v44 = vand.u32 2147483647, %v1982_v50  ;;  %v4274_v35 = vadd.f32 %v1892_v9, %v4185_v47 }
 0xad7   :  { %v2094_v33 = vor.u32 1.1754944e-38, %v2093_v14 }
 0xad8   :  { %v2070_v52 = vmul.f32 %v2906_v61, %v2069_v36  ;;  %vm2092_vm12 = vcmp.eq.f32.partialorder %v2091_v44, 8.507059e+37 }
 0xada   :  { %v2908_v63 = vpop.eup %2907  ;;  %v2071_v28 = vadd.f32 %v2906_v61, %v2070_v52  ;;  %v2612_v52 = vmul.f32 -1.702, %v4274_v35 }
 0xadb   :  { %v2910_v51 = vpop.eup %2909  ;;  %v1983_v54 = vadd.f32 1.0, %v2908_v63 }
 0xadc   :  { %v2075_v8 = vsel %vm2074_vm2, %v2906_v61, %v2071_v28  ;;  %v2083_v58 = vmul.f32 %v2910_v51, %v1982_v50  ;;  %vm2088_vm14 = vweird.f32 %v2910_v51  ;;  %v1960_v9 = vmul.f32 1.442695, %v2612_v52 }
 0xadd   :  { %v2080_v46 = vsel %vm2077_vm7, %v2079_v25, %v2075_v8  ;;  %2911 = vrcp.f32 %v1983_v54  ;;  %v1894_v40 = vpop.f32.mrf.mxu2  ;;  %vm2089_vm9 = vmor %vm2087_vm1, %vm2088_vm14  ;;  %v2108_v42 = vand.u32 2147483648, %v1983_v54  ;;  %vm2102_vm15 = vweird.f32 %v1983_v54 }
 0xade   :  { %v4261_v2 = vmul.f32 %v2080_v46, %v4226_v43  ;;  %v2084_v41 = vsub.f32 1.0, %v2083_v58  ;;  %v2106_v43 = vand.u32 2147483647, %v1983_v54  ;;  %v4277_v31 = vadd.f32 %v1894_v40, %v4201_v29 }
 0xadf   :  { %v2109_v16 = vor.u32 1.1754944e-38, %v2108_v42  ;;  %2913 = vpow2.f32 %v1960_v9 }
 0xae0   :  { %v2085_v17 = vmul.f32 %v2910_v51, %v2084_v41  ;;  %vm2107_vm11 = vcmp.eq.f32.partialorder %v2106_v43, 8.507059e+37 }
 0xae2   :  { %v2086_v10 = vadd.f32 %v2910_v51, %v2085_v17 }
 0xae3   :  { %v2912_v49 = vpop.eup %2911 }
 0xae4   :  { %v2098_v23 = vmul.f32 %v2912_v49, %v1983_v54  ;;  %v2090_v24 = vsel %vm2089_vm9, %v2910_v51, %v2086_v10  ;;  %vm2103_vm13 = vweird.f32 %v2912_v49 }
 0xae5   :  { %v1897_v45 = vpop.f32.mrf.mxu2  ;;  %v2095_v4 = vsel %vm2092_vm12, %v2094_v33, %v2090_v24  ;;  %vm2104_vm8 = vmor %vm2102_vm15, %vm2103_vm13  ;;  %v2914_v58 = vpop.eup %2913 }
 0xae6   :  { %v2099_v7 = vsub.f32 1.0, %v2098_v23  ;;  %v4266_v50 = vmul.f32 %v2095_v4, %v4238_v15  ;;  %v4280_v12 = vadd.f32 %v1897_v45, %v4176_v48  ;;  %v4301_v17 = vadd.f32 1.0, %v2914_v58 }
 0xae8   :  { %v2100_v62 = vmul.f32 %v2912_v49, %v2099_v7  ;;  %v2614_v47 = vmul.f32 -1.702, %v4280_v12 }
 0xaea   :  { %v2101_v21 = vadd.f32 %v2912_v49, %v2100_v62  ;;  %v1964_v51 = vmul.f32 1.442695, %v2614_v47 }
 0xaec   :  { %v2105_v32 = vsel %vm2104_vm8, %v2912_v49, %v2101_v21 }
 0xaed   :  { %v2110_v61 = vsel %vm2107_vm11, %v2109_v16, %v2105_v32  ;;  %v1899_v37 = vpop.f32.mrf.mxu2 }
 0xaee   :  { %v4269_v11 = vmul.f32 %v2110_v61, %v4249_v55  ;;  %v2613_v55 = vmul.f32 -1.702, %v4277_v31  ;;  %v4288_v18 = vadd.f32 %v1899_v37, %v4196_v20 }
 0xaf0   :  { %v2251_v1 = vpack.c.bf16 %v4269_v11, %v4266_v50  ;;  %v1962_v63 = vmul.f32 1.442695, %v2613_v55  ;;  %v2615_v48 = vmul.f32 -1.702, %v4288_v18  ;;  %v4598_v50 = vpack.c.bf16 %v4223_v30, %v4220_v60  ;;  %v1707_v11 = vpop.permute.xlu2 %1706 }
 0xaf1   :  { %v3015_v30 = vmov 109  }
 0xaf2   :  { %2915 = vpow2.f32 %v1962_v63  ;;  %v1966_v20 = vmul.f32 1.442695, %v2615_v48  ;;  %2772 = vset.pattern.permute.xlu1 %v3015_v30  ;;  %2773 = vset.pattern.permute.xlu0 %v3015_v30 }
 0xaf3   :  { %2917 = vpow2.f32 %v1964_v51  ;;  %2771 = vset.pattern.permute.xlu2 %v3015_v30 }
 0xaf5   :  { %v1902_v36 = vpop.f32.mrf.mxu2 }
 0xaf6   :  { %v4284_v15 = vadd.f32 %v1902_v36, %v4190_v34 }
 0xaf8   :  { %v2616_v53 = vmul.f32 -1.702, %v4284_v15  ;;  %v2916_v46 = vpop.eup %2915 }
 0xaf9   :  { %v2918_v40 = vpop.eup %2917  ;;  %v4303_v23 = vadd.f32 1.0, %v2916_v46 }
 0xafa   :  { %v1968_v19 = vmul.f32 1.442695, %v2616_v53  ;;  %v4305_v45 = vadd.f32 1.0, %v2918_v40 }
 0xafb   :  { %vm2132_vm15 = vweird.f32 %v4303_v23 }
 0xafc   :  { %vm2147_vm1 = vweird.f32 %v4305_v45 }
 0xafd   :  { %v1904_v29 = vpop.f32.mrf.mxu2 }
 0xafe   :  { %v4294_v28 = vadd.f32 %v1904_v29, %v4178_v27 }
 0xb00   :  { %v2617_v34 = vmul.f32 -1.702, %v4294_v28 }
 0xb02   :  { %v1970_v25 = vmul.f32 1.442695, %v2617_v34 }
 0xb04   :  { %2919 = vpow2.f32 %v1970_v25 }
 0xb05   :  { %2921 = vpow2.f32 %v1968_v19  ;;  %v1907_v54 = vpop.f32.mrf.mxu2 }
 0xb06   :  { %2923 = vpow2.f32 %v1966_v20  ;;  %v4298_v8 = vadd.f32 %v1907_v54, %v4180_v0 }
 0xb08   :  { %v2618_v27 = vmul.f32 -1.702, %v4298_v8 }
 0xb0a   :  { %v2920_v41 = vpop.eup %2919  ;;  %v1972_v49 = vmul.f32 1.442695, %v2618_v27 }
 0xb0b   :  { %v2922_v10 = vpop.eup %2921  ;;  %v4307_v44 = vadd.f32 1.0, %v2920_v41  ;;  %v2136_v41 = vand.u32 2147483647, %v4303_v23 }
 0xb0c   :  { %v2924_v14 = vpop.eup %2923  ;;  %2925 = vpow2.f32 %v1972_v49  ;;  %v4310_v7 = vadd.f32 1.0, %v2922_v10  ;;  %v2151_v49 = vand.u32 2147483647, %v4305_v45  ;;  %v2153_v10 = vand.u32 2147483648, %v4305_v45 }
 0xb0d   :  { %v1909_v0 = vpop.f32.mrf.mxu2  ;;  %2927 = vrcp.f32 %v4301_v17  ;;  %v4316_v24 = vadd.f32 1.0, %v2924_v14  ;;  %vm2192_vm2 = vweird.f32 %v4307_v44 }
 0xb0e   :  { %v4313_v42 = vadd.f32 %v1909_v0, %v4170_v38  ;;  %2929 = vrcp.f32 %v4303_v23  ;;  %vm2177_vm10 = vweird.f32 %v4310_v7 }
 0xb0f   :  { %2931 = vrcp.f32 %v4305_v45  ;;  %v2166_v0 = vand.u32 2147483647, %v4316_v24  ;;  %vm2162_vm0 = vweird.f32 %v4316_v24 }
 0xb10   :  { %v2619_v62 = vmul.f32 -1.702, %v4313_v42  ;;  %2933 = vrcp.f32 %v4307_v44 }
 0xb11   :  { %2935 = vrcp.f32 %v4310_v7 }
 0xb12   :  { %v2926_v43 = vpop.eup %2925  ;;  %v1974_v33 = vmul.f32 1.442695, %v2619_v62  ;;  %2937 = vrcp.f32 %v4316_v24  ;;  %v2168_v62 = vand.u32 2147483648, %v4316_v24 }
 0xb13   :  { %v4323_v21 = vadd.f32 1.0, %v2926_v43  ;;  %v4325_v38 = vpop.eup %2927 }
 0xb14   :  { %2939 = vpow2.f32 %v1974_v33  ;;  %v4327_v4 = vpop.eup %2929  ;;  %v2113_v36 = vmul.f32 %v4325_v38, %v4301_v17  ;;  %vm2118_vm12 = vweird.f32 %v4325_v38 }
 0xb15   :  { %2941 = vrcp.f32 %v4323_v21  ;;  %v4330_v16 = vpop.eup %2931  ;;  %v2128_v55 = vmul.f32 %v4327_v4, %v4303_v23  ;;  %vm2133_vm14 = vweird.f32 %v4327_v4  ;;  %vm2207_vm9 = vweird.f32 %v4323_v21 }
 0xb16   :  { %v4332_v32 = vpop.eup %2933  ;;  %v2143_v53 = vmul.f32 %v4330_v16, %v4305_v45  ;;  %v2114_v34 = vsub.f32 1.0, %v2113_v36  ;;  %vm2148_vm4 = vweird.f32 %v4330_v16 }
 0xb17   :  { %v4334_v61 = vpop.eup %2935  ;;  %v2188_v47 = vmul.f32 %v4332_v32, %v4307_v44  ;;  %v2129_v19 = vsub.f32 1.0, %v2128_v55  ;;  %vm2193_vm7 = vweird.f32 %v4332_v32 }
 0xb18   :  { %v4336_v37 = vpop.eup %2937  ;;  %v2173_v29 = vmul.f32 %v4334_v61, %v4310_v7  ;;  %v2144_v54 = vsub.f32 1.0, %v2143_v53  ;;  %v4359_v40 = vmul.f32 %v4325_v38, %v2114_v34  ;;  %vm2178_vm6 = vweird.f32 %v4334_v61  ;;  %vm4410_vm11 = vmor %vm2192_vm2, %vm2193_vm7 }
 0xb19   :  { %v2158_v48 = vmul.f32 %v4336_v37, %v4316_v24  ;;  %v2189_v20 = vsub.f32 1.0, %v2188_v47  ;;  %v2130_v14 = vmul.f32 %v4327_v4, %v2129_v19  ;;  %vm2163_vm5 = vweird.f32 %v4336_v37 }
 0xb1a   :  { %v2940_v52 = vpop.eup %2939  ;;  %v2174_v58 = vsub.f32 1.0, %v2173_v29  ;;  %v2145_v36 = vmul.f32 %v4330_v16, %v2144_v54  ;;  %v2213_v29 = vand.u32 2147483648, %v4323_v21 }
 0xb1b   :  { %v4344_v9 = vpop.eup %2941  ;;  %v4350_v63 = vadd.f32 1.0, %v2940_v52  ;;  %v2159_v46 = vsub.f32 1.0, %v2158_v48  ;;  %v2190_v43 = vmul.f32 %v4332_v32, %v2189_v20  ;;  %v2196_v20 = vand.u32 2147483647, %v4307_v44 }
 0xb1c   :  { %v2203_v51 = vmul.f32 %v4344_v9, %v4323_v21  ;;  %v2175_v52 = vmul.f32 %v4334_v61, %v2174_v58  ;;  %vm2208_vm3 = vweird.f32 %v4344_v9  ;;  %v2214_v54 = vor.u32 1.1754944e-38, %v2213_v29 }
 0xb1d   :  { %2943 = vrcp.f32 %v4350_v63  ;;  %v2160_v55 = vmul.f32 %v4336_v37, %v2159_v46  ;;  %v2191_v48 = vadd.f32 %v4332_v32, %v2190_v43  ;;  %vm4392_vm13 = vmor %vm2207_vm9, %vm2208_vm3  ;;  %v2228_v58 = vand.u32 2147483648, %v4350_v63 }
 0xb1e   :  { %v2204_v25 = vsub.f32 1.0, %v2203_v51  ;;  %v2211_v51 = vand.u32 2147483647, %v4323_v21  ;;  %v2176_v19 = vadd.f32 %v4334_v61, %v2175_v52  ;;  %v2181_v52 = vand.u32 2147483647, %v4310_v7  ;;  %vm4418_vm3 = vmor %vm2177_vm10, %vm2178_vm6 }
 0xb1f   :  { %v2161_v43 = vadd.f32 %v4336_v37, %v2160_v55  ;;  %v2195_v55 = vsel %vm4410_vm11, %v4332_v32, %v2191_v48  ;;  %vm2222_vm2 = vweird.f32 %v4350_v63  ;;  %v2229_v3 = vor.u32 1.1754944e-38, %v2228_v58 }
 0xb20   :  { %v2205_v27 = vmul.f32 %v4344_v9, %v2204_v25  ;;  %v2198_v25 = vand.u32 2147483648, %v4307_v44  ;;  %vm2212_vm9 = vcmp.eq.f32.partialorder %v2211_v51, 8.507059e+37  ;;  %v2146_v44 = vadd.f32 %v4330_v16, %v2145_v36 }
 0xb21   :  { %vm2197_vm10 = vcmp.eq.f32.partialorder %v2196_v20, 8.507059e+37  ;;  %v2131_v59 = vadd.f32 %v4327_v4, %v2130_v14  ;;  %v2116_v51 = vadd.f32 %v4325_v38, %v4359_v40  ;;  %vm2117_vm11 = vweird.f32 %v4301_v17 }
 0xb22   :  { %v2206_v47 = vadd.f32 %v4344_v9, %v2205_v27  ;;  %v2226_v27 = vand.u32 2147483647, %v4350_v63  ;;  %v2123_v20 = vand.u32 2147483648, %v4301_v17 }
 0xb23   :  { %v2944_v33 = vpop.eup %2943 }
 0xb24   :  { %v2218_v53 = vmul.f32 %v2944_v33, %v4350_v63  ;;  %v2210_v21 = vsel %vm4392_vm13, %v4344_v9, %v2206_v47  ;;  %vm2223_vm8 = vweird.f32 %v2944_v33  ;;  %vm2227_vm6 = vcmp.eq.f32.partialorder %v2226_v27, 8.507059e+37  ;;  %vm4436_vm13 = vmor %vm2162_vm0, %vm2163_vm5  ;;  %v2270_v9 = vpop.permute.xlu0 %2269 }
 0xb25   :  { %v2215_v29 = vsel %vm2212_vm9, %v2214_v54, %v2210_v21  ;;  %vm2224_vm7 = vmor %vm2222_vm2, %vm2223_vm8  ;;  %vm2182_vm8 = vcmp.eq.f32.partialorder %v2181_v52, 8.507059e+37  ;;  %vm2167_vm0 = vcmp.eq.f32.partialorder %v2166_v0, 8.507059e+37  ;;  %v2121_v0 = vand.u32 2147483647, %v4301_v17 }
 0xb26   :  { %v2219_v34 = vsub.f32 1.0, %v2218_v53  ;;  %v2183_v53 = vand.u32 2147483648, %v4310_v7  ;;  %v2180_v7 = vsel %vm4418_vm3, %v4334_v61, %v2176_v19  ;;  %v2165_v61 = vsel %vm4436_vm13, %v4336_v37, %v2161_v43  ;;  %vm4452_vm5 = vmor %vm2147_vm1, %vm2148_vm4 }
 0xb27   :  { %v2138_v19 = vand.u32 2147483648, %v4303_v23  ;;  %vm4470_vm4 = vmor %vm2132_vm15, %vm2133_vm14  ;;  %vm2152_vm1 = vcmp.eq.f32.partialorder %v2151_v49, 8.507059e+37  ;;  %vm2137_vm15 = vcmp.eq.f32.partialorder %v2136_v41, 8.507059e+37  ;;  %vm2122_vm3 = vcmp.eq.f32.partialorder %v2121_v0, 8.507059e+37 }
 0xb28   :  { %v2220_v46 = vmul.f32 %v2944_v33, %v2219_v34  ;;  %v2199_v34 = vor.u32 1.1754944e-38, %v2198_v25  ;;  %v2184_v63 = vor.u32 1.1754944e-38, %v2183_v53  ;;  %vm2119_vm14 = vmor %vm2117_vm11, %vm2118_vm12  ;;  %v2266_v53 = vpop.permute.xlu2 %2265  ;;  %vm4599_vm12 = vcmask 261120  }
 0xb29   :  { %v2139_v58 = vor.u32 1.1754944e-38, %v2138_v19  ;;  %vm4600_vm9 = vmmov %vm4599_vm12 }
 0xb2a   :  { %v2221_v47 = vadd.f32 %v2944_v33, %v2220_v46  ;;  %v2200_v36 = vsel %vm2197_vm10, %v2199_v34, %v2195_v55  ;;  %v2185_v37 = vsel %vm2182_vm8, %v2184_v63, %v2180_v7  ;;  %v2992_v55 = vld [vmem:[%s4539_s1 + $0x8] sm:$0xff]  ;;  %v1712_v7 = vmul.f32 %v1707_v11, %v4135_v13  ;;  %vm4601_vm2 = vmmov %vm4600_vm9 }
 0xb2b   :  { %v2244_v25 = vmul.f32 %v2185_v37, %v4284_v15  ;;  %2312 = vperm.xlu1 %2772, %v2992_v55  }
 0xb2c   :  { %v2225_v26 = vsel %vm2224_vm7, %v2944_v33, %v2221_v47  ;;  %v2246_v33 = vmul.f32 %v2215_v29, %v4298_v8  ;;  %v2150_v8 = vsel %vm4452_vm5, %v4330_v16, %v2146_v44  ;;  %v2154_v16 = vor.u32 1.1754944e-38, %v2153_v10  ;;  %v2993_v47 = vld [vmem:[%s4539_s1 + $0x18] sm:$0xff]  ;;  %v2994_v29 = vld [vmem:[%s4539_s1] sm:$0xff]  ;;  %vm4602_vm7 = vmmov %vm4601_vm2 }
 0xb2d   :  { %v2230_v48 = vsel %vm2227_vm6, %v2229_v3, %v2225_v26  ;;  %v2169_v26 = vor.u32 1.1754944e-38, %v2168_v62  ;;  %v2120_v10 = vsel %vm2119_vm14, %v4325_v38, %v2116_v51  ;;  %2320 = vperm.xlu0 %2773, %v2993_v47   ;;  %2308 = vperm.xlu2 %2771, %v2994_v29   ;;  %v3016_v3 = vmov 111  }
 0xb2e   :  { %v2247_v14 = vmul.f32 %v2230_v48, %v4313_v42  ;;  %v2245_v42 = vmul.f32 %v2200_v36, %v4294_v28  ;;  %v2135_v28 = vsel %vm4470_vm4, %v4327_v4, %v2131_v59  ;;  %v2155_v21 = vsel %vm2152_vm1, %v2154_v16, %v2150_v8 }
 0xb2f   :  { %v2170_v24 = vsel %vm2167_vm0, %v2169_v26, %v2165_v61  ;;  %v2124_v4 = vor.u32 1.1754944e-38, %v2123_v20  ;;  %v2140_v27 = vsel %vm2137_vm15, %v2139_v58, %v2135_v28  ;;  %v2242_v45 = vmul.f32 %v2155_v21, %v4280_v12 }
 0xb30   :  { %v2255_v40 = vpack.c.bf16 %v2247_v14, %v2246_v33  ;;  %v2243_v17 = vmul.f32 %v2170_v24, %v4288_v18  ;;  %v2254_v46 = vpack.c.bf16 %v2245_v42, %v2244_v25  ;;  %v2241_v49 = vmul.f32 %v2140_v27, %v4277_v31  ;;  %v2622_v31 = vld [vmem:[%s4547_s8 + $0x4] sm:$0xf]  ;;  %v2262_v44 = vpop.permute.xlu2 %2261  ;;  %v1695_v33 = vpop.permute.xlu0 %1694 }
 0xb31   :  { %v2125_v15 = vsel %vm2122_vm3, %v2124_v4, %v2120_v10  ;;  %v4596_v18 = vpack.c.bf16 %v4261_v2, %v4258_v57  ;;  %v4597_v12 = vpack.c.bf16 %v4246_v39, %v4243_v56  ;;  %v2626_v57 = vld [vmem:[%s4547_s8 + $0x14] sm:$0xf]  ;;  %v2661_v56 = vld [vmem:[%s4547_s8 + $0x18] sm:$0xf0]  ;;  %v3017_v26 = vmov 110  }
 0xb32   :  { %2284 = vmatpush.bf16.msrb.mxu1 %v2255_v40  ;;  %v2253_v43 = vpack.c.bf16 %v2243_v17, %v2242_v45  ;;  %v2240_v52 = vmul.f32 %v2125_v15, %v4274_v35  ;;  %v2660_v35 = vld [vmem:[%s4547_s8 + $0x8] sm:$0xf0]  ;;  %v2627_v39 = vor.u32 %v2661_v56, %v2626_v57  ;;  %v1709_v37 = vmul.f32 %v1695_v33, %v4142_v6 }
 0xb33   :  { %v2623_v23 = vor.u32 %v2660_v35, %v2622_v31  ;;  %2774 = vset.pattern.permute.xlu1 %v3016_v3 }
 0xb34   :  { %v2252_v38 = vpack.c.bf16 %v2241_v49, %v2240_v52  ;;  %2397 = vperm.xlu1 %2774, %v2994_v29  }
 0xb35   :  { %2776 = vset.pattern.permute.xlu0 %v3017_v26 }
 0xb36   :  { %2285 = vmatpush.bf16.msrb.mxu1 %v2254_v46  ;;  %2426 = vperm.xlu0 %2776, %v2994_v29  }
 0xb3a   :  { %2286 = vmatpush.bf16.msrb.mxu1 %v2253_v43 }
 0xb3e   :  { %2287 = vmatpush.bf16.msrb.mxu1 %v2252_v38 }
 0xb42   :  { %2288 = vmatpush.bf16.msrb.mxu1 %v2251_v1  ;;  %v1703_v1 = vpop.permute.xlu1 %1702 }
 0xb43   :  { %v1711_v36 = vmul.f32 %v1703_v1, %v4133_v22  ;;  %v2995_v22 = vld [vmem:[%s4539_s1 + $0x10] sm:$0xff] }
 0xb44   :  { %2316 = vperm.xlu2 %2771, %v2995_v22   ;;  %2405 = vperm.xlu1 %2774, %v2995_v22  }
 0xb46   :  { %2289 = vmatpush.bf16.msrb.mxu1 %v4596_v18 }
 0xb4a   :  { %2290 = vmatpush.bf16.msrb.mxu1 %v4597_v12  ;;  %v1699_v60 = vpop.permute.xlu1 %1698 }
 0xb4b   :  { %v1710_v14 = vmul.f32 %v1699_v60, %v4138_v5 }
 0xb4c   :  { %2775 = vset.pattern.permute.xlu2 %v3016_v3 }
 0xb4d   :  { %2401 = vperm.xlu2 %2775, %v2992_v55  }
 0xb4e   :  { %2291 = vmatpush.bf16.msrb.mxu1 %v4598_v50 }
 0xb51   :  { %2292 = vmatmul.bf16.vlgmr.msrb.gmra.mxu1 %v2623_v23 }
 0xb52   :  { %v2258_v63 = vpop.permute.xlu1 %2257 }
 0xb55   :  { %2409 = vperm.xlu2 %2775, %v2993_v47  }
 0xb61   :  { %2297 = vmatmul.bf16.gmra.mxu1 %v2627_v39 }
 0xb87   :  { %v2309_v5 = vpop.permute.xlu2 %2308 }
 0xb9d   :  { %v2313_v20 = vpop.permute.xlu1 %2312 }
 0xb9e   :  { %v2317_v21 = vpop.permute.xlu2 %2316 }
 0xb9f   :  { %v2321_v43 = vpop.permute.xlu0 %2320 }
 0xbce   :  { %v2293_v2 = vpop.f32.mrf.mxu1 }
 0xbcf   :  { %v2294_v51 = vadd.f32 %v2293_v2, %v2258_v63 }
 0xbd1   :  { %v2303_v8 = vadd.f32 %v2294_v51, %v1709_v37 }
 0xbd6   :  { %v2295_v41 = vpop.f32.mrf.mxu1 }
 0xbd7   :  { %v2296_v48 = vadd.f32 %v2295_v41, %v2262_v44 }
 0xbd9   :  { %v2304_v13 = vadd.f32 %v2296_v48, %v1710_v14 }
 0xbde   :  { %v2298_v54 = vpop.f32.mrf.mxu1 }
 0xbdf   :  { %v2299_v59 = vadd.f32 %v2298_v54, %v2266_v53 }
 0xbe1   :  { %v2305_v19 = vadd.f32 %v2299_v59, %v1711_v36 }
 0xbe6   :  { %v2300_v34 = vpop.f32.mrf.mxu1 }
 0xbe7   :  { %v2301_v32 = vadd.f32 %v2300_v34, %v2270_v9  ;;  %v2398_v9 = vpop.permute.xlu1 %2397 }
 0xbe9   :  { %v2306_v61 = vadd.f32 %v2301_v32, %v1712_v7 }
 0xbeb   :  { %2343 = vmatpush.msra.mxu0 %v2306_v61 }
 0xbed   :  { %2344 = vmatpush.msra.mxu0 %v2305_v19 }
 0xbef   :  { %2345 = vmatpush.msra.mxu0 %v2304_v13  ;;  %v2406_v32 = vpop.permute.xlu1 %2405 }
 0xbf1   :  { %2346 = vmatpush.msra.mxu0 %v2303_v8 }
 0xbf2   :  { %2628 = vmatmul.msk.f32.vlgmr.msra.gmra.mxu0 %vm4599_vm12, %v2994_v29 }
 0xbfa   :  { %2629 = vmatmul.msk.f32.gmra.mxu0 %vm4600_vm9, %v2992_v55  ;;  %v2402_v55 = vpop.permute.xlu2 %2401 }
 0xc02   :  { %2630 = vmatmul.msk.f32.gmra.mxu0 %vm4601_vm2, %v2995_v22  ;;  %v2410_v14 = vpop.permute.xlu2 %2409 }
 0xc0a   :  { %2631 = vmatmul.msk.f32.gmra.mxu0 %vm4602_vm7, %v2993_v47 }
 0xc6f   :  { %v2348_v6 = vpop.f32.mrf.mxu0 }
 0xc70   :  { %v2349_v42 = vadd.f32 %v2348_v6, %v2309_v5  ;;  %v2427_v5 = vpop.permute.xlu0 %2426 }
 0xc72   :  { %v2360_v40 = vmul.f32 %v2349_v42, %v2349_v42 }
 0xc74   :  { %v2364_v16 = vmul.f32 %v2360_v40, %v2349_v42 }
 0xc76   :  { %v2368_v28 = vmul.f32 0.044715, %v2364_v16 }
 0xc77   :  { %v2351_v62 = vpop.f32.mrf.mxu0 }
 0xc78   :  { %v2352_v24 = vadd.f32 %v2351_v62, %v2313_v20  ;;  %v2372_v46 = vadd.f32 %v2368_v28, %v2349_v42 }
 0xc7a   :  { %v2361_v0 = vmul.f32 %v2352_v24, %v2352_v24  ;;  %v2376_v49 = vmul.f32 0.7978846, %v2372_v46 }
 0xc7c   :  { %v2365_v25 = vmul.f32 %v2361_v0, %v2352_v24 }
 0xc7e   :  { %v2369_v58 = vmul.f32 0.044715, %v2365_v25 }
 0xc7f   :  { %v2354_v10 = vpop.f32.mrf.mxu0 }
 0xc80   :  { %v2355_v17 = vadd.f32 %v2354_v10, %v2317_v21  ;;  %v2373_v4 = vadd.f32 %v2369_v58, %v2352_v24 }
 0xc82   :  { %v2362_v27 = vmul.f32 %v2355_v17, %v2355_v17  ;;  %v2377_v45 = vmul.f32 0.7978846, %v2373_v4 }
 0xc84   :  { %v2366_v15 = vmul.f32 %v2362_v27, %v2355_v17  ;;  %2945 = vtanh.f32 %v2377_v45 }
 0xc85   :  { %2947 = vtanh.f32 %v2376_v49 }
 0xc86   :  { %v2370_v52 = vmul.f32 0.044715, %v2366_v15 }
 0xc87   :  { %v2357_v38 = vpop.f32.mrf.mxu0 }
 0xc88   :  { %v2358_v18 = vadd.f32 %v2357_v38, %v2321_v43  ;;  %v2374_v12 = vadd.f32 %v2370_v52, %v2355_v17 }
 0xc8a   :  { %v2363_v31 = vmul.f32 %v2358_v18, %v2358_v18  ;;  %v2378_v35 = vmul.f32 0.7978846, %v2374_v12  ;;  %v2946_v23 = vpop.eup %2945 }
 0xc8b   :  { %v2948_v57 = vpop.eup %2947  ;;  %v2385_v39 = vadd.f32 1.0, %v2946_v23 }
 0xc8c   :  { %v2367_v50 = vmul.f32 %v2363_v31, %v2358_v18  ;;  %2949 = vtanh.f32 %v2378_v35  ;;  %v2384_v11 = vadd.f32 1.0, %v2948_v57 }
 0xc8d   :  { %v2389_v53 = vmul.f32 0.5, %v2385_v39 }
 0xc8e   :  { %v2371_v56 = vmul.f32 0.044715, %v2367_v50  ;;  %v2388_v60 = vmul.f32 0.5, %v2384_v11 }
 0xc8f   :  { %v2393_v47 = vmul.f32 %v2389_v53, %v2352_v24 }
 0xc90   :  { %v2375_v2 = vadd.f32 %v2371_v56, %v2358_v18  ;;  %v2392_v44 = vmul.f32 %v2388_v60, %v2349_v42 }
 0xc91   :  { %v2413_v7 = vmul.f32 %v2402_v55, %v2393_v47 }
 0xc92   :  { %v2950_v1 = vpop.eup %2949  ;;  %v2379_v41 = vmul.f32 0.7978846, %v2375_v2  ;;  %v2412_v63 = vmul.f32 %v2398_v9, %v2392_v44 }
 0xc93   :  { %v2386_v54 = vadd.f32 1.0, %v2950_v1 }
 0xc94   :  { %2951 = vtanh.f32 %v2379_v41  ;;  %v2416_v61 = vadd.f32 %v2413_v7, %v2412_v63 }
 0xc95   :  { %v2390_v30 = vmul.f32 0.5, %v2386_v54 }
 0xc97   :  { %v2394_v34 = vmul.f32 %v2390_v30, %v2355_v17 }
 0xc99   :  { %v2414_v36 = vmul.f32 %v2406_v32, %v2394_v34 }
 0xc9a   :  { %v2952_v29 = vpop.eup %2951 }
 0xc9b   :  { %v2387_v59 = vadd.f32 1.0, %v2952_v29  ;;  %v2417_v51 = vadd.f32 %v2416_v61, %v2414_v36 }
 0xc9d   :  { %v2391_v48 = vmul.f32 0.5, %v2387_v59 }
 0xc9f   :  { %v2395_v33 = vmul.f32 %v2391_v48, %v2358_v18 }
 0xca1   :  { %v2415_v19 = vmul.f32 %v2410_v14, %v2395_v33 }
 0xca3   :  { %v2418_v3 = vadd.f32 %v2417_v51, %v2415_v19 }
 0xca5   :  { %v2419_v26 = vrot.slane %v2418_v3, 4 }
 0xca7   :  { %v2420_v37 = vadd.f32 %v2419_v26, %v2418_v3 }
 0xca9   :  { %v2421_v13 = vrot.slane %v2420_v37, 2 }
 0xcab   :  { %v2422_v22 = vadd.f32 %v2421_v13, %v2420_v37 }
 0xcad   :  { %v2423_v8 = vrot.slane %v2422_v22, 1 }
 0xcaf   :  { %v2424_v6 = vadd.f32 %v2423_v8, %v2422_v22 }
 0xcb1   :  { %v2429_v42 = vadd.f32 %v2427_v5, %v2424_v6 }
 0xcb3   :  { %2430 = vst [vmem:[%s4548_s9] sm:$0x1] %v2429_v42 }

</bundles_post_ra>
